<compile_context>
chip_gen: v6e
topology: v6e:2x2x1
jax: 0.10.0
libtpu: 0.0.40
codegen_flags: <defaults>
</compile_context>

<pallas_src>
import jax
import jax.numpy as jnp
from jax import lax
from jax.experimental import pallas as pl
from jax.experimental.pallas import tpu as pltpu

KK_PAD = 32                       # contraction (tap) dim padded 25 -> 32
_VMEM_BUDGET = 24 * 1024 * 1024   # target per-grid-step live VMEM
_VMEM_LIMIT = 48 * 1024 * 1024    # scoped VMEM limit (< physical on v5e/v6e/v7x)


def _choose_tiles(B, H, W, Cout, pad):
    """Pick (Bt, Sh): images per grid step and output-row strip height."""
    def step_bytes(Bt, Sh):
        inp = 2 * Bt * (H + 2 * pad) * W * 4        # resident input (dbl-buffered)
        out = 2 * Bt * Cout * Sh * W * 4            # output block (dbl-buffered)
        taps = KK_PAD * Sh * W * 4                  # tap scratch
        return inp + out + taps + (1 << 20)         # + slack for temporaries

    # Strip heights: full image first, else divisors of H that keep the output
    # block's lane dim (Sh*W) a multiple of 128 (unmasked vst, free reshape).
    sh_cands = [H] + [d for d in range(H - 1, 0, -1)
                      if H % d == 0 and (d * W) % 128 == 0]
    bt_cands = [d for d in range(min(B, 8), 0, -1) if B % d == 0]
    for Sh in sh_cands:
        for Bt in bt_cands:
            if step_bytes(Bt, Sh) <= _VMEM_BUDGET:
                return Bt, Sh
    # TODO(synk): add column tiling for extreme W where no row strip fits VMEM.
    return 1, sh_cands[-1]


def _make_pre_kernel(H, W, K, Sh, Bt, Cout):
    pad = K // 2
    n_taps = K * K

    def kernel(x_ref, w_ref, o_ref, taps_ref):
        # x_ref   : (Bt, 1, H+2*pad, W)  row-zero-padded images, resident over strips
        # w_ref   : (Cout, KK_PAD)       flattened conv weights, taps padded to 32
        # o_ref   : (Bt, Cout, Sh*W)     channels-first, lane-dense output strip
        # taps_ref: (KK_PAD, Sh, W)      VMEM scratch: "im2col" slab for one image
        s = pl.program_id(1)
        r0 = s * Sh
        if Sh % 8 == 0:
            r0 = pl.multiple_of(r0, 8)

        # Zero the contraction-padding rows 25..31 once per step (scratch is
        # per-core; a core may never see program_id == 0 under megacore).
        taps_ref[pl.ds(n_taps, KK_PAD - n_taps)] = jnp.zeros(
            (KK_PAD - n_taps, Sh, W), jnp.float32)

        # Hoisted column-validity masks: one per dx != 0 (implicit W padding).
        xx = lax.broadcasted_iota(jnp.int32, (Sh, W), 1)
        col_ok = {dx: (xx + dx >= 0) & (xx + dx < W)
                  for dx in range(-pad, pad + 1) if dx != 0}

        w = w_ref[...]                                        # (Cout, 32)
        for b in range(Bt):                                   # static unroll
            for kh in range(K):
                # dy = kh - pad is absorbed by the wrapper's row zero-padding:
                # padded rows [r0+kh, r0+kh+Sh) == unpadded rows shifted by dy
                # (zeros outside the image), so no row mask is needed.
                base = x_ref[b, 0, pl.ds(r0 + kh, Sh), :]     # (Sh, W)
                for kw in range(K):
                    dx = kw - pad
                    if dx == 0:
                        taps_ref[kh * K + kw] = base
                    else:
                        shifted = pltpu.roll(base, (-dx) % W, 1)   # lane roll (XLU)
                        taps_ref[kh * K + kw] = jnp.where(
                            col_ok[dx], shifted, 0.0)
            # (Cout,32) x (32, Sh*W) MXU matmul; reshape is free when W%128==0.
            taps = taps_ref[...].reshape(KK_PAD, Sh * W)
            o_ref[b] = jnp.dot(w, taps, preferred_element_type=jnp.float32)

    return kernel


def pre_forward(x, hpf_weight):
    """x: (B, 1, H, W), hpf_weight: (Cout, 1, 5, 5) -> (B, Cout, H, W) f32."""
    B, Cin, H, W = x.shape
    Cout, _, K, K2 = hpf_weight.shape
    assert Cin == 1 and K == 5 and K2 == 5
    pad = K // 2
    HW = H * W
    Bt, Sh = _choose_tiles(B, H, W, Cout, pad)

    # Vertical conv padding applied once in HBM (single-channel input: ~1/30 of
    # the output traffic); horizontal padding is done in-kernel via lane rolls
    # + static masks so the lane dimension stays exactly W.
    xp = jnp.pad(x.astype(jnp.float32),
                 ((0, 0), (0, 0), (pad, pad), (0, 0)))            # (B,1,H+4,W)
    w_flat = jnp.pad(hpf_weight.reshape(Cout, K * K).astype(jnp.float32),
                     ((0, 0), (0, KK_PAD - K * K)))               # (Cout, 32)

    out = pl.pallas_call(
        _make_pre_kernel(H, W, K, Sh, Bt, Cout),
        out_shape=jax.ShapeDtypeStruct((B, Cout, HW), jnp.float32),
        grid_spec=pltpu.PrefetchScalarGridSpec(
            num_scalar_prefetch=0,
            grid=(B // Bt, H // Sh),
            in_specs=[
                pl.BlockSpec((Bt, 1, H + 2 * pad, W),
                             lambda bg, s: (bg, 0, 0, 0)),   # resident over strips
                pl.BlockSpec((Cout, KK_PAD),
                             lambda bg, s: (0, 0)),          # resident weights
            ],
            out_specs=pl.BlockSpec((Bt, Cout, Sh * W),
                                   lambda bg, s: (bg, 0, s)),
            scratch_shapes=[pltpu.VMEM((KK_PAD, Sh, W), jnp.float32)],
        ),
        compiler_params=pltpu.CompilerParams(
            dimension_semantics=("parallel", "parallel"),
            vmem_limit_bytes=_VMEM_LIMIT),
    )(xp, w_flat)

    # (B, Cout, H*W) -> NCHW (B, Cout, H, W): pure metadata reshape, no transpose.
    return out.reshape(B, Cout, H, W)


if __name__ == "__main__":
    key = jax.random.PRNGKey(0)
    kx, kw = jax.random.split(key)

    B, H, W = 2, 16, 16
    Cout, K = 30, 5

    x = jax.random.normal(kx, (B, 1, H, W), dtype=jnp.float32)

    # Deterministic synthetic stand-in for the fixed SRM/HPF filter bank
    # (real module loads 30 normalized high-pass filters; shapes identical).
    hpf_weight = jax.random.normal(kw, (Cout, 1, K, K), dtype=jnp.float32)

    y = pre_forward(x, hpf_weight)
    y = jax.block_until_ready(y)

    # Reference check against XLA's conv (same semantics as nn.Conv2d, pad=2).
    y_ref = jax.lax.conv_general_dilated(
        x, hpf_weight, window_strides=(1, 1),
        padding=((2, 2), (2, 2)),
        dimension_numbers=("NCHW", "OIHW", "NCHW"))
    assert y.shape == (B, Cout, H, W)
    assert jnp.allclose(y, y_ref, atol=1e-4, rtol=1e-4)

    print("KERNEL_OK")
</pallas_src>

<mosaic_0001>
module attributes {stable_mosaic.version = 11 : i64} {
  func.func @kernel(%arg0: i32, %arg1: i32, %arg2: memref<2x1x20x16xf32, #tpu.memory_space<vmem>>, %arg3: memref<30x32xf32, #tpu.memory_space<vmem>>, %arg4: memref<2x30x256xf32, #tpu.memory_space<vmem>>, %arg5: memref<32x16x16xf32, #tpu.memory_space<vmem>>) attributes {dimension_semantics = [#tpu.dimension_semantics<parallel>, #tpu.dimension_semantics<parallel>], iteration_bounds = array<i64: 1, 1>, scalar_prefetch = 0 : i64, scratch_operands = 1 : i64, tpu.core_type = #tpu.core_type<tc>, window_params = [{transform_indices = @transform_0, window_bounds = array<i64: 2, 1, 20, 16>}, {pipeline_mode = #tpu.pipeline_mode<synchronous>, transform_indices = @transform_1, window_bounds = array<i64: 30, 32>}, {transform_indices = @transform_2, window_bounds = array<i64: 2, 30, 256>}]} {
    %c16_i32 = arith.constant 16 : i32
    %0 = arith.muli %arg1, %c16_i32 : i32
    %1 = tpu.assume_multiple %0, 8 : i32
    %cst = arith.constant 0.000000e+00 : f32
    %2 = vector.broadcast %cst : f32 to vector<7x16x16xf32>
    %c25 = arith.constant 25 : index
    %c0 = arith.constant 0 : index
    %c0_0 = arith.constant 0 : index
    %3 = vector.load %arg5[%c25, %c0, %c0_0] : memref<32x16x16xf32, #tpu.memory_space<vmem>>, vector<7x16x16xf32>
    tpu.vector_store %arg5[%c25, %c0, %c0_0], %2 {strides = array<i32>} : memref<32x16x16xf32, #tpu.memory_space<vmem>>, vector<7x16x16xf32>,
    %4 = tpu.iota {dimensions = array<i32: 1>} : vector<16x16xi32>
    %c-2_i32 = arith.constant -2 : i32
    %5 = vector.broadcast %c-2_i32 : i32 to vector<16x16xi32>
    %6 = arith.addi %4, %5 : vector<16x16xi32>
    %c0_i32 = arith.constant 0 : i32
    %7 = vector.broadcast %c0_i32 : i32 to vector<16x16xi32>
    %8 = arith.cmpi sge, %6, %7 : vector<16x16xi32>
    %c-2_i32_1 = arith.constant -2 : i32
    %9 = vector.broadcast %c-2_i32_1 : i32 to vector<16x16xi32>
    %10 = arith.addi %4, %9 : vector<16x16xi32>
    %c16_i32_2 = arith.constant 16 : i32
    %11 = vector.broadcast %c16_i32_2 : i32 to vector<16x16xi32>
    %12 = arith.cmpi slt, %10, %11 : vector<16x16xi32>
    %13 = arith.andi %8, %12 : vector<16x16xi1>
    %c-1_i32 = arith.constant -1 : i32
    %14 = vector.broadcast %c-1_i32 : i32 to vector<16x16xi32>
    %15 = arith.addi %4, %14 : vector<16x16xi32>
    %c0_i32_3 = arith.constant 0 : i32
    %16 = vector.broadcast %c0_i32_3 : i32 to vector<16x16xi32>
    %17 = arith.cmpi sge, %15, %16 : vector<16x16xi32>
    %c-1_i32_4 = arith.constant -1 : i32
    %18 = vector.broadcast %c-1_i32_4 : i32 to vector<16x16xi32>
    %19 = arith.addi %4, %18 : vector<16x16xi32>
    %c16_i32_5 = arith.constant 16 : i32
    %20 = vector.broadcast %c16_i32_5 : i32 to vector<16x16xi32>
    %21 = arith.cmpi slt, %19, %20 : vector<16x16xi32>
    %22 = arith.andi %17, %21 : vector<16x16xi1>
    %c1_i32 = arith.constant 1 : i32
    %23 = vector.broadcast %c1_i32 : i32 to vector<16x16xi32>
    %24 = arith.addi %4, %23 : vector<16x16xi32>
    %c0_i32_6 = arith.constant 0 : i32
    %25 = vector.broadcast %c0_i32_6 : i32 to vector<16x16xi32>
    %26 = arith.cmpi sge, %24, %25 : vector<16x16xi32>
    %c1_i32_7 = arith.constant 1 : i32
    %27 = vector.broadcast %c1_i32_7 : i32 to vector<16x16xi32>
    %28 = arith.addi %4, %27 : vector<16x16xi32>
    %c16_i32_8 = arith.constant 16 : i32
    %29 = vector.broadcast %c16_i32_8 : i32 to vector<16x16xi32>
    %30 = arith.cmpi slt, %28, %29 : vector<16x16xi32>
    %31 = arith.andi %26, %30 : vector<16x16xi1>
    %c2_i32 = arith.constant 2 : i32
    %32 = vector.broadcast %c2_i32 : i32 to vector<16x16xi32>
    %33 = arith.addi %4, %32 : vector<16x16xi32>
    %c0_i32_9 = arith.constant 0 : i32
    %34 = vector.broadcast %c0_i32_9 : i32 to vector<16x16xi32>
    %35 = arith.cmpi sge, %33, %34 : vector<16x16xi32>
    %c2_i32_10 = arith.constant 2 : i32
    %36 = vector.broadcast %c2_i32_10 : i32 to vector<16x16xi32>
    %37 = arith.addi %4, %36 : vector<16x16xi32>
    %c16_i32_11 = arith.constant 16 : i32
    %38 = vector.broadcast %c16_i32_11 : i32 to vector<16x16xi32>
    %39 = arith.cmpi slt, %37, %38 : vector<16x16xi32>
    %40 = arith.andi %35, %39 : vector<16x16xi1>
    %c0_12 = arith.constant 0 : index
    %c0_13 = arith.constant 0 : index
    %41 = vector.load %arg3[%c0_12, %c0_13] : memref<30x32xf32, #tpu.memory_space<vmem>>, vector<30x32xf32>
    %c0_i32_14 = arith.constant 0 : i32
    %42 = arith.addi %1, %c0_i32_14 : i32
    %c0_15 = arith.constant 0 : index
    %c0_16 = arith.constant 0 : index
    %43 = arith.index_cast %42 : i32 to index
    %c0_17 = arith.constant 0 : index
    %44 = vector.load %arg2[%c0_15, %c0_16, %43, %c0_17] : memref<2x1x20x16xf32, #tpu.memory_space<vmem>>, vector<1x1x16x16xf32>
    %45 = vector.shape_cast %44 : vector<1x1x16x16xf32> to vector<16x16xf32>
    %c2_i32_18 = arith.constant 2 : i32
    %46 = tpu.dynamic_rotate %45 by %c2_i32_18 dim 1 : vector<16x16xf32>, i32 -> vector<16x16xf32>
    %cst_19 = arith.constant 0.000000e+00 : f32
    %47 = vector.broadcast %cst_19 : f32 to vector<16x16xf32>
    %48 = arith.select %13, %46, %47 : vector<16x16xi1>, vector<16x16xf32>
    %c0_20 = arith.constant 0 : index
    %c0_21 = arith.constant 0 : index
    %c0_22 = arith.constant 0 : index
    %49 = vector.load %arg5[%c0_20, %c0_21, %c0_22] : memref<32x16x16xf32, #tpu.memory_space<vmem>>, vector<1x16x16xf32>
    %50 = vector.shape_cast %49 : vector<1x16x16xf32> to vector<16x16xf32>
    %51 = vector.shape_cast %48 : vector<16x16xf32> to vector<1x16x16xf32>
    tpu.vector_store %arg5[%c0_20, %c0_21, %c0_22], %51 {strides = array<i32>} : memref<32x16x16xf32, #tpu.memory_space<vmem>>, vector<1x16x16xf32>,
    %c1_i32_23 = arith.constant 1 : i32
    %52 = tpu.dynamic_rotate %45 by %c1_i32_23 dim 1 : vector<16x16xf32>, i32 -> vector<16x16xf32>
    %cst_24 = arith.constant 0.000000e+00 : f32
    %53 = vector.broadcast %cst_24 : f32 to vector<16x16xf32>
    %54 = arith.select %22, %52, %53 : vector<16x16xi1>, vector<16x16xf32>
    %c1 = arith.constant 1 : index
    %c0_25 = arith.constant 0 : index
    %c0_26 = arith.constant 0 : index
    %55 = vector.load %arg5[%c1, %c0_25, %c0_26] : memref<32x16x16xf32, #tpu.memory_space<vmem>>, vector<1x16x16xf32>
    %56 = vector.shape_cast %55 : vector<1x16x16xf32> to vector<16x16xf32>
    %57 = vector.shape_cast %54 : vector<16x16xf32> to vector<1x16x16xf32>
    tpu.vector_store %arg5[%c1, %c0_25, %c0_26], %57 {strides = array<i32>} : memref<32x16x16xf32, #tpu.memory_space<vmem>>, vector<1x16x16xf32>,
    %c2 = arith.constant 2 : index
    %c0_27 = arith.constant 0 : index
    %c0_28 = arith.constant 0 : index
    %58 = vector.load %arg5[%c2, %c0_27, %c0_28] : memref<32x16x16xf32, #tpu.memory_space<vmem>>, vector<1x16x16xf32>
    %59 = vector.shape_cast %58 : vector<1x16x16xf32> to vector<16x16xf32>
    %60 = vector.shape_cast %45 : vector<16x16xf32> to vector<1x16x16xf32>
    tpu.vector_store %arg5[%c2, %c0_27, %c0_28], %60 {strides = array<i32>} : memref<32x16x16xf32, #tpu.memory_space<vmem>>, vector<1x16x16xf32>,
    %c15_i32 = arith.constant 15 : i32
    %61 = tpu.dynamic_rotate %45 by %c15_i32 dim 1 : vector<16x16xf32>, i32 -> vector<16x16xf32>
    %cst_29 = arith.constant 0.000000e+00 : f32
    %62 = vector.broadcast %cst_29 : f32 to vector<16x16xf32>
    %63 = arith.select %31, %61, %62 : vector<16x16xi1>, vector<16x16xf32>
    %c3 = arith.constant 3 : index
    %c0_30 = arith.constant 0 : index
    %c0_31 = arith.constant 0 : index
    %64 = vector.load %arg5[%c3, %c0_30, %c0_31] : memref<32x16x16xf32, #tpu.memory_space<vmem>>, vector<1x16x16xf32>
    %65 = vector.shape_cast %64 : vector<1x16x16xf32> to vector<16x16xf32>
    %66 = vector.shape_cast %63 : vector<16x16xf32> to vector<1x16x16xf32>
    tpu.vector_store %arg5[%c3, %c0_30, %c0_31], %66 {strides = array<i32>} : memref<32x16x16xf32, #tpu.memory_space<vmem>>, vector<1x16x16xf32>,
    %c14_i32 = arith.constant 14 : i32
    %67 = tpu.dynamic_rotate %45 by %c14_i32 dim 1 : vector<16x16xf32>, i32 -> vector<16x16xf32>
    %cst_32 = arith.constant 0.000000e+00 : f32
    %68 = vector.broadcast %cst_32 : f32 to vector<16x16xf32>
    %69 = arith.select %40, %67, %68 : vector<16x16xi1>, vector<16x16xf32>
    %c4 = arith.constant 4 : index
    %c0_33 = arith.constant 0 : index
    %c0_34 = arith.constant 0 : index
    %70 = vector.load %arg5[%c4, %c0_33, %c0_34] : memref<32x16x16xf32, #tpu.memory_space<vmem>>, vector<1x16x16xf32>
    %71 = vector.shape_cast %70 : vector<1x16x16xf32> to vector<16x16xf32>
    %72 = vector.shape_cast %69 : vector<16x16xf32> to vector<1x16x16xf32>
    tpu.vector_store %arg5[%c4, %c0_33, %c0_34], %72 {strides = array<i32>} : memref<32x16x16xf32, #tpu.memory_space<vmem>>, vector<1x16x16xf32>,
    %c1_i32_35 = arith.constant 1 : i32
    %73 = arith.addi %1, %c1_i32_35 : i32
    %c0_36 = arith.constant 0 : index
    %c0_37 = arith.constant 0 : index
    %74 = arith.index_cast %73 : i32 to index
    %c0_38 = arith.constant 0 : index
    %75 = vector.load %arg2[%c0_36, %c0_37, %74, %c0_38] : memref<2x1x20x16xf32, #tpu.memory_space<vmem>>, vector<1x1x16x16xf32>
    %76 = vector.shape_cast %75 : vector<1x1x16x16xf32> to vector<16x16xf32>
    %c2_i32_39 = arith.constant 2 : i32
    %77 = tpu.dynamic_rotate %76 by %c2_i32_39 dim 1 : vector<16x16xf32>, i32 -> vector<16x16xf32>
    %cst_40 = arith.constant 0.000000e+00 : f32
    %78 = vector.broadcast %cst_40 : f32 to vector<16x16xf32>
    %79 = arith.select %13, %77, %78 : vector<16x16xi1>, vector<16x16xf32>
    %c5 = arith.constant 5 : index
    %c0_41 = arith.constant 0 : index
    %c0_42 = arith.constant 0 : index
    %80 = vector.load %arg5[%c5, %c0_41, %c0_42] : memref<32x16x16xf32, #tpu.memory_space<vmem>>, vector<1x16x16xf32>
    %81 = vector.shape_cast %80 : vector<1x16x16xf32> to vector<16x16xf32>
    %82 = vector.shape_cast %79 : vector<16x16xf32> to vector<1x16x16xf32>
    tpu.vector_store %arg5[%c5, %c0_41, %c0_42], %82 {strides = array<i32>} : memref<32x16x16xf32, #tpu.memory_space<vmem>>, vector<1x16x16xf32>,
    %c1_i32_43 = arith.constant 1 : i32
    %83 = tpu.dynamic_rotate %76 by %c1_i32_43 dim 1 : vector<16x16xf32>, i32 -> vector<16x16xf32>
    %cst_44 = arith.constant 0.000000e+00 : f32
    %84 = vector.broadcast %cst_44 : f32 to vector<16x16xf32>
    %85 = arith.select %22, %83, %84 : vector<16x16xi1>, vector<16x16xf32>
    %c6 = arith.constant 6 : index
    %c0_45 = arith.constant 0 : index
    %c0_46 = arith.constant 0 : index
    %86 = vector.load %arg5[%c6, %c0_45, %c0_46] : memref<32x16x16xf32, #tpu.memory_space<vmem>>, vector<1x16x16xf32>
    %87 = vector.shape_cast %86 : vector<1x16x16xf32> to vector<16x16xf32>
    %88 = vector.shape_cast %85 : vector<16x16xf32> to vector<1x16x16xf32>
    tpu.vector_store %arg5[%c6, %c0_45, %c0_46], %88 {strides = array<i32>} : memref<32x16x16xf32, #tpu.memory_space<vmem>>, vector<1x16x16xf32>,
    %c7 = arith.constant 7 : index
    %c0_47 = arith.constant 0 : index
    %c0_48 = arith.constant 0 : index
    %89 = vector.load %arg5[%c7, %c0_47, %c0_48] : memref<32x16x16xf32, #tpu.memory_space<vmem>>, vector<1x16x16xf32>
    %90 = vector.shape_cast %89 : vector<1x16x16xf32> to vector<16x16xf32>
    %91 = vector.shape_cast %76 : vector<16x16xf32> to vector<1x16x16xf32>
    tpu.vector_store %arg5[%c7, %c0_47, %c0_48], %91 {strides = array<i32>} : memref<32x16x16xf32, #tpu.memory_space<vmem>>, vector<1x16x16xf32>,
    %c15_i32_49 = arith.constant 15 : i32
    %92 = tpu.dynamic_rotate %76 by %c15_i32_49 dim 1 : vector<16x16xf32>, i32 -> vector<16x16xf32>
    %cst_50 = arith.constant 0.000000e+00 : f32
    %93 = vector.broadcast %cst_50 : f32 to vector<16x16xf32>
    %94 = arith.select %31, %92, %93 : vector<16x16xi1>, vector<16x16xf32>
    %c8 = arith.constant 8 : index
    %c0_51 = arith.constant 0 : index
    %c0_52 = arith.constant 0 : index
    %95 = vector.load %arg5[%c8, %c0_51, %c0_52] : memref<32x16x16xf32, #tpu.memory_space<vmem>>, vector<1x16x16xf32>
    %96 = vector.shape_cast %95 : vector<1x16x16xf32> to vector<16x16xf32>
    %97 = vector.shape_cast %94 : vector<16x16xf32> to vector<1x16x16xf32>
    tpu.vector_store %arg5[%c8, %c0_51, %c0_52], %97 {strides = array<i32>} : memref<32x16x16xf32, #tpu.memory_space<vmem>>, vector<1x16x16xf32>,
    %c14_i32_53 = arith.constant 14 : i32
    %98 = tpu.dynamic_rotate %76 by %c14_i32_53 dim 1 : vector<16x16xf32>, i32 -> vector<16x16xf32>
    %cst_54 = arith.constant 0.000000e+00 : f32
    %99 = vector.broadcast %cst_54 : f32 to vector<16x16xf32>
    %100 = arith.select %40, %98, %99 : vector<16x16xi1>, vector<16x16xf32>
    %c9 = arith.constant 9 : index
    %c0_55 = arith.constant 0 : index
    %c0_56 = arith.constant 0 : index
    %101 = vector.load %arg5[%c9, %c0_55, %c0_56] : memref<32x16x16xf32, #tpu.memory_space<vmem>>, vector<1x16x16xf32>
    %102 = vector.shape_cast %101 : vector<1x16x16xf32> to vector<16x16xf32>
    %103 = vector.shape_cast %100 : vector<16x16xf32> to vector<1x16x16xf32>
    tpu.vector_store %arg5[%c9, %c0_55, %c0_56], %103 {strides = array<i32>} : memref<32x16x16xf32, #tpu.memory_space<vmem>>, vector<1x16x16xf32>,
    %c2_i32_57 = arith.constant 2 : i32
    %104 = arith.addi %1, %c2_i32_57 : i32
    %c0_58 = arith.constant 0 : index
    %c0_59 = arith.constant 0 : index
    %105 = arith.index_cast %104 : i32 to index
    %c0_60 = arith.constant 0 : index
    %106 = vector.load %arg2[%c0_58, %c0_59, %105, %c0_60] : memref<2x1x20x16xf32, #tpu.memory_space<vmem>>, vector<1x1x16x16xf32>
    %107 = vector.shape_cast %106 : vector<1x1x16x16xf32> to vector<16x16xf32>
    %c2_i32_61 = arith.constant 2 : i32
    %108 = tpu.dynamic_rotate %107 by %c2_i32_61 dim 1 : vector<16x16xf32>, i32 -> vector<16x16xf32>
    %cst_62 = arith.constant 0.000000e+00 : f32
    %109 = vector.broadcast %cst_62 : f32 to vector<16x16xf32>
    %110 = arith.select %13, %108, %109 : vector<16x16xi1>, vector<16x16xf32>
    %c10 = arith.constant 10 : index
    %c0_63 = arith.constant 0 : index
    %c0_64 = arith.constant 0 : index
    %111 = vector.load %arg5[%c10, %c0_63, %c0_64] : memref<32x16x16xf32, #tpu.memory_space<vmem>>, vector<1x16x16xf32>
    %112 = vector.shape_cast %111 : vector<1x16x16xf32> to vector<16x16xf32>
    %113 = vector.shape_cast %110 : vector<16x16xf32> to vector<1x16x16xf32>
    tpu.vector_store %arg5[%c10, %c0_63, %c0_64], %113 {strides = array<i32>} : memref<32x16x16xf32, #tpu.memory_space<vmem>>, vector<1x16x16xf32>,
    %c1_i32_65 = arith.constant 1 : i32
    %114 = tpu.dynamic_rotate %107 by %c1_i32_65 dim 1 : vector<16x16xf32>, i32 -> vector<16x16xf32>
    %cst_66 = arith.constant 0.000000e+00 : f32
    %115 = vector.broadcast %cst_66 : f32 to vector<16x16xf32>
    %116 = arith.select %22, %114, %115 : vector<16x16xi1>, vector<16x16xf32>
    %c11 = arith.constant 11 : index
    %c0_67 = arith.constant 0 : index
    %c0_68 = arith.constant 0 : index
    %117 = vector.load %arg5[%c11, %c0_67, %c0_68] : memref<32x16x16xf32, #tpu.memory_space<vmem>>, vector<1x16x16xf32>
    %118 = vector.shape_cast %117 : vector<1x16x16xf32> to vector<16x16xf32>
    %119 = vector.shape_cast %116 : vector<16x16xf32> to vector<1x16x16xf32>
    tpu.vector_store %arg5[%c11, %c0_67, %c0_68], %119 {strides = array<i32>} : memref<32x16x16xf32, #tpu.memory_space<vmem>>, vector<1x16x16xf32>,
    %c12 = arith.constant 12 : index
    %c0_69 = arith.constant 0 : index
    %c0_70 = arith.constant 0 : index
    %120 = vector.load %arg5[%c12, %c0_69, %c0_70] : memref<32x16x16xf32, #tpu.memory_space<vmem>>, vector<1x16x16xf32>
    %121 = vector.shape_cast %120 : vector<1x16x16xf32> to vector<16x16xf32>
    %122 = vector.shape_cast %107 : vector<16x16xf32> to vector<1x16x16xf32>
    tpu.vector_store %arg5[%c12, %c0_69, %c0_70], %122 {strides = array<i32>} : memref<32x16x16xf32, #tpu.memory_space<vmem>>, vector<1x16x16xf32>,
    %c15_i32_71 = arith.constant 15 : i32
    %123 = tpu.dynamic_rotate %107 by %c15_i32_71 dim 1 : vector<16x16xf32>, i32 -> vector<16x16xf32>
    %cst_72 = arith.constant 0.000000e+00 : f32
    %124 = vector.broadcast %cst_72 : f32 to vector<16x16xf32>
    %125 = arith.select %31, %123, %124 : vector<16x16xi1>, vector<16x16xf32>
    %c13 = arith.constant 13 : index
    %c0_73 = arith.constant 0 : index
    %c0_74 = arith.constant 0 : index
    %126 = vector.load %arg5[%c13, %c0_73, %c0_74] : memref<32x16x16xf32, #tpu.memory_space<vmem>>, vector<1x16x16xf32>
    %127 = vector.shape_cast %126 : vector<1x16x16xf32> to vector<16x16xf32>
    %128 = vector.shape_cast %125 : vector<16x16xf32> to vector<1x16x16xf32>
    tpu.vector_store %arg5[%c13, %c0_73, %c0_74], %128 {strides = array<i32>} : memref<32x16x16xf32, #tpu.memory_space<vmem>>, vector<1x16x16xf32>,
    %c14_i32_75 = arith.constant 14 : i32
    %129 = tpu.dynamic_rotate %107 by %c14_i32_75 dim 1 : vector<16x16xf32>, i32 -> vector<16x16xf32>
    %cst_76 = arith.constant 0.000000e+00 : f32
    %130 = vector.broadcast %cst_76 : f32 to vector<16x16xf32>
    %131 = arith.select %40, %129, %130 : vector<16x16xi1>, vector<16x16xf32>
    %c14 = arith.constant 14 : index
    %c0_77 = arith.constant 0 : index
    %c0_78 = arith.constant 0 : index
    %132 = vector.load %arg5[%c14, %c0_77, %c0_78] : memref<32x16x16xf32, #tpu.memory_space<vmem>>, vector<1x16x16xf32>
    %133 = vector.shape_cast %132 : vector<1x16x16xf32> to vector<16x16xf32>
    %134 = vector.shape_cast %131 : vector<16x16xf32> to vector<1x16x16xf32>
    tpu.vector_store %arg5[%c14, %c0_77, %c0_78], %134 {strides = array<i32>} : memref<32x16x16xf32, #tpu.memory_space<vmem>>, vector<1x16x16xf32>,
    %c3_i32 = arith.constant 3 : i32
    %135 = arith.addi %1, %c3_i32 : i32
    %c0_79 = arith.constant 0 : index
    %c0_80 = arith.constant 0 : index
    %136 = arith.index_cast %135 : i32 to index
    %c0_81 = arith.constant 0 : index
    %137 = vector.load %arg2[%c0_79, %c0_80, %136, %c0_81] : memref<2x1x20x16xf32, #tpu.memory_space<vmem>>, vector<1x1x16x16xf32>
    %138 = vector.shape_cast %137 : vector<1x1x16x16xf32> to vector<16x16xf32>
    %c2_i32_82 = arith.constant 2 : i32
    %139 = tpu.dynamic_rotate %138 by %c2_i32_82 dim 1 : vector<16x16xf32>, i32 -> vector<16x16xf32>
    %cst_83 = arith.constant 0.000000e+00 : f32
    %140 = vector.broadcast %cst_83 : f32 to vector<16x16xf32>
    %141 = arith.select %13, %139, %140 : vector<16x16xi1>, vector<16x16xf32>
    %c15 = arith.constant 15 : index
    %c0_84 = arith.constant 0 : index
    %c0_85 = arith.constant 0 : index
    %142 = vector.load %arg5[%c15, %c0_84, %c0_85] : memref<32x16x16xf32, #tpu.memory_space<vmem>>, vector<1x16x16xf32>
    %143 = vector.shape_cast %142 : vector<1x16x16xf32> to vector<16x16xf32>
    %144 = vector.shape_cast %141 : vector<16x16xf32> to vector<1x16x16xf32>
    tpu.vector_store %arg5[%c15, %c0_84, %c0_85], %144 {strides = array<i32>} : memref<32x16x16xf32, #tpu.memory_space<vmem>>, vector<1x16x16xf32>,
    %c1_i32_86 = arith.constant 1 : i32
    %145 = tpu.dynamic_rotate %138 by %c1_i32_86 dim 1 : vector<16x16xf32>, i32 -> vector<16x16xf32>
    %cst_87 = arith.constant 0.000000e+00 : f32
    %146 = vector.broadcast %cst_87 : f32 to vector<16x16xf32>
    %147 = arith.select %22, %145, %146 : vector<16x16xi1>, vector<16x16xf32>
    %c16 = arith.constant 16 : index
    %c0_88 = arith.constant 0 : index
    %c0_89 = arith.constant 0 : index
    %148 = vector.load %arg5[%c16, %c0_88, %c0_89] : memref<32x16x16xf32, #tpu.memory_space<vmem>>, vector<1x16x16xf32>
    %149 = vector.shape_cast %148 : vector<1x16x16xf32> to vector<16x16xf32>
    %150 = vector.shape_cast %147 : vector<16x16xf32> to vector<1x16x16xf32>
    tpu.vector_store %arg5[%c16, %c0_88, %c0_89], %150 {strides = array<i32>} : memref<32x16x16xf32, #tpu.memory_space<vmem>>, vector<1x16x16xf32>,
    %c17 = arith.constant 17 : index
    %c0_90 = arith.constant 0 : index
    %c0_91 = arith.constant 0 : index
    %151 = vector.load %arg5[%c17, %c0_90, %c0_91] : memref<32x16x16xf32, #tpu.memory_space<vmem>>, vector<1x16x16xf32>
    %152 = vector.shape_cast %151 : vector<1x16x16xf32> to vector<16x16xf32>
    %153 = vector.shape_cast %138 : vector<16x16xf32> to vector<1x16x16xf32>
    tpu.vector_store %arg5[%c17, %c0_90, %c0_91], %153 {strides = array<i32>} : memref<32x16x16xf32, #tpu.memory_space<vmem>>, vector<1x16x16xf32>,
    %c15_i32_92 = arith.constant 15 : i32
    %154 = tpu.dynamic_rotate %138 by %c15_i32_92 dim 1 : vector<16x16xf32>, i32 -> vector<16x16xf32>
    %cst_93 = arith.constant 0.000000e+00 : f32
    %155 = vector.broadcast %cst_93 : f32 to vector<16x16xf32>
    %156 = arith.select %31, %154, %155 : vector<16x16xi1>, vector<16x16xf32>
    %c18 = arith.constant 18 : index
    %c0_94 = arith.constant 0 : index
    %c0_95 = arith.constant 0 : index
    %157 = vector.load %arg5[%c18, %c0_94, %c0_95] : memref<32x16x16xf32, #tpu.memory_space<vmem>>, vector<1x16x16xf32>
    %158 = vector.shape_cast %157 : vector<1x16x16xf32> to vector<16x16xf32>
    %159 = vector.shape_cast %156 : vector<16x16xf32> to vector<1x16x16xf32>
    tpu.vector_store %arg5[%c18, %c0_94, %c0_95], %159 {strides = array<i32>} : memref<32x16x16xf32, #tpu.memory_space<vmem>>, vector<1x16x16xf32>,
    %c14_i32_96 = arith.constant 14 : i32
    %160 = tpu.dynamic_rotate %138 by %c14_i32_96 dim 1 : vector<16x16xf32>, i32 -> vector<16x16xf32>
    %cst_97 = arith.constant 0.000000e+00 : f32
    %161 = vector.broadcast %cst_97 : f32 to vector<16x16xf32>
    %162 = arith.select %40, %160, %161 : vector<16x16xi1>, vector<16x16xf32>
    %c19 = arith.constant 19 : index
    %c0_98 = arith.constant 0 : index
    %c0_99 = arith.constant 0 : index
    %163 = vector.load %arg5[%c19, %c0_98, %c0_99] : memref<32x16x16xf32, #tpu.memory_space<vmem>>, vector<1x16x16xf32>
    %164 = vector.shape_cast %163 : vector<1x16x16xf32> to vector<16x16xf32>
    %165 = vector.shape_cast %162 : vector<16x16xf32> to vector<1x16x16xf32>
    tpu.vector_store %arg5[%c19, %c0_98, %c0_99], %165 {strides = array<i32>} : memref<32x16x16xf32, #tpu.memory_space<vmem>>, vector<1x16x16xf32>,
    %c4_i32 = arith.constant 4 : i32
    %166 = arith.addi %1, %c4_i32 : i32
    %c0_100 = arith.constant 0 : index
    %c0_101 = arith.constant 0 : index
    %167 = arith.index_cast %166 : i32 to index
    %c0_102 = arith.constant 0 : index
    %168 = vector.load %arg2[%c0_100, %c0_101, %167, %c0_102] : memref<2x1x20x16xf32, #tpu.memory_space<vmem>>, vector<1x1x16x16xf32>
    %169 = vector.shape_cast %168 : vector<1x1x16x16xf32> to vector<16x16xf32>
    %c2_i32_103 = arith.constant 2 : i32
    %170 = tpu.dynamic_rotate %169 by %c2_i32_103 dim 1 : vector<16x16xf32>, i32 -> vector<16x16xf32>
    %cst_104 = arith.constant 0.000000e+00 : f32
    %171 = vector.broadcast %cst_104 : f32 to vector<16x16xf32>
    %172 = arith.select %13, %170, %171 : vector<16x16xi1>, vector<16x16xf32>
    %c20 = arith.constant 20 : index
    %c0_105 = arith.constant 0 : index
    %c0_106 = arith.constant 0 : index
    %173 = vector.load %arg5[%c20, %c0_105, %c0_106] : memref<32x16x16xf32, #tpu.memory_space<vmem>>, vector<1x16x16xf32>
    %174 = vector.shape_cast %173 : vector<1x16x16xf32> to vector<16x16xf32>
    %175 = vector.shape_cast %172 : vector<16x16xf32> to vector<1x16x16xf32>
    tpu.vector_store %arg5[%c20, %c0_105, %c0_106], %175 {strides = array<i32>} : memref<32x16x16xf32, #tpu.memory_space<vmem>>, vector<1x16x16xf32>,
    %c1_i32_107 = arith.constant 1 : i32
    %176 = tpu.dynamic_rotate %169 by %c1_i32_107 dim 1 : vector<16x16xf32>, i32 -> vector<16x16xf32>
    %cst_108 = arith.constant 0.000000e+00 : f32
    %177 = vector.broadcast %cst_108 : f32 to vector<16x16xf32>
    %178 = arith.select %22, %176, %177 : vector<16x16xi1>, vector<16x16xf32>
    %c21 = arith.constant 21 : index
    %c0_109 = arith.constant 0 : index
    %c0_110 = arith.constant 0 : index
    %179 = vector.load %arg5[%c21, %c0_109, %c0_110] : memref<32x16x16xf32, #tpu.memory_space<vmem>>, vector<1x16x16xf32>
    %180 = vector.shape_cast %179 : vector<1x16x16xf32> to vector<16x16xf32>
    %181 = vector.shape_cast %178 : vector<16x16xf32> to vector<1x16x16xf32>
    tpu.vector_store %arg5[%c21, %c0_109, %c0_110], %181 {strides = array<i32>} : memref<32x16x16xf32, #tpu.memory_space<vmem>>, vector<1x16x16xf32>,
    %c22 = arith.constant 22 : index
    %c0_111 = arith.constant 0 : index
    %c0_112 = arith.constant 0 : index
    %182 = vector.load %arg5[%c22, %c0_111, %c0_112] : memref<32x16x16xf32, #tpu.memory_space<vmem>>, vector<1x16x16xf32>
    %183 = vector.shape_cast %182 : vector<1x16x16xf32> to vector<16x16xf32>
    %184 = vector.shape_cast %169 : vector<16x16xf32> to vector<1x16x16xf32>
    tpu.vector_store %arg5[%c22, %c0_111, %c0_112], %184 {strides = array<i32>} : memref<32x16x16xf32, #tpu.memory_space<vmem>>, vector<1x16x16xf32>,
    %c15_i32_113 = arith.constant 15 : i32
    %185 = tpu.dynamic_rotate %169 by %c15_i32_113 dim 1 : vector<16x16xf32>, i32 -> vector<16x16xf32>
    %cst_114 = arith.constant 0.000000e+00 : f32
    %186 = vector.broadcast %cst_114 : f32 to vector<16x16xf32>
    %187 = arith.select %31, %185, %186 : vector<16x16xi1>, vector<16x16xf32>
    %c23 = arith.constant 23 : index
    %c0_115 = arith.constant 0 : index
    %c0_116 = arith.constant 0 : index
    %188 = vector.load %arg5[%c23, %c0_115, %c0_116] : memref<32x16x16xf32, #tpu.memory_space<vmem>>, vector<1x16x16xf32>
    %189 = vector.shape_cast %188 : vector<1x16x16xf32> to vector<16x16xf32>
    %190 = vector.shape_cast %187 : vector<16x16xf32> to vector<1x16x16xf32>
    tpu.vector_store %arg5[%c23, %c0_115, %c0_116], %190 {strides = array<i32>} : memref<32x16x16xf32, #tpu.memory_space<vmem>>, vector<1x16x16xf32>,
    %c14_i32_117 = arith.constant 14 : i32
    %191 = tpu.dynamic_rotate %169 by %c14_i32_117 dim 1 : vector<16x16xf32>, i32 -> vector<16x16xf32>
    %cst_118 = arith.constant 0.000000e+00 : f32
    %192 = vector.broadcast %cst_118 : f32 to vector<16x16xf32>
    %193 = arith.select %40, %191, %192 : vector<16x16xi1>, vector<16x16xf32>
    %c24 = arith.constant 24 : index
    %c0_119 = arith.constant 0 : index
    %c0_120 = arith.constant 0 : index
    %194 = vector.load %arg5[%c24, %c0_119, %c0_120] : memref<32x16x16xf32, #tpu.memory_space<vmem>>, vector<1x16x16xf32>
    %195 = vector.shape_cast %194 : vector<1x16x16xf32> to vector<16x16xf32>
    %196 = vector.shape_cast %193 : vector<16x16xf32> to vector<1x16x16xf32>
    tpu.vector_store %arg5[%c24, %c0_119, %c0_120], %196 {strides = array<i32>} : memref<32x16x16xf32, #tpu.memory_space<vmem>>, vector<1x16x16xf32>,
    %c0_121 = arith.constant 0 : index
    %c0_122 = arith.constant 0 : index
    %c0_123 = arith.constant 0 : index
    %197 = vector.load %arg5[%c0_121, %c0_122, %c0_123] : memref<32x16x16xf32, #tpu.memory_space<vmem>>, vector<32x16x16xf32>
    %198 = vector.shape_cast %197 : vector<32x16x16xf32> to vector<32x256xf32>
    %cst_124 = arith.constant dense<0.000000e+00> : vector<30x256xf32>
    %199 = tpu.matmul %41, %198, %cst_124 {dimension_numbers = #tpu.dot_dimension_numbers<[1], [0], [0], [1], [0, 0, 1, 1], [], []>} : vector<30x32xf32>, vector<32x256xf32>, vector<30x256xf32> -> vector<30x256xf32>
    %c0_125 = arith.constant 0 : index
    %c0_126 = arith.constant 0 : index
    %c0_127 = arith.constant 0 : index
    %200 = vector.load %arg4[%c0_125, %c0_126, %c0_127] : memref<2x30x256xf32, #tpu.memory_space<vmem>>, vector<1x30x256xf32>
    %201 = vector.shape_cast %200 : vector<1x30x256xf32> to vector<30x256xf32>
    %202 = vector.shape_cast %199 : vector<30x256xf32> to vector<1x30x256xf32>
    tpu.vector_store %arg4[%c0_125, %c0_126, %c0_127], %202 {strides = array<i32>} : memref<2x30x256xf32, #tpu.memory_space<vmem>>, vector<1x30x256xf32>,
    %c0_i32_128 = arith.constant 0 : i32
    %203 = arith.addi %1, %c0_i32_128 : i32
    %c1_129 = arith.constant 1 : index
    %c0_130 = arith.constant 0 : index
    %204 = arith.index_cast %203 : i32 to index
    %c0_131 = arith.constant 0 : index
    %205 = vector.load %arg2[%c1_129, %c0_130, %204, %c0_131] : memref<2x1x20x16xf32, #tpu.memory_space<vmem>>, vector<1x1x16x16xf32>
    %206 = vector.shape_cast %205 : vector<1x1x16x16xf32> to vector<16x16xf32>
    %c2_i32_132 = arith.constant 2 : i32
    %207 = tpu.dynamic_rotate %206 by %c2_i32_132 dim 1 : vector<16x16xf32>, i32 -> vector<16x16xf32>
    %cst_133 = arith.constant 0.000000e+00 : f32
    %208 = vector.broadcast %cst_133 : f32 to vector<16x16xf32>
    %209 = arith.select %13, %207, %208 : vector<16x16xi1>, vector<16x16xf32>
    %c0_134 = arith.constant 0 : index
    %c0_135 = arith.constant 0 : index
    %c0_136 = arith.constant 0 : index
    %210 = vector.load %arg5[%c0_134, %c0_135, %c0_136] : memref<32x16x16xf32, #tpu.memory_space<vmem>>, vector<1x16x16xf32>
    %211 = vector.shape_cast %210 : vector<1x16x16xf32> to vector<16x16xf32>
    %212 = vector.shape_cast %209 : vector<16x16xf32> to vector<1x16x16xf32>
    tpu.vector_store %arg5[%c0_134, %c0_135, %c0_136], %212 {strides = array<i32>} : memref<32x16x16xf32, #tpu.memory_space<vmem>>, vector<1x16x16xf32>,
    %c1_i32_137 = arith.constant 1 : i32
    %213 = tpu.dynamic_rotate %206 by %c1_i32_137 dim 1 : vector<16x16xf32>, i32 -> vector<16x16xf32>
    %cst_138 = arith.constant 0.000000e+00 : f32
    %214 = vector.broadcast %cst_138 : f32 to vector<16x16xf32>
    %215 = arith.select %22, %213, %214 : vector<16x16xi1>, vector<16x16xf32>
    %c1_139 = arith.constant 1 : index
    %c0_140 = arith.constant 0 : index
    %c0_141 = arith.constant 0 : index
    %216 = vector.load %arg5[%c1_139, %c0_140, %c0_141] : memref<32x16x16xf32, #tpu.memory_space<vmem>>, vector<1x16x16xf32>
    %217 = vector.shape_cast %216 : vector<1x16x16xf32> to vector<16x16xf32>
    %218 = vector.shape_cast %215 : vector<16x16xf32> to vector<1x16x16xf32>
    tpu.vector_store %arg5[%c1_139, %c0_140, %c0_141], %218 {strides = array<i32>} : memref<32x16x16xf32, #tpu.memory_space<vmem>>, vector<1x16x16xf32>,
    %c2_142 = arith.constant 2 : index
    %c0_143 = arith.constant 0 : index
    %c0_144 = arith.constant 0 : index
    %219 = vector.load %arg5[%c2_142, %c0_143, %c0_144] : memref<32x16x16xf32, #tpu.memory_space<vmem>>, vector<1x16x16xf32>
    %220 = vector.shape_cast %219 : vector<1x16x16xf32> to vector<16x16xf32>
    %221 = vector.shape_cast %206 : vector<16x16xf32> to vector<1x16x16xf32>
    tpu.vector_store %arg5[%c2_142, %c0_143, %c0_144], %221 {strides = array<i32>} : memref<32x16x16xf32, #tpu.memory_space<vmem>>, vector<1x16x16xf32>,
    %c15_i32_145 = arith.constant 15 : i32
    %222 = tpu.dynamic_rotate %206 by %c15_i32_145 dim 1 : vector<16x16xf32>, i32 -> vector<16x16xf32>
    %cst_146 = arith.constant 0.000000e+00 : f32
    %223 = vector.broadcast %cst_146 : f32 to vector<16x16xf32>
    %224 = arith.select %31, %222, %223 : vector<16x16xi1>, vector<16x16xf32>
    %c3_147 = arith.constant 3 : index
    %c0_148 = arith.constant 0 : index
    %c0_149 = arith.constant 0 : index
    %225 = vector.load %arg5[%c3_147, %c0_148, %c0_149] : memref<32x16x16xf32, #tpu.memory_space<vmem>>, vector<1x16x16xf32>
    %226 = vector.shape_cast %225 : vector<1x16x16xf32> to vector<16x16xf32>
    %227 = vector.shape_cast %224 : vector<16x16xf32> to vector<1x16x16xf32>
    tpu.vector_store %arg5[%c3_147, %c0_148, %c0_149], %227 {strides = array<i32>} : memref<32x16x16xf32, #tpu.memory_space<vmem>>, vector<1x16x16xf32>,
    %c14_i32_150 = arith.constant 14 : i32
    %228 = tpu.dynamic_rotate %206 by %c14_i32_150 dim 1 : vector<16x16xf32>, i32 -> vector<16x16xf32>
    %cst_151 = arith.constant 0.000000e+00 : f32
    %229 = vector.broadcast %cst_151 : f32 to vector<16x16xf32>
    %230 = arith.select %40, %228, %229 : vector<16x16xi1>, vector<16x16xf32>
    %c4_152 = arith.constant 4 : index
    %c0_153 = arith.constant 0 : index
    %c0_154 = arith.constant 0 : index
    %231 = vector.load %arg5[%c4_152, %c0_153, %c0_154] : memref<32x16x16xf32, #tpu.memory_space<vmem>>, vector<1x16x16xf32>
    %232 = vector.shape_cast %231 : vector<1x16x16xf32> to vector<16x16xf32>
    %233 = vector.shape_cast %230 : vector<16x16xf32> to vector<1x16x16xf32>
    tpu.vector_store %arg5[%c4_152, %c0_153, %c0_154], %233 {strides = array<i32>} : memref<32x16x16xf32, #tpu.memory_space<vmem>>, vector<1x16x16xf32>,
    %c1_i32_155 = arith.constant 1 : i32
    %234 = arith.addi %1, %c1_i32_155 : i32
    %c1_156 = arith.constant 1 : index
    %c0_157 = arith.constant 0 : index
    %235 = arith.index_cast %234 : i32 to index
    %c0_158 = arith.constant 0 : index
    %236 = vector.load %arg2[%c1_156, %c0_157, %235, %c0_158] : memref<2x1x20x16xf32, #tpu.memory_space<vmem>>, vector<1x1x16x16xf32>
    %237 = vector.shape_cast %236 : vector<1x1x16x16xf32> to vector<16x16xf32>
    %c2_i32_159 = arith.constant 2 : i32
    %238 = tpu.dynamic_rotate %237 by %c2_i32_159 dim 1 : vector<16x16xf32>, i32 -> vector<16x16xf32>
    %cst_160 = arith.constant 0.000000e+00 : f32
    %239 = vector.broadcast %cst_160 : f32 to vector<16x16xf32>
    %240 = arith.select %13, %238, %239 : vector<16x16xi1>, vector<16x16xf32>
    %c5_161 = arith.constant 5 : index
    %c0_162 = arith.constant 0 : index
    %c0_163 = arith.constant 0 : index
    %241 = vector.load %arg5[%c5_161, %c0_162, %c0_163] : memref<32x16x16xf32, #tpu.memory_space<vmem>>, vector<1x16x16xf32>
    %242 = vector.shape_cast %241 : vector<1x16x16xf32> to vector<16x16xf32>
    %243 = vector.shape_cast %240 : vector<16x16xf32> to vector<1x16x16xf32>
    tpu.vector_store %arg5[%c5_161, %c0_162, %c0_163], %243 {strides = array<i32>} : memref<32x16x16xf32, #tpu.memory_space<vmem>>, vector<1x16x16xf32>,
    %c1_i32_164 = arith.constant 1 : i32
    %244 = tpu.dynamic_rotate %237 by %c1_i32_164 dim 1 : vector<16x16xf32>, i32 -> vector<16x16xf32>
    %cst_165 = arith.constant 0.000000e+00 : f32
    %245 = vector.broadcast %cst_165 : f32 to vector<16x16xf32>
    %246 = arith.select %22, %244, %245 : vector<16x16xi1>, vector<16x16xf32>
    %c6_166 = arith.constant 6 : index
    %c0_167 = arith.constant 0 : index
    %c0_168 = arith.constant 0 : index
    %247 = vector.load %arg5[%c6_166, %c0_167, %c0_168] : memref<32x16x16xf32, #tpu.memory_space<vmem>>, vector<1x16x16xf32>
    %248 = vector.shape_cast %247 : vector<1x16x16xf32> to vector<16x16xf32>
    %249 = vector.shape_cast %246 : vector<16x16xf32> to vector<1x16x16xf32>
    tpu.vector_store %arg5[%c6_166, %c0_167, %c0_168], %249 {strides = array<i32>} : memref<32x16x16xf32, #tpu.memory_space<vmem>>, vector<1x16x16xf32>,
    %c7_169 = arith.constant 7 : index
    %c0_170 = arith.constant 0 : index
    %c0_171 = arith.constant 0 : index
    %250 = vector.load %arg5[%c7_169, %c0_170, %c0_171] : memref<32x16x16xf32, #tpu.memory_space<vmem>>, vector<1x16x16xf32>
    %251 = vector.shape_cast %250 : vector<1x16x16xf32> to vector<16x16xf32>
    %252 = vector.shape_cast %237 : vector<16x16xf32> to vector<1x16x16xf32>
    tpu.vector_store %arg5[%c7_169, %c0_170, %c0_171], %252 {strides = array<i32>} : memref<32x16x16xf32, #tpu.memory_space<vmem>>, vector<1x16x16xf32>,
    %c15_i32_172 = arith.constant 15 : i32
    %253 = tpu.dynamic_rotate %237 by %c15_i32_172 dim 1 : vector<16x16xf32>, i32 -> vector<16x16xf32>
    %cst_173 = arith.constant 0.000000e+00 : f32
    %254 = vector.broadcast %cst_173 : f32 to vector<16x16xf32>
    %255 = arith.select %31, %253, %254 : vector<16x16xi1>, vector<16x16xf32>
    %c8_174 = arith.constant 8 : index
    %c0_175 = arith.constant 0 : index
    %c0_176 = arith.constant 0 : index
    %256 = vector.load %arg5[%c8_174, %c0_175, %c0_176] : memref<32x16x16xf32, #tpu.memory_space<vmem>>, vector<1x16x16xf32>
    %257 = vector.shape_cast %256 : vector<1x16x16xf32> to vector<16x16xf32>
    %258 = vector.shape_cast %255 : vector<16x16xf32> to vector<1x16x16xf32>
    tpu.vector_store %arg5[%c8_174, %c0_175, %c0_176], %258 {strides = array<i32>} : memref<32x16x16xf32, #tpu.memory_space<vmem>>, vector<1x16x16xf32>,
    %c14_i32_177 = arith.constant 14 : i32
    %259 = tpu.dynamic_rotate %237 by %c14_i32_177 dim 1 : vector<16x16xf32>, i32 -> vector<16x16xf32>
    %cst_178 = arith.constant 0.000000e+00 : f32
    %260 = vector.broadcast %cst_178 : f32 to vector<16x16xf32>
    %261 = arith.select %40, %259, %260 : vector<16x16xi1>, vector<16x16xf32>
    %c9_179 = arith.constant 9 : index
    %c0_180 = arith.constant 0 : index
    %c0_181 = arith.constant 0 : index
    %262 = vector.load %arg5[%c9_179, %c0_180, %c0_181] : memref<32x16x16xf32, #tpu.memory_space<vmem>>, vector<1x16x16xf32>
    %263 = vector.shape_cast %262 : vector<1x16x16xf32> to vector<16x16xf32>
    %264 = vector.shape_cast %261 : vector<16x16xf32> to vector<1x16x16xf32>
    tpu.vector_store %arg5[%c9_179, %c0_180, %c0_181], %264 {strides = array<i32>} : memref<32x16x16xf32, #tpu.memory_space<vmem>>, vector<1x16x16xf32>,
    %c2_i32_182 = arith.constant 2 : i32
    %265 = arith.addi %1, %c2_i32_182 : i32
    %c1_183 = arith.constant 1 : index
    %c0_184 = arith.constant 0 : index
    %266 = arith.index_cast %265 : i32 to index
    %c0_185 = arith.constant 0 : index
    %267 = vector.load %arg2[%c1_183, %c0_184, %266, %c0_185] : memref<2x1x20x16xf32, #tpu.memory_space<vmem>>, vector<1x1x16x16xf32>
    %268 = vector.shape_cast %267 : vector<1x1x16x16xf32> to vector<16x16xf32>
    %c2_i32_186 = arith.constant 2 : i32
    %269 = tpu.dynamic_rotate %268 by %c2_i32_186 dim 1 : vector<16x16xf32>, i32 -> vector<16x16xf32>
    %cst_187 = arith.constant 0.000000e+00 : f32
    %270 = vector.broadcast %cst_187 : f32 to vector<16x16xf32>
    %271 = arith.select %13, %269, %270 : vector<16x16xi1>, vector<16x16xf32>
    %c10_188 = arith.constant 10 : index
    %c0_189 = arith.constant 0 : index
    %c0_190 = arith.constant 0 : index
    %272 = vector.load %arg5[%c10_188, %c0_189, %c0_190] : memref<32x16x16xf32, #tpu.memory_space<vmem>>, vector<1x16x16xf32>
    %273 = vector.shape_cast %272 : vector<1x16x16xf32> to vector<16x16xf32>
    %274 = vector.shape_cast %271 : vector<16x16xf32> to vector<1x16x16xf32>
    tpu.vector_store %arg5[%c10_188, %c0_189, %c0_190], %274 {strides = array<i32>} : memref<32x16x16xf32, #tpu.memory_space<vmem>>, vector<1x16x16xf32>,
    %c1_i32_191 = arith.constant 1 : i32
    %275 = tpu.dynamic_rotate %268 by %c1_i32_191 dim 1 : vector<16x16xf32>, i32 -> vector<16x16xf32>
    %cst_192 = arith.constant 0.000000e+00 : f32
    %276 = vector.broadcast %cst_192 : f32 to vector<16x16xf32>
    %277 = arith.select %22, %275, %276 : vector<16x16xi1>, vector<16x16xf32>
    %c11_193 = arith.constant 11 : index
    %c0_194 = arith.constant 0 : index
    %c0_195 = arith.constant 0 : index
    %278 = vector.load %arg5[%c11_193, %c0_194, %c0_195] : memref<32x16x16xf32, #tpu.memory_space<vmem>>, vector<1x16x16xf32>
    %279 = vector.shape_cast %278 : vector<1x16x16xf32> to vector<16x16xf32>
    %280 = vector.shape_cast %277 : vector<16x16xf32> to vector<1x16x16xf32>
    tpu.vector_store %arg5[%c11_193, %c0_194, %c0_195], %280 {strides = array<i32>} : memref<32x16x16xf32, #tpu.memory_space<vmem>>, vector<1x16x16xf32>,
    %c12_196 = arith.constant 12 : index
    %c0_197 = arith.constant 0 : index
    %c0_198 = arith.constant 0 : index
    %281 = vector.load %arg5[%c12_196, %c0_197, %c0_198] : memref<32x16x16xf32, #tpu.memory_space<vmem>>, vector<1x16x16xf32>
    %282 = vector.shape_cast %281 : vector<1x16x16xf32> to vector<16x16xf32>
    %283 = vector.shape_cast %268 : vector<16x16xf32> to vector<1x16x16xf32>
    tpu.vector_store %arg5[%c12_196, %c0_197, %c0_198], %283 {strides = array<i32>} : memref<32x16x16xf32, #tpu.memory_space<vmem>>, vector<1x16x16xf32>,
    %c15_i32_199 = arith.constant 15 : i32
    %284 = tpu.dynamic_rotate %268 by %c15_i32_199 dim 1 : vector<16x16xf32>, i32 -> vector<16x16xf32>
    %cst_200 = arith.constant 0.000000e+00 : f32
    %285 = vector.broadcast %cst_200 : f32 to vector<16x16xf32>
    %286 = arith.select %31, %284, %285 : vector<16x16xi1>, vector<16x16xf32>
    %c13_201 = arith.constant 13 : index
    %c0_202 = arith.constant 0 : index
    %c0_203 = arith.constant 0 : index
    %287 = vector.load %arg5[%c13_201, %c0_202, %c0_203] : memref<32x16x16xf32, #tpu.memory_space<vmem>>, vector<1x16x16xf32>
    %288 = vector.shape_cast %287 : vector<1x16x16xf32> to vector<16x16xf32>
    %289 = vector.shape_cast %286 : vector<16x16xf32> to vector<1x16x16xf32>
    tpu.vector_store %arg5[%c13_201, %c0_202, %c0_203], %289 {strides = array<i32>} : memref<32x16x16xf32, #tpu.memory_space<vmem>>, vector<1x16x16xf32>,
    %c14_i32_204 = arith.constant 14 : i32
    %290 = tpu.dynamic_rotate %268 by %c14_i32_204 dim 1 : vector<16x16xf32>, i32 -> vector<16x16xf32>
    %cst_205 = arith.constant 0.000000e+00 : f32
    %291 = vector.broadcast %cst_205 : f32 to vector<16x16xf32>
    %292 = arith.select %40, %290, %291 : vector<16x16xi1>, vector<16x16xf32>
    %c14_206 = arith.constant 14 : index
    %c0_207 = arith.constant 0 : index
    %c0_208 = arith.constant 0 : index
    %293 = vector.load %arg5[%c14_206, %c0_207, %c0_208] : memref<32x16x16xf32, #tpu.memory_space<vmem>>, vector<1x16x16xf32>
    %294 = vector.shape_cast %293 : vector<1x16x16xf32> to vector<16x16xf32>
    %295 = vector.shape_cast %292 : vector<16x16xf32> to vector<1x16x16xf32>
    tpu.vector_store %arg5[%c14_206, %c0_207, %c0_208], %295 {strides = array<i32>} : memref<32x16x16xf32, #tpu.memory_space<vmem>>, vector<1x16x16xf32>,
    %c3_i32_209 = arith.constant 3 : i32
    %296 = arith.addi %1, %c3_i32_209 : i32
    %c1_210 = arith.constant 1 : index
    %c0_211 = arith.constant 0 : index
    %297 = arith.index_cast %296 : i32 to index
    %c0_212 = arith.constant 0 : index
    %298 = vector.load %arg2[%c1_210, %c0_211, %297, %c0_212] : memref<2x1x20x16xf32, #tpu.memory_space<vmem>>, vector<1x1x16x16xf32>
    %299 = vector.shape_cast %298 : vector<1x1x16x16xf32> to vector<16x16xf32>
    %c2_i32_213 = arith.constant 2 : i32
    %300 = tpu.dynamic_rotate %299 by %c2_i32_213 dim 1 : vector<16x16xf32>, i32 -> vector<16x16xf32>
    %cst_214 = arith.constant 0.000000e+00 : f32
    %301 = vector.broadcast %cst_214 : f32 to vector<16x16xf32>
    %302 = arith.select %13, %300, %301 : vector<16x16xi1>, vector<16x16xf32>
    %c15_215 = arith.constant 15 : index
    %c0_216 = arith.constant 0 : index
    %c0_217 = arith.constant 0 : index
    %303 = vector.load %arg5[%c15_215, %c0_216, %c0_217] : memref<32x16x16xf32, #tpu.memory_space<vmem>>, vector<1x16x16xf32>
    %304 = vector.shape_cast %303 : vector<1x16x16xf32> to vector<16x16xf32>
    %305 = vector.shape_cast %302 : vector<16x16xf32> to vector<1x16x16xf32>
    tpu.vector_store %arg5[%c15_215, %c0_216, %c0_217], %305 {strides = array<i32>} : memref<32x16x16xf32, #tpu.memory_space<vmem>>, vector<1x16x16xf32>,
    %c1_i32_218 = arith.constant 1 : i32
    %306 = tpu.dynamic_rotate %299 by %c1_i32_218 dim 1 : vector<16x16xf32>, i32 -> vector<16x16xf32>
    %cst_219 = arith.constant 0.000000e+00 : f32
    %307 = vector.broadcast %cst_219 : f32 to vector<16x16xf32>
    %308 = arith.select %22, %306, %307 : vector<16x16xi1>, vector<16x16xf32>
    %c16_220 = arith.constant 16 : index
    %c0_221 = arith.constant 0 : index
    %c0_222 = arith.constant 0 : index
    %309 = vector.load %arg5[%c16_220, %c0_221, %c0_222] : memref<32x16x16xf32, #tpu.memory_space<vmem>>, vector<1x16x16xf32>
    %310 = vector.shape_cast %309 : vector<1x16x16xf32> to vector<16x16xf32>
    %311 = vector.shape_cast %308 : vector<16x16xf32> to vector<1x16x16xf32>
    tpu.vector_store %arg5[%c16_220, %c0_221, %c0_222], %311 {strides = array<i32>} : memref<32x16x16xf32, #tpu.memory_space<vmem>>, vector<1x16x16xf32>,
    %c17_223 = arith.constant 17 : index
    %c0_224 = arith.constant 0 : index
    %c0_225 = arith.constant 0 : index
    %312 = vector.load %arg5[%c17_223, %c0_224, %c0_225] : memref<32x16x16xf32, #tpu.memory_space<vmem>>, vector<1x16x16xf32>
    %313 = vector.shape_cast %312 : vector<1x16x16xf32> to vector<16x16xf32>
    %314 = vector.shape_cast %299 : vector<16x16xf32> to vector<1x16x16xf32>
    tpu.vector_store %arg5[%c17_223, %c0_224, %c0_225], %314 {strides = array<i32>} : memref<32x16x16xf32, #tpu.memory_space<vmem>>, vector<1x16x16xf32>,
    %c15_i32_226 = arith.constant 15 : i32
    %315 = tpu.dynamic_rotate %299 by %c15_i32_226 dim 1 : vector<16x16xf32>, i32 -> vector<16x16xf32>
    %cst_227 = arith.constant 0.000000e+00 : f32
    %316 = vector.broadcast %cst_227 : f32 to vector<16x16xf32>
    %317 = arith.select %31, %315, %316 : vector<16x16xi1>, vector<16x16xf32>
    %c18_228 = arith.constant 18 : index
    %c0_229 = arith.constant 0 : index
    %c0_230 = arith.constant 0 : index
    %318 = vector.load %arg5[%c18_228, %c0_229, %c0_230] : memref<32x16x16xf32, #tpu.memory_space<vmem>>, vector<1x16x16xf32>
    %319 = vector.shape_cast %318 : vector<1x16x16xf32> to vector<16x16xf32>
    %320 = vector.shape_cast %317 : vector<16x16xf32> to vector<1x16x16xf32>
    tpu.vector_store %arg5[%c18_228, %c0_229, %c0_230], %320 {strides = array<i32>} : memref<32x16x16xf32, #tpu.memory_space<vmem>>, vector<1x16x16xf32>,
    %c14_i32_231 = arith.constant 14 : i32
    %321 = tpu.dynamic_rotate %299 by %c14_i32_231 dim 1 : vector<16x16xf32>, i32 -> vector<16x16xf32>
    %cst_232 = arith.constant 0.000000e+00 : f32
    %322 = vector.broadcast %cst_232 : f32 to vector<16x16xf32>
    %323 = arith.select %40, %321, %322 : vector<16x16xi1>, vector<16x16xf32>
    %c19_233 = arith.constant 19 : index
    %c0_234 = arith.constant 0 : index
    %c0_235 = arith.constant 0 : index
    %324 = vector.load %arg5[%c19_233, %c0_234, %c0_235] : memref<32x16x16xf32, #tpu.memory_space<vmem>>, vector<1x16x16xf32>
    %325 = vector.shape_cast %324 : vector<1x16x16xf32> to vector<16x16xf32>
    %326 = vector.shape_cast %323 : vector<16x16xf32> to vector<1x16x16xf32>
    tpu.vector_store %arg5[%c19_233, %c0_234, %c0_235], %326 {strides = array<i32>} : memref<32x16x16xf32, #tpu.memory_space<vmem>>, vector<1x16x16xf32>,
    %c4_i32_236 = arith.constant 4 : i32
    %327 = arith.addi %1, %c4_i32_236 : i32
    %c1_237 = arith.constant 1 : index
    %c0_238 = arith.constant 0 : index
    %328 = arith.index_cast %327 : i32 to index
    %c0_239 = arith.constant 0 : index
    %329 = vector.load %arg2[%c1_237, %c0_238, %328, %c0_239] : memref<2x1x20x16xf32, #tpu.memory_space<vmem>>, vector<1x1x16x16xf32>
    %330 = vector.shape_cast %329 : vector<1x1x16x16xf32> to vector<16x16xf32>
    %c2_i32_240 = arith.constant 2 : i32
    %331 = tpu.dynamic_rotate %330 by %c2_i32_240 dim 1 : vector<16x16xf32>, i32 -> vector<16x16xf32>
    %cst_241 = arith.constant 0.000000e+00 : f32
    %332 = vector.broadcast %cst_241 : f32 to vector<16x16xf32>
    %333 = arith.select %13, %331, %332 : vector<16x16xi1>, vector<16x16xf32>
    %c20_242 = arith.constant 20 : index
    %c0_243 = arith.constant 0 : index
    %c0_244 = arith.constant 0 : index
    %334 = vector.load %arg5[%c20_242, %c0_243, %c0_244] : memref<32x16x16xf32, #tpu.memory_space<vmem>>, vector<1x16x16xf32>
    %335 = vector.shape_cast %334 : vector<1x16x16xf32> to vector<16x16xf32>
    %336 = vector.shape_cast %333 : vector<16x16xf32> to vector<1x16x16xf32>
    tpu.vector_store %arg5[%c20_242, %c0_243, %c0_244], %336 {strides = array<i32>} : memref<32x16x16xf32, #tpu.memory_space<vmem>>, vector<1x16x16xf32>,
    %c1_i32_245 = arith.constant 1 : i32
    %337 = tpu.dynamic_rotate %330 by %c1_i32_245 dim 1 : vector<16x16xf32>, i32 -> vector<16x16xf32>
    %cst_246 = arith.constant 0.000000e+00 : f32
    %338 = vector.broadcast %cst_246 : f32 to vector<16x16xf32>
    %339 = arith.select %22, %337, %338 : vector<16x16xi1>, vector<16x16xf32>
    %c21_247 = arith.constant 21 : index
    %c0_248 = arith.constant 0 : index
    %c0_249 = arith.constant 0 : index
    %340 = vector.load %arg5[%c21_247, %c0_248, %c0_249] : memref<32x16x16xf32, #tpu.memory_space<vmem>>, vector<1x16x16xf32>
    %341 = vector.shape_cast %340 : vector<1x16x16xf32> to vector<16x16xf32>
    %342 = vector.shape_cast %339 : vector<16x16xf32> to vector<1x16x16xf32>
    tpu.vector_store %arg5[%c21_247, %c0_248, %c0_249], %342 {strides = array<i32>} : memref<32x16x16xf32, #tpu.memory_space<vmem>>, vector<1x16x16xf32>,
    %c22_250 = arith.constant 22 : index
    %c0_251 = arith.constant 0 : index
    %c0_252 = arith.constant 0 : index
    %343 = vector.load %arg5[%c22_250, %c0_251, %c0_252] : memref<32x16x16xf32, #tpu.memory_space<vmem>>, vector<1x16x16xf32>
    %344 = vector.shape_cast %343 : vector<1x16x16xf32> to vector<16x16xf32>
    %345 = vector.shape_cast %330 : vector<16x16xf32> to vector<1x16x16xf32>
    tpu.vector_store %arg5[%c22_250, %c0_251, %c0_252], %345 {strides = array<i32>} : memref<32x16x16xf32, #tpu.memory_space<vmem>>, vector<1x16x16xf32>,
    %c15_i32_253 = arith.constant 15 : i32
    %346 = tpu.dynamic_rotate %330 by %c15_i32_253 dim 1 : vector<16x16xf32>, i32 -> vector<16x16xf32>
    %cst_254 = arith.constant 0.000000e+00 : f32
    %347 = vector.broadcast %cst_254 : f32 to vector<16x16xf32>
    %348 = arith.select %31, %346, %347 : vector<16x16xi1>, vector<16x16xf32>
    %c23_255 = arith.constant 23 : index
    %c0_256 = arith.constant 0 : index
    %c0_257 = arith.constant 0 : index
    %349 = vector.load %arg5[%c23_255, %c0_256, %c0_257] : memref<32x16x16xf32, #tpu.memory_space<vmem>>, vector<1x16x16xf32>
    %350 = vector.shape_cast %349 : vector<1x16x16xf32> to vector<16x16xf32>
    %351 = vector.shape_cast %348 : vector<16x16xf32> to vector<1x16x16xf32>
    tpu.vector_store %arg5[%c23_255, %c0_256, %c0_257], %351 {strides = array<i32>} : memref<32x16x16xf32, #tpu.memory_space<vmem>>, vector<1x16x16xf32>,
    %c14_i32_258 = arith.constant 14 : i32
    %352 = tpu.dynamic_rotate %330 by %c14_i32_258 dim 1 : vector<16x16xf32>, i32 -> vector<16x16xf32>
    %cst_259 = arith.constant 0.000000e+00 : f32
    %353 = vector.broadcast %cst_259 : f32 to vector<16x16xf32>
    %354 = arith.select %40, %352, %353 : vector<16x16xi1>, vector<16x16xf32>
    %c24_260 = arith.constant 24 : index
    %c0_261 = arith.constant 0 : index
    %c0_262 = arith.constant 0 : index
    %355 = vector.load %arg5[%c24_260, %c0_261, %c0_262] : memref<32x16x16xf32, #tpu.memory_space<vmem>>, vector<1x16x16xf32>
    %356 = vector.shape_cast %355 : vector<1x16x16xf32> to vector<16x16xf32>
    %357 = vector.shape_cast %354 : vector<16x16xf32> to vector<1x16x16xf32>
    tpu.vector_store %arg5[%c24_260, %c0_261, %c0_262], %357 {strides = array<i32>} : memref<32x16x16xf32, #tpu.memory_space<vmem>>, vector<1x16x16xf32>,
    %c0_263 = arith.constant 0 : index
    %c0_264 = arith.constant 0 : index
    %c0_265 = arith.constant 0 : index
    %358 = vector.load %arg5[%c0_263, %c0_264, %c0_265] : memref<32x16x16xf32, #tpu.memory_space<vmem>>, vector<32x16x16xf32>
    %359 = vector.shape_cast %358 : vector<32x16x16xf32> to vector<32x256xf32>
    %cst_266 = arith.constant dense<0.000000e+00> : vector<30x256xf32>
    %360 = tpu.matmul %41, %359, %cst_266 {dimension_numbers = #tpu.dot_dimension_numbers<[1], [0], [0], [1], [0, 0, 1, 1], [], []>} : vector<30x32xf32>, vector<32x256xf32>, vector<30x256xf32> -> vector<30x256xf32>
    %c1_267 = arith.constant 1 : index
    %c0_268 = arith.constant 0 : index
    %c0_269 = arith.constant 0 : index
    %361 = vector.load %arg4[%c1_267, %c0_268, %c0_269] : memref<2x30x256xf32, #tpu.memory_space<vmem>>, vector<1x30x256xf32>
    %362 = vector.shape_cast %361 : vector<1x30x256xf32> to vector<30x256xf32>
    %363 = vector.shape_cast %360 : vector<30x256xf32> to vector<1x30x256xf32>
    tpu.vector_store %arg4[%c1_267, %c0_268, %c0_269], %363 {strides = array<i32>} : memref<2x30x256xf32, #tpu.memory_space<vmem>>, vector<1x30x256xf32>,
    return
  }
  func.func @transform_0(%arg0: i32, %arg1: i32) -> (i32, i32, i32, i32) {
    %c0_i32 = arith.constant 0 : i32
    %c0_i32_0 = arith.constant 0 : i32
    %c0_i32_1 = arith.constant 0 : i32
    %c0_i32_2 = arith.constant 0 : i32
    return %arg0, %c0_i32, %c0_i32_0, %c0_i32_1 : i32, i32, i32, i32
  }
  func.func @transform_1(%arg0: i32, %arg1: i32) -> (i32, i32) {
    %c0_i32 = arith.constant 0 : i32
    %c0_i32_0 = arith.constant 0 : i32
    %c0_i32_1 = arith.constant 0 : i32
    return %c0_i32, %c0_i32_0 : i32, i32
  }
  func.func @transform_2(%arg0: i32, %arg1: i32) -> (i32, i32, i32) {
    %c0_i32 = arith.constant 0 : i32
    %c0_i32_0 = arith.constant 0 : i32
    return %arg0, %c0_i32, %arg1 : i32, i32, i32
  }
}

</mosaic_0001>

<bundles_post_ra>
// kernel: tpu_custom_call.1
= control target key start
LH: loop header
LB: loop body
LE: loop exit
PB: predicated region body
PF: predicated region fallthrough
CT: control target
= control target key end

     0   :  { %vm13_vm0 = vcmask 130048   ;;  %s3815_s15 = smov 16   ;;  %vm53_vm1 = vcmask 1047680   ;;  %s3817_s23 = smov 113   ;;  %vm1754_vm10 = vcmask 261120   ;;  %vm1759_vm11 = vcmask 392192   ;;  %s6478_s0 = inlined_call_operand.vmem [shape: f32[2,1,20,16], index: 0, kind: input, shape index: {}]   ;;  %s6479_s1 = inlined_call_operand.vmem [shape: f32[30,32], index: 1, kind: input, shape index: {}]   ;;  %s6480_s2 = inlined_call_operand.vmem [shape: f32[2,30,256], index: 2, kind: output, shape index: {}]  }
   0x1   :  { %v3847_v0 = vld [vmem:[%s6478_s0 + $0xc] sm:$0xff]  ;;  %v3852_v1 = vld [vmem:[%s6478_s0 + $0x4] sm:$0xff]  ;;  %v3930_v11 = vld [vmem:[%s6478_s0 + $0x1c] sm:$0xff]  ;;  %s3818_s24 = smov 127   ;;  %s3820_s25 = smov 126   ;;  %vm1764_vm12 = vcmask 523264  }
   0x2   :  { %v3857_v2 = vld [vmem:[%s6478_s0 + $0xb] sm:$0xff]  ;;  %316 = vrot.lane.b32.xlu0 %v3847_v0, %s3815_s15  ;;  %351 = vst.msk [vmem:[#allocation2 + $0x168] sm:$0xff] %vm13_vm0, %v3847_v0  ;;  %350 = vst.msk [vmem:[#allocation2 + $0x160] sm:$0xff] %vm13_vm0, %v3852_v1  ;;  %v3872_v3 = vld [vmem:[%s6478_s0 + $0x3] sm:$0xff]  ;;  %s3823_s26 = smov 32   ;;  %s3824_s27 = smov 48  }
   0x3   :  { %251 = vrot.lane.b32.xlu1 %v3857_v2, %s3815_s15  ;;  %286 = vst.msk [vmem:[#allocation2 + $0x118] sm:$0xff] %vm13_vm0, %v3857_v2  ;;  %v3877_v4 = vld [vmem:[%s6478_s0 + $0x9] sm:$0xff]  ;;  %285 = vst.msk [vmem:[#allocation2 + $0x110] sm:$0xff] %vm13_vm0, %v3872_v3  ;;  %v3891_v6 = vld [vmem:[%s6478_s0 + $0x1] sm:$0xff]  ;;  %s3825_s28 = smov 64   ;;  %s3826_s29 = smov 96  }
   0x4   :  { %156 = vst.msk [vmem:[#allocation2 + $0x78] sm:$0xff] %vm13_vm0, %v3877_v4  ;;  %v3886_v5 = vld [vmem:[%s6478_s0 + $0xa] sm:$0xff]  ;;  %v3896_v7 = vld [vmem:[%s6478_s0 + $0x2] sm:$0xff]  ;;  %155 = vst.msk [vmem:[#allocation2 + $0x70] sm:$0xff] %vm13_vm0, %v3891_v6  ;;  %s3827_s30 = smov 80   ;;  %s3828_s3 = smov 112  }
   0x5   :  { %221 = vst.msk [vmem:[#allocation2 + $0xc8] sm:$0xff] %vm13_vm0, %v3886_v5  ;;  %220 = vst.msk [vmem:[#allocation2 + $0xc0] sm:$0xff] %vm13_vm0, %v3896_v7  ;;  %v3907_v8 = vld [vmem:[%s6478_s0 + $0x8] sm:$0xff]  ;;  %v3912_v9 = vld [vmem:[%s6478_s0] sm:$0xff]  ;;  %vm1769_vm13 = vcmask 654336   ;;  %vm1774_vm14 = vcmask 785408  }
   0x6   :  { %91 = vst.msk [vmem:[#allocation2 + $0x28] sm:$0xff] %vm13_vm0, %v3907_v8  ;;  %90 = vst.msk [vmem:[#allocation2 + $0x20] sm:$0xff] %vm13_vm0, %v3912_v9  ;;  %313 = vrot.lane.b32.xlu0 %v3852_v1, %s3815_s15  ;;  %v3925_v10 = vld [vmem:[%s6478_s0 + $0x24] sm:$0xff]  ;;  %v3945_v14 = vld [vmem:[%s6478_s0 + $0x1b] sm:$0xff]  ;;  %vm1779_vm15 = vcmask 916480  }
   0x7   :  { %248 = vrot.lane.b32.xlu1 %v3872_v3, %s3815_s15  ;;  %v3935_v12 = vld [vmem:[%s6478_s0 + $0x23] sm:$0xff]  ;;  %v3956_v18 = vld [vmem:[%s6478_s0 + $0x19] sm:$0xff] }
   0x8   :  { %v3940_v13 = vld [vmem:[%s6478_s0 + $0x21] sm:$0xff]  ;;  %v4008_v28 = vld [vmem:[%s6478_s0 + $0x18] sm:$0xff] }
   0x9   :  { %v3947_v15 = vld [vmem:[#allocation2 + $0x168] sm:$0xff]  ;;  %v3949_v16 = vld [vmem:[#allocation2 + $0x160] sm:$0xff] }
   0xa   :  { %v3951_v17 = vld [vmem:[#allocation2 + $0x118] sm:$0xff]  ;;  %v3961_v19 = vld [vmem:[%s6478_s0 + $0x22] sm:$0xff]  ;;  %121 = vrot.lane.b32.xlu0 %v3877_v4, %s3815_s15  ;;  %2200 = vst.msk [vmem:[#allocation2 + $0x168] sm:$0xff] %vm13_vm0, %v3925_v10  ;;  %2199 = vst.msk [vmem:[#allocation2 + $0x160] sm:$0xff] %vm13_vm0, %v3930_v11 }
   0xb   :  { %186 = vrot.lane.b32.xlu1 %v3886_v5, %s3815_s15  ;;  %2140 = vst.msk [vmem:[#allocation2 + $0x118] sm:$0xff] %vm13_vm0, %v3935_v12  ;;  %v3973_v20 = vld [vmem:[#allocation2 + $0x78] sm:$0xff]  ;;  %v3975_v21 = vld [vmem:[#allocation2 + $0x110] sm:$0xff]  ;;  %v3980_v22 = vld [vmem:[%s6478_s0 + $0x20] sm:$0xff] }
   0xc   :  { %6592 = vst [vmem:[#allocation3_spill] sm:$0xff] %v3973_v20  ;;  %v3985_v23 = vld [vmem:[%s6478_s0 + $0x1a] sm:$0xff]  ;;  %2020 = vst.msk [vmem:[#allocation2 + $0x78] sm:$0xff] %vm13_vm0, %v3940_v13  ;;  %v3991_v24 = vld [vmem:[#allocation2 + $0x70] sm:$0xff]  ;;  %s3816_s0 = smov 114  }
   0xd   :  { %2139 = vst.msk [vmem:[#allocation2 + $0x110] sm:$0xff] %vm13_vm0, %v3945_v14  ;;  %6593 = vst [vmem:[#allocation4_spill] sm:$0xff] %v3991_v24  ;;  %v3993_v25 = vld [vmem:[#allocation2 + $0xc8] sm:$0xff]  ;;  %v3995_v26 = vld [vmem:[#allocation2 + $0xc0] sm:$0xff] }
   0xe   :  { %2019 = vst.msk [vmem:[#allocation2 + $0x70] sm:$0xff] %vm13_vm0, %v3956_v18  ;;  %2080 = vst.msk [vmem:[#allocation2 + $0xc8] sm:$0xff] %vm13_vm0, %v3961_v19  ;;  %v4001_v27 = vld [vmem:[#allocation2 + $0x28] sm:$0xff]  ;;  %v4010_v29 = vld [vmem:[#allocation2 + $0x20] sm:$0xff]  ;;  %118 = vrot.lane.b32.xlu0 %v3891_v6, %s3815_s15 }
   0xf   :  { %6594 = vst [vmem:[#allocation5_spill] sm:$0xff] %v4001_v27  ;;  %2079 = vst.msk [vmem:[#allocation2 + $0xc0] sm:$0xff] %vm13_vm0, %v3985_v23  ;;  %183 = vrot.lane.b32.xlu1 %v3896_v7, %s3815_s15 }
  0x10   :  { %6595 = vst [vmem:[#allocation6_spill] sm:$0xff] %v4010_v29  ;;  %1960 = vst.msk [vmem:[#allocation2 + $0x28] sm:$0xff] %vm13_vm0, %v3980_v22 }
  0x11   :  { %1959 = vst.msk [vmem:[#allocation2 + $0x20] sm:$0xff] %vm13_vm0, %v4008_v28 }
  0x12   :  { %57 = vrot.lane.b32.xlu0 %v3907_v8, %s3815_s15 }
  0x13   :  { %54 = vrot.lane.b32.xlu1 %v3912_v9, %s3815_s15 }
  0x16   :  { %2168 = vrot.lane.b32.xlu0 %v3925_v10, %s3815_s15 }
  0x17   :  { %2165 = vrot.lane.b32.xlu1 %v3930_v11, %s3815_s15 }
  0x1a   :  { %2108 = vrot.lane.b32.xlu0 %v3935_v12, %s3815_s15 }
  0x1b   :  { %2105 = vrot.lane.b32.xlu1 %v3945_v14, %s3815_s15 }
  0x1e   :  { %1988 = vrot.lane.b32.xlu0 %v3940_v13, %s3815_s15 }
  0x1f   :  { %2048 = vrot.lane.b32.xlu1 %v3961_v19, %s3815_s15 }
  0x22   :  { %1985 = vrot.lane.b32.xlu0 %v3956_v18, %s3815_s15 }
  0x23   :  { %2045 = vrot.lane.b32.xlu1 %v3985_v23, %s3815_s15 }
  0x26   :  { %1928 = vrot.lane.b32.xlu0 %v3980_v22, %s3815_s15 }
  0x27   :  { %1925 = vrot.lane.b32.xlu1 %v4008_v28, %s3815_s15 }
  0x74   :  { %v317_v30 = vpop.permute.xlu0 %316 }
  0x75   :  { %v252_v31 = vpop.permute.xlu1 %251  ;;  %v318_v32 = vsel %vm53_vm1, %v317_v30, %v3847_v0 }
  0x76   :  { %321 = vrot.lane.b32.xlu0 %v318_v32, %s3815_s15  ;;  %v253_v33 = vsel %vm53_vm1, %v252_v31, %v3857_v2 }
  0x78   :  { %v314_v34 = vpop.permute.xlu0 %313 }
  0x79   :  { %v249_v35 = vpop.permute.xlu1 %248  ;;  %v315_v36 = vsel %vm53_vm1, %v314_v34, %v3852_v1 }
  0x7a   :  { %256 = vrot.lane.b32.xlu0 %v253_v33, %s3815_s15  ;;  %319 = vrot.lane.b32.xlu1 %v315_v36, %s3815_s15  ;;  %v250_v37 = vsel %vm53_vm1, %v249_v35, %v3872_v3 }
  0x7c   :  { %v122_v38 = vpop.permute.xlu0 %121 }
  0x7d   :  { %v187_v39 = vpop.permute.xlu1 %186  ;;  %v123_v40 = vsel %vm53_vm1, %v122_v38, %v3877_v4 }
  0x7e   :  { %126 = vrot.lane.b32.xlu0 %v123_v40, %s3815_s15  ;;  %254 = vrot.lane.b32.xlu1 %v250_v37, %s3815_s15  ;;  %v188_v41 = vsel %vm53_vm1, %v187_v39, %v3886_v5 }
  0x80   :  { %v119_v42 = vpop.permute.xlu0 %118 }
  0x81   :  { %v184_v43 = vpop.permute.xlu1 %183  ;;  %v120_v44 = vsel %vm53_vm1, %v119_v42, %v3891_v6 }
  0x82   :  { %124 = vrot.lane.b32.xlu0 %v120_v44, %s3815_s15  ;;  %191 = vrot.lane.b32.xlu1 %v188_v41, %s3815_s15  ;;  %v185_v45 = vsel %vm53_vm1, %v184_v43, %v3896_v7 }
  0x84   :  { %v58_v46 = vpop.permute.xlu0 %57 }
  0x85   :  { %v55_v47 = vpop.permute.xlu1 %54  ;;  %v59_v48 = vsel %vm53_vm1, %v58_v46, %v3907_v8 }
  0x86   :  { %62 = vrot.lane.b32.xlu0 %v59_v48, %s3815_s15  ;;  %189 = vrot.lane.b32.xlu1 %v185_v45, %s3815_s15  ;;  %v56_v49 = vsel %vm53_vm1, %v55_v47, %v3912_v9  ;;  %v6481_v48 = vmov 0.0  }
  0x87   :  { %15 = vst.msk [vmem:[#allocation2 + $0x198] sm:$0xff] %vm13_vm0, %v6481_v48  ;;  %17 = vst.msk [vmem:[#allocation2 + $0x1a8] sm:$0xff] %vm13_vm0, %v6481_v48  ;;  %1888 = vmatprep.mubr.f32.mxu0 %v6481_v48  ;;  %3717 = vmatprep.mubr.f32.mxu1 %v6481_v48 }
  0x88   :  { %v2169_v50 = vpop.permute.xlu0 %2168  ;;  %19 = vst.msk [vmem:[#allocation2 + $0x1b8] sm:$0xff] %vm13_vm0, %v6481_v48  ;;  %21 = vst.msk [vmem:[#allocation2 + $0x1c8] sm:$0xff] %vm13_vm0, %v6481_v48 }
  0x89   :  { %v2166_v51 = vpop.permute.xlu1 %2165  ;;  %v2170_v52 = vsel %vm53_vm1, %v2169_v50, %v3925_v10  ;;  %23 = vst.msk [vmem:[#allocation2 + $0x1d8] sm:$0xff] %vm13_vm0, %v6481_v48  ;;  %25 = vst.msk [vmem:[#allocation2 + $0x1e8] sm:$0xff] %vm13_vm0, %v6481_v48 }
  0x8a   :  { %60 = vrot.lane.b32.xlu1 %v56_v49, %s3815_s15  ;;  %2173 = vrot.lane.b32.xlu0 %v2170_v52, %s3815_s15  ;;  %v2167_v53 = vsel %vm53_vm1, %v2166_v51, %v3930_v11  ;;  %27 = vst.msk [vmem:[#allocation2 + $0x1f8] sm:$0xff] %vm13_vm0, %v6481_v48  ;;  %14 = vst.msk [vmem:[#allocation2 + $0x190] sm:$0xff] %vm13_vm0, %v6481_v48 }
  0x8b   :  { %16 = vst.msk [vmem:[#allocation2 + $0x1a0] sm:$0xff] %vm13_vm0, %v6481_v48  ;;  %18 = vst.msk [vmem:[#allocation2 + $0x1b0] sm:$0xff] %vm13_vm0, %v6481_v48 }
  0x8c   :  { %v2109_v54 = vpop.permute.xlu0 %2108  ;;  %20 = vst.msk [vmem:[#allocation2 + $0x1c0] sm:$0xff] %vm13_vm0, %v6481_v48  ;;  %22 = vst.msk [vmem:[#allocation2 + $0x1d0] sm:$0xff] %vm13_vm0, %v6481_v48 }
  0x8d   :  { %v2106_v55 = vpop.permute.xlu1 %2105  ;;  %v2110_v56 = vsel %vm53_vm1, %v2109_v54, %v3935_v12  ;;  %24 = vst.msk [vmem:[#allocation2 + $0x1e0] sm:$0xff] %vm13_vm0, %v6481_v48  ;;  %26 = vst.msk [vmem:[#allocation2 + $0x1f0] sm:$0xff] %vm13_vm0, %v6481_v48 }
  0x8e   :  { %2171 = vrot.lane.b32.xlu1 %v2167_v53, %s3815_s15  ;;  %2113 = vrot.lane.b32.xlu0 %v2110_v56, %s3815_s15  ;;  %v2107_v57 = vsel %vm53_vm1, %v2106_v55, %v3945_v14 }
  0x90   :  { %v1989_v58 = vpop.permute.xlu0 %1988 }
  0x91   :  { %v2049_v59 = vpop.permute.xlu1 %2048  ;;  %v1990_v60 = vsel %vm53_vm1, %v1989_v58, %v3940_v13 }
  0x92   :  { %2111 = vrot.lane.b32.xlu1 %v2107_v57, %s3815_s15  ;;  %1993 = vrot.lane.b32.xlu0 %v1990_v60, %s3815_s15  ;;  %v2050_v61 = vsel %vm53_vm1, %v2049_v59, %v3961_v19 }
  0x94   :  { %v1986_v62 = vpop.permute.xlu0 %1985 }
  0x95   :  { %v2046_v63 = vpop.permute.xlu1 %2045  ;;  %v1987_v30 = vsel %vm53_vm1, %v1986_v62, %v3956_v18 }
  0x96   :  { %2053 = vrot.lane.b32.xlu1 %v2050_v61, %s3815_s15  ;;  %1991 = vrot.lane.b32.xlu0 %v1987_v30, %s3815_s15  ;;  %v2047_v31 = vsel %vm53_vm1, %v2046_v63, %v3985_v23 }
  0x98   :  { %v1929_v32 = vpop.permute.xlu0 %1928 }
  0x99   :  { %v1926_v33 = vpop.permute.xlu1 %1925  ;;  %v1930_v34 = vsel %vm53_vm1, %v1929_v32, %v3980_v22 }
  0x9a   :  { %2051 = vrot.lane.b32.xlu1 %v2047_v31, %s3815_s15  ;;  %1933 = vrot.lane.b32.xlu0 %v1930_v34, %s3815_s15  ;;  %v1927_v35 = vsel %vm53_vm1, %v1926_v33, %v4008_v28 }
  0x9e   :  { %1931 = vrot.lane.b32.xlu1 %v1927_v35, %s3815_s15 }
  0xe8   :  { %v322_v36 = vpop.permute.xlu0 %321 }
  0xe9   :  { %v324_v50 = vsel %vm53_vm1, %v322_v36, %v3847_v0 }
  0xec   :  { %v257_v37 = vpop.permute.xlu0 %256  ;;  %v320_v38 = vpop.permute.xlu1 %319 }
  0xf0   :  { %v127_v39 = vpop.permute.xlu0 %126  ;;  %v255_v40 = vpop.permute.xlu1 %254 }
  0xf4   :  { %v125_v41 = vpop.permute.xlu0 %124  ;;  %v192_v42 = vpop.permute.xlu1 %191 }
  0xf5   :  { %v128_v49 = vsel %vm53_vm1, %v125_v41, %v3891_v6  ;;  %v194_v0 = vsel %vm53_vm1, %v192_v42, %v3886_v5 }
  0xf8   :  { %v63_v43 = vpop.permute.xlu0 %62  ;;  %v4104_v44 = vpop.permute.xlu1 %189 }
  0xf9   :  { %v65_v45 = vsel %vm53_vm1, %v63_v43, %v3907_v8  ;;  %v129_v8 = vsel %vm53_vm1, %v127_v39, %v3877_v4  ;;  %v259_v4 = vsel %vm53_vm1, %v257_v37, %v3857_v2  ;;  %v193_v2 = vsel %vm53_vm1, %v4104_v44, %v3896_v7 }
  0xfa   :  { %70 = vrot.lane.b32.xlu1 %v65_v45, %s3816_s0  ;;  %v3821_v44 = vmov 1983009808  }
  0xfc   :  { %v61_v46 = vpop.permute.xlu1 %60 }
  0xfd   :  { %v64_v47 = vsel %vm53_vm1, %v61_v46, %v3912_v9  ;;  %v323_v9 = vsel %vm53_vm1, %v320_v38, %v3852_v1  ;;  %v258_v1 = vsel %vm53_vm1, %v255_v40, %v3872_v3  ;;  %v2174_v3 = vpop.permute.xlu0 %2173 }
  0xfe   :  { %80 = vrot.lane.b32.xlu1 %v65_v45, %s3817_s23  ;;  %68 = vrot.lane.b32.xlu0 %v64_v47, %s3816_s0  ;;  %v2176_v51 = vsel %vm53_vm1, %v2174_v3, %v3925_v10  ;;  %v28_v10 = vlaneseq }
 0x100   :  { %v2172_v5 = vpop.permute.xlu1 %2171  ;;  %v29_v54 = vand.u32 127, %v28_v10 }
 0x101   :  { %v2175_v6 = vsel %vm53_vm1, %v2172_v5, %v3930_v11  ;;  %v2114_v7 = vpop.permute.xlu0 %2113 }
 0x102   :  { %94 = vrot.lane.b32.xlu1 %v65_v45, %s3818_s24  ;;  %78 = vrot.lane.b32.xlu0 %v64_v47, %s3817_s23  ;;  %v2116_v52 = vsel %vm53_vm1, %v2114_v7, %v3935_v12  ;;  %v34_v59 = vadd.s32 4294967295, %v29_v54  ;;  %v4251_v31 = vadd.s32 1, %v29_v54  ;;  %v4267_v37 = vadd.s32 2, %v29_v54 }
 0x104   :  { %v2112_v11 = vpop.permute.xlu1 %2111  ;;  %vm35_vm5 = vcmp.ge.s32.totalorder %v34_v59, 0  ;;  %vm36_vm6 = vcmp.lt.s32.totalorder %v34_v59, 16  ;;  %vm40_vm8 = vcmp.lt.s32.totalorder %v4251_v31, 16  ;;  %vm44_vm9 = vcmp.lt.s32.totalorder %v4267_v37, 16  ;;  %v4329_v59 = vld [vmem:[#allocation2 + $0x1c8] sm:$0xff] }
 0x105   :  { %v4212_v53 = vsel %vm53_vm1, %v2112_v11, %v3945_v14  ;;  %v1994_v55 = vpop.permute.xlu0 %1993  ;;  %v30_v14 = vadd.s32 4294967294, %v29_v54  ;;  %vm4247_vm7 = vmand %vm35_vm5, %vm36_vm6  ;;  %v4323_v54 = vld [vmem:[#allocation2 + $0x1b0] sm:$0xff] }
 0x106   :  { %105 = vrot.lane.b32.xlu1 %v65_v45, %s3820_s25  ;;  %92 = vrot.lane.b32.xlu0 %v64_v47, %s3818_s24  ;;  %v4226_v57 = vsel %vm53_vm1, %v1994_v55, %v3940_v13  ;;  %v4325_v55 = vld [vmem:[#allocation2 + $0x1c0] sm:$0xff] }
 0x107   :  { %vm31_vm2 = vcmp.ge.s32.totalorder %v30_v14, 0  ;;  %vm32_vm3 = vcmp.lt.s32.totalorder %v30_v14, 16 }
 0x108   :  { %v2054_v12 = vpop.permute.xlu1 %2053  ;;  %vm4238_vm4 = vmand %vm31_vm2, %vm32_vm3 }
 0x109   :  { %v1992_v58 = vpop.permute.xlu0 %1991  ;;  %v2056_v61 = vsel %vm53_vm1, %v2054_v12, %v3961_v19 }
 0x10a   :  { %134 = vrot.lane.b32.xlu1 %v129_v8, %s3816_s0  ;;  %103 = vrot.lane.b32.xlu0 %v64_v47, %s3820_s25  ;;  %v4255_v34 = vsel %vm53_vm1, %v1992_v58, %v3956_v18 }
 0x10c   :  { %v2052_v56 = vpop.permute.xlu1 %2051 }
 0x10d   :  { %v1934_v62 = vpop.permute.xlu0 %1933  ;;  %v2055_v39 = vsel %vm53_vm1, %v2052_v56, %v3985_v23  ;;  %v441_v23 = vunpack.c.l.s4 %v3821_v44  ;;  %v4327_v56 = vld [vmem:[#allocation2 + $0x1d0] sm:$0xff] }
 0x10e   :  { %363 = vrot.lane.b32.xlu1 %v323_v9, %s3820_s25  ;;  %132 = vrot.lane.b32.xlu0 %v128_v49, %s3816_s0 }
 0x110   :  { %v4231_v60 = vpop.permute.xlu1 %1931 }
 0x112   :  { %289 = vrot.lane.b32.xlu1 %v259_v4, %s3818_s24  ;;  %365 = vrot.lane.b32.xlu0 %v324_v50, %s3820_s25 }
 0x116   :  { %329 = vrot.lane.b32.xlu1 %v324_v50, %s3816_s0  ;;  %275 = vrot.lane.b32.xlu0 %v259_v4, %s3817_s23 }
 0x11a   :  { %354 = vrot.lane.b32.xlu1 %v324_v50, %s3818_s24  ;;  %300 = vrot.lane.b32.xlu0 %v259_v4, %s3820_s25 }
 0x11e   :  { %287 = vrot.lane.b32.xlu1 %v258_v1, %s3818_s24  ;;  %340 = vrot.lane.b32.xlu0 %v324_v50, %s3817_s23 }
 0x122   :  { %327 = vrot.lane.b32.xlu1 %v323_v9, %s3816_s0  ;;  %273 = vrot.lane.b32.xlu0 %v258_v1, %s3817_s23 }
 0x126   :  { %352 = vrot.lane.b32.xlu1 %v323_v9, %s3818_s24  ;;  %298 = vrot.lane.b32.xlu0 %v258_v1, %s3820_s25 }
 0x12a   :  { %170 = vrot.lane.b32.xlu1 %v129_v8, %s3820_s25  ;;  %338 = vrot.lane.b32.xlu0 %v323_v9, %s3817_s23  ;;  %v442_v9 = vunpack.c.0.s8 %v441_v23 }
 0x12e   :  { %210 = vrot.lane.b32.xlu1 %v194_v0, %s3817_s23  ;;  %159 = vrot.lane.b32.xlu0 %v129_v8, %s3818_s24 }
 0x132   :  { %235 = vrot.lane.b32.xlu1 %v194_v0, %s3820_s25  ;;  %199 = vrot.lane.b32.xlu0 %v194_v0, %s3816_s0 }
 0x136   :  { %157 = vrot.lane.b32.xlu1 %v128_v49, %s3818_s24  ;;  %224 = vrot.lane.b32.xlu0 %v194_v0, %s3818_s24 }
 0x13a   :  { %197 = vrot.lane.b32.xlu1 %v193_v2, %s3816_s0  ;;  %264 = vrot.lane.b32.xlu0 %v259_v4, %s3816_s0 }
 0x13e   :  { %222 = vrot.lane.b32.xlu1 %v193_v2, %s3818_s24  ;;  %168 = vrot.lane.b32.xlu0 %v128_v49, %s3820_s25 }
 0x142   :  { %262 = vrot.lane.b32.xlu1 %v258_v1, %s3816_s0  ;;  %208 = vrot.lane.b32.xlu0 %v193_v2, %s3817_s23 }
 0x146   :  { %143 = vrot.lane.b32.xlu1 %v128_v49, %s3817_s23  ;;  %233 = vrot.lane.b32.xlu0 %v193_v2, %s3820_s25  ;;  %v444_v49 = vshrl.u32 %v28_v10, 7 }
 0x148   :  { %v4301_v2 = vsub.s32 %v442_v9, %v444_v49 }
 0x14a   :  { %145 = vrot.lane.b32.xlu0 %v129_v8, %s3817_s23  ;;  %2211 = vrot.lane.b32.xlu1 %v2175_v6, %s3820_s25 }
 0x14e   :  { %2213 = vrot.lane.b32.xlu0 %v2176_v51, %s3820_s25  ;;  %2143 = vrot.lane.b32.xlu1 %v2116_v52, %s3818_s24 }
 0x152   :  { %2131 = vrot.lane.b32.xlu0 %v2116_v52, %s3817_s23  ;;  %2181 = vrot.lane.b32.xlu1 %v2176_v51, %s3816_s0 }
 0x156   :  { %2153 = vrot.lane.b32.xlu0 %v2116_v52, %s3820_s25  ;;  %2203 = vrot.lane.b32.xlu1 %v2176_v51, %s3818_s24 }
 0x15a   :  { %2191 = vrot.lane.b32.xlu0 %v2176_v51, %s3817_s23  ;;  %2141 = vrot.lane.b32.xlu1 %v4212_v53, %s3818_s24 }
 0x15e   :  { %2179 = vrot.lane.b32.xlu1 %v2175_v6, %s3816_s0  ;;  %2129 = vrot.lane.b32.xlu0 %v4212_v53, %s3817_s23 }
 0x162   :  { %2201 = vrot.lane.b32.xlu1 %v2175_v6, %s3818_s24  ;;  %2151 = vrot.lane.b32.xlu0 %v4212_v53, %s3820_s25 }
 0x166   :  { %2033 = vrot.lane.b32.xlu1 %v4226_v57, %s3820_s25  ;;  %2189 = vrot.lane.b32.xlu0 %v2175_v6, %s3817_s23  ;;  %v1936_v6 = vsel %vm53_vm1, %v1934_v62, %v3980_v22  ;;  %v4319_v22 = vld [vmem:[#allocation2 + $0x190] sm:$0xff] }
 0x167   :  { %v4333_v62 = vld [vmem:[#allocation2 + $0x1f0] sm:$0xff] }
 0x168   :  { %v894_v44 = vcombine.low %v4327_v56, %v4333_v62 }
 0x16a   :  { %2023 = vrot.lane.b32.xlu0 %v4226_v57, %s3818_s24  ;;  %2071 = vrot.lane.b32.xlu1 %v2056_v61, %s3817_s23 }
 0x16c   :  { %v71_v63 = vpop.permute.xlu1 %70 }
 0x16d   :  { %v75_v30 = vsel %vm4238_vm4, %v71_v63, 0.0 }
 0x16e   :  { %77 = vst.msk [vmem:[#allocation2 + $0x8] sm:$0xff] %vm13_vm0, %v75_v30  ;;  %2093 = vrot.lane.b32.xlu1 %v2056_v61, %s3820_s25  ;;  %2061 = vrot.lane.b32.xlu0 %v2056_v61, %s3816_s0 }
 0x170   :  { %v69_v32 = vpop.permute.xlu0 %68  ;;  %v81_v33 = vpop.permute.xlu1 %80 }
 0x171   :  { %v74_v35 = vsel %vm4238_vm4, %v69_v32, 0.0  ;;  %v85_v36 = vsel %vm4247_vm7, %v81_v33, 0.0 }
 0x172   :  { %76 = vst.msk [vmem:[#allocation2] sm:$0xff] %vm13_vm0, %v74_v35  ;;  %88 = vst.msk [vmem:[#allocation2 + $0x18] sm:$0xff] %vm13_vm0, %v85_v36  ;;  %2021 = vrot.lane.b32.xlu1 %v4255_v34, %s3818_s24  ;;  %2083 = vrot.lane.b32.xlu0 %v2056_v61, %s3818_s24  ;;  %v4331_v61 = vld [vmem:[#allocation2 + $0x1e0] sm:$0xff]  ;;  %v4345_v35 = vld [vmem:[#allocation2 + $0x1d8] sm:$0xff] }
 0x173   :  { %v4347_v36 = vld [vmem:[#allocation2 + $0x1e8] sm:$0xff] }
 0x174   :  { %v79_v18 = vpop.permute.xlu0 %78  ;;  %v95_v38 = vpop.permute.xlu1 %94 }
 0x175   :  { %v84_v40 = vsel %vm4247_vm7, %v79_v18, 0.0  ;;  %v99_v41 = vsel %vm40_vm8, %v95_v38, 0.0  ;;  %v4349_v18 = vld [vmem:[#allocation2 + $0x1f8] sm:$0xff] }
 0x176   :  { %87 = vst.msk [vmem:[#allocation2 + $0x10] sm:$0xff] %vm13_vm0, %v84_v40  ;;  %102 = vst.msk [vmem:[#allocation2 + $0x38] sm:$0xff] %vm13_vm0, %v99_v41  ;;  %2121 = vrot.lane.b32.xlu0 %v2116_v52, %s3816_s0  ;;  %2059 = vrot.lane.b32.xlu1 %v2055_v39, %s3816_s0  ;;  %v425_v40 = vld [vmem:[#allocation2 + $0x198] sm:$0xff] }
 0x177   :  { %v429_v41 = vld [vmem:[#allocation2 + $0x1b8] sm:$0xff] }
 0x178   :  { %v93_v42 = vpop.permute.xlu0 %92  ;;  %v106_v43 = vpop.permute.xlu1 %105 }
 0x179   :  { %v98_v45 = vsel %vm40_vm8, %v93_v42, 0.0  ;;  %v110_v46 = vsel %vm44_vm9, %v106_v43, 0.0  ;;  %v4294_v1 = vld [vmem:[#allocation2] sm:$0xff]  ;;  %v862_v42 = vcombine.low %v4319_v22, %v4323_v54  ;;  %v878_v43 = vcombine.low %v4325_v55, %v4331_v61  ;;  %v4533_v48 = vld [vmem:[#allocation2 + $0x18] sm:$0xff] }
 0x17a   :  { %101 = vst.msk [vmem:[#allocation2 + $0x30] sm:$0xff] %vm13_vm0, %v98_v45  ;;  %113 = vst.msk [vmem:[#allocation2 + $0x48] sm:$0xff] %vm13_vm0, %v110_v46  ;;  %2031 = vrot.lane.b32.xlu0 %v4255_v34, %s3820_s25  ;;  %2081 = vrot.lane.b32.xlu1 %v2055_v39, %s3818_s24  ;;  %v438_v5 = vcombine.low %v4294_v1, %v4010_v29  ;;  %v1422_v46 = vcombine.low %v4329_v59, %v4347_v36 }
 0x17b   :  { %6600 = vst [vmem:[#allocation7_spill] sm:$0xff] %v4294_v1  ;;  %6610 = vst [vmem:[#allocation17_spill] sm:$0xff] %v4533_v48 }
 0x17c   :  { %v104_v47 = vpop.permute.xlu0 %103  ;;  %v135_v8 = vpop.permute.xlu1 %134  ;;  %v4336_v63 = vrot.slane %v438_v5, %v4301_v2  ;;  %v886_v5 = vrot.slane %v878_v43, %v4301_v2 }
 0x17d   :  { %v109_v50 = vsel %vm44_vm9, %v104_v47, 0.0  ;;  %v139_v4 = vsel %vm4238_vm4, %v135_v8, 0.0  ;;  %v4311_v52 = vld [vmem:[#allocation2 + $0x10] sm:$0xff]  ;;  %v1438_v47 = vcombine.low %v4345_v35, %v4349_v18 }
 0x17e   :  { %112 = vst.msk [vmem:[#allocation2 + $0x40] sm:$0xff] %vm13_vm0, %v109_v50  ;;  %142 = vst.msk [vmem:[#allocation2 + $0x58] sm:$0xff] %vm13_vm0, %v139_v4  ;;  %2069 = vrot.lane.b32.xlu0 %v2055_v39, %s3817_s23  ;;  %2119 = vrot.lane.b32.xlu1 %v4212_v53, %s3816_s0  ;;  %v3822_v53 = vmov 1934713408   ;;  %v1406_v4 = vcombine.low %v425_v40, %v429_v41 }
 0x17f   :  { %6601 = vst [vmem:[#allocation8_spill] sm:$0xff] %v4311_v52  ;;  %v505_v10 = vunpack.c.l.s4 %v3822_v53  ;;  %6603 = vst [vmem:[#allocation10_spill] sm:$0xff] %v4336_v63 }
 0x180   :  { %v133_v0 = vpop.permute.xlu0 %132  ;;  %v364_v3 = vpop.permute.xlu1 %363 }
 0x181   :  { %v138_v7 = vsel %vm4238_vm4, %v133_v0, 0.0  ;;  %v369_v51 = vsel %vm44_vm9, %v364_v3, 0.0  ;;  %v4313_v11 = vld [vmem:[#allocation2 + $0x30] sm:$0xff]  ;;  %v506_v38 = vunpack.c.0.s8 %v505_v10  ;;  %v4378_v0 = vld [vmem:[#allocation2 + $0x1a8] sm:$0xff]  ;;  %v4381_v3 = vrot.slane %v862_v42, %v4301_v2 }
 0x182   :  { %6602 = vst [vmem:[#allocation9_spill] sm:$0xff] %v4313_v11  ;;  %141 = vst.msk [vmem:[#allocation2 + $0x50] sm:$0xff] %vm13_vm0, %v138_v7  ;;  %2091 = vrot.lane.b32.xlu0 %v2055_v39, %s3820_s25  ;;  %1951 = vrot.lane.b32.xlu1 %v1936_v6, %s3817_s23  ;;  %v454_v12 = vcombine.low %v4311_v52, %v4313_v11  ;;  %v863_v7 = vcombine.high %v4319_v22, %v4323_v54 }
 0x183   :  { %372 = vst.msk [vmem:[#allocation2 + $0x180] sm:$0xff] %vm13_vm0, %v369_v51  ;;  %v4371_v50 = vsub.s32 %v506_v38, %v444_v49  ;;  %v902_v49 = vrot.slane %v894_v44, %v4301_v2  ;;  %v1446_v10 = vrot.slane %v1438_v47, %v4301_v2  ;;  %v1423_v42 = vcombine.high %v4329_v59, %v4347_v36 }
 0x184   :  { %v366_v14 = vpop.permute.xlu0 %365  ;;  %v290_v58 = vpop.permute.xlu1 %289  ;;  %v4339_v30 = vrot.slane %v454_v12, %v4301_v2  ;;  %v4418_v36 = vrot.slane %v863_v7, %v4301_v2 }
 0x185   :  { %v370_v32 = vsel %vm44_vm9, %v366_v14, 0.0  ;;  %v294_v33 = vsel %vm40_vm8, %v290_v58, 0.0  ;;  %v4389_v14 = vld [vmem:[#allocation2 + $0x1a0] sm:$0xff]  ;;  %v1407_v58 = vcombine.high %v425_v40, %v429_v41  ;;  %v4558_v29 = vld [vmem:[#allocation2 + $0x58] sm:$0xff] }
 0x186   :  { %6604 = vst [vmem:[#allocation11_spill] sm:$0xff] %v4339_v30  ;;  %373 = vst.msk [vmem:[#allocation2 + $0x188] sm:$0xff] %vm13_vm0, %v370_v32  ;;  %1941 = vrot.lane.b32.xlu0 %v1936_v6, %s3816_s0  ;;  %1973 = vrot.lane.b32.xlu1 %v1936_v6, %s3820_s25  ;;  %v879_v32 = vcombine.high %v4325_v55, %v4331_v61  ;;  %v1439_v55 = vcombine.high %v4345_v35, %v4349_v18 }
 0x187   :  { %297 = vst.msk [vmem:[#allocation2 + $0x128] sm:$0xff] %vm13_vm0, %v294_v33  ;;  %v1935_v33 = vsel %vm53_vm1, %v4231_v60, %v4008_v28  ;;  %v4412_v60 = vrot.slane %v1406_v4, %v4301_v2  ;;  %v942_v61 = vcombine.low %v886_v5, %v902_v49  ;;  %6612 = vst [vmem:[#allocation19_spill] sm:$0xff] %v4558_v29 }
 0x188   :  { %v276_v23 = vpop.permute.xlu0 %275  ;;  %v330_v45 = vpop.permute.xlu1 %329 }
 0x189   :  { %v280_v8 = vsel %vm4247_vm7, %v276_v23, 0.0  ;;  %v334_v9 = vsel %vm4238_vm4, %v330_v45, 0.0  ;;  %v943_v23 = vcombine.high %v886_v5, %v902_v49  ;;  %v4424_v45 = vrot.slane %v1407_v58, %v4301_v2 }
 0x18a   :  { %283 = vst.msk [vmem:[#allocation2 + $0x108] sm:$0xff] %vm13_vm0, %v280_v8  ;;  %337 = vst.msk [vmem:[#allocation2 + $0x148] sm:$0xff] %vm13_vm0, %v334_v9  ;;  %1963 = vrot.lane.b32.xlu0 %v1936_v6, %s3818_s24  ;;  %2011 = vrot.lane.b32.xlu1 %v4226_v57, %s3817_s23  ;;  %v1430_v6 = vrot.slane %v1422_v46, %v4301_v2  ;;  %v422_v12 = vld [vmem:[#allocation2 + $0x180] sm:$0xff]  ;;  %v4440_v8 = vrot.slane %v1439_v55, %v4301_v2 }
 0x18b   :  { %v846_v59 = vcombine.low %v422_v12, %v4389_v14  ;;  %v847_v47 = vcombine.high %v422_v12, %v4389_v14  ;;  %v4444_v4 = vrot.slane %v942_v61, %v4371_v50  ;;  %v4449_v49 = vrot.slane %v879_v32, %v4301_v2 }
 0x18c   :  { %v301_v51 = vpop.permute.xlu0 %300  ;;  %v355_v53 = vpop.permute.xlu1 %354  ;;  %v1487_v44 = vcombine.high %v1430_v6, %v1446_v10  ;;  %v1486_v46 = vcombine.low %v1430_v6, %v1446_v10  ;;  %v4462_v58 = vrot.slane %v943_v23, %v4371_v50 }
 0x18d   :  { %v305_v22 = vsel %vm44_vm9, %v301_v51, 0.0  ;;  %v359_v54 = vsel %vm40_vm8, %v355_v53, 0.0  ;;  %v4400_v38 = vld [vmem:[#allocation2 + $0x188] sm:$0xff]  ;;  %v854_v9 = vrot.slane %v846_v59, %v4301_v2  ;;  %6605 = vst [vmem:[#allocation12_spill] sm:$0xff] %v4444_v4  ;;  %v4478_v59 = vrot.slane %v847_v47, %v4301_v2 }
 0x18e   :  { %308 = vst.msk [vmem:[#allocation2 + $0x138] sm:$0xff] %vm13_vm0, %v305_v22  ;;  %362 = vst.msk [vmem:[#allocation2 + $0x178] sm:$0xff] %vm13_vm0, %v359_v54  ;;  %2001 = vrot.lane.b32.xlu0 %v4226_v57, %s3816_s0  ;;  %1949 = vrot.lane.b32.xlu1 %v1935_v33, %s3817_s23  ;;  %v1390_v28 = vcombine.low %v4400_v38, %v4378_v0  ;;  %v895_v57 = vcombine.high %v4327_v56, %v4333_v62 }
 0x18f   :  { %v4437_v62 = vrot.slane %v1423_v42, %v4301_v2  ;;  %v4458_v10 = vrot.slane %v1487_v44, %v4371_v50  ;;  %v4469_v54 = vrot.slane %v1486_v46, %v4371_v50  ;;  %v4471_v42 = vld [vmem:[#allocation2 + $0x128] sm:$0xff]  ;;  %v1391_v44 = vcombine.high %v4400_v38, %v4378_v0  ;;  %v4509_v38 = vld [vmem:[#allocation2 + $0x38] sm:$0xff] }
 0x190   :  { %v341_v40 = vpop.permute.xlu0 %340  ;;  %v288_v41 = vpop.permute.xlu1 %287  ;;  %v1398_v43 = vrot.slane %v1390_v28, %v4301_v2  ;;  %v4452_v7 = vrot.slane %v895_v57, %v4301_v2  ;;  %6609 = vst [vmem:[#allocation16_spill] sm:$0xff] %v4509_v38 }
 0x191   :  { %v345_v35 = vsel %vm4247_vm7, %v341_v40, 0.0  ;;  %v293_v18 = vsel %vm40_vm8, %v288_v41, 0.0  ;;  %v4446_v5 = vld [vmem:[#allocation2 + $0x108] sm:$0xff]  ;;  %6606 = vst [vmem:[#allocation13_spill] sm:$0xff] %v4469_v54  ;;  %v1502_v40 = vcombine.low %v4437_v62, %v4440_v8  ;;  %v910_v41 = vcombine.low %v854_v9, %v4381_v3 }
 0x192   :  { %348 = vst.msk [vmem:[#allocation2 + $0x158] sm:$0xff] %vm13_vm0, %v345_v35  ;;  %296 = vst.msk [vmem:[#allocation2 + $0x120] sm:$0xff] %vm13_vm0, %v293_v18  ;;  %1971 = vrot.lane.b32.xlu1 %v1935_v33, %s3820_s25  ;;  %1939 = vrot.lane.b32.xlu0 %v1935_v33, %s3816_s0  ;;  %v1455_v56 = vcombine.high %v1398_v43, %v4412_v60  ;;  %v1454_v12 = vcombine.low %v1398_v43, %v4412_v60  ;;  %v4475_v55 = vld [vmem:[#allocation2 + $0x148] sm:$0xff] }
 0x193   :  { %v1254_v61 = vcombine.low %v4446_v5, %v4471_v42  ;;  %v911_v43 = vcombine.high %v854_v9, %v4381_v3  ;;  %v958_v23 = vcombine.low %v4449_v49, %v4452_v7  ;;  %v1286_v9 = vcombine.low %v4475_v55, %v3947_v15 }
 0x194   :  { %v274_v51 = vpop.permute.xlu0 %273  ;;  %v328_v53 = vpop.permute.xlu1 %327  ;;  %v4455_v6 = vrot.slane %v1455_v56, %v4371_v50  ;;  %v4502_v47 = vrot.slane %v1454_v12, %v4371_v50  ;;  %v926_v12 = vcombine.low %v4478_v59, %v4418_v36 }
 0x195   :  { %v279_v32 = vsel %vm4247_vm7, %v274_v51, 0.0  ;;  %v333_v22 = vsel %vm4238_vm4, %v328_v53, 0.0  ;;  %v4473_v28 = vld [vmem:[#allocation2 + $0x138] sm:$0xff]  ;;  %v4551_v1 = vrot.slane %v1286_v9, %v4301_v2  ;;  %v4568_v9 = vrot.slane %v958_v23, %v4371_v50 }
 0x196   :  { %282 = vst.msk [vmem:[#allocation2 + $0x100] sm:$0xff] %vm13_vm0, %v279_v32  ;;  %336 = vst.msk [vmem:[#allocation2 + $0x140] sm:$0xff] %vm13_vm0, %v333_v22  ;;  %2009 = vrot.lane.b32.xlu1 %v4255_v34, %s3817_s23  ;;  %1961 = vrot.lane.b32.xlu0 %v1935_v33, %s3818_s24  ;;  %v1270_v57 = vcombine.low %v3951_v17, %v4473_v28  ;;  %v4497_v33 = vld [vmem:[#allocation2 + $0x8] sm:$0xff]  ;;  %v1520_v46 = vcombine.low %v4455_v6, %v4458_v10  ;;  %v4517_v22 = vld [vmem:[#allocation2 + $0x178] sm:$0xff] }
 0x197   :  { %6607 = vst [vmem:[#allocation14_spill] sm:$0xff] %v4497_v33  ;;  %6608 = vst [vmem:[#allocation15_spill] sm:$0xff] %v4502_v47  ;;  %v1519_v39 = vcombine.high %v4502_v47, %v4469_v54  ;;  %v4565_v11 = vrot.slane %v926_v12, %v4371_v50 }
 0x198   :  { %v299_v35 = vpop.permute.xlu0 %298  ;;  %v353_v18 = vpop.permute.xlu1 %352  ;;  %v4505_v56 = vrot.slane %v1270_v57, %v4301_v2  ;;  %v1503_v57 = vcombine.high %v4437_v62, %v4440_v8  ;;  %v982_v62 = vcombine.low %v4497_v33, %v4001_v27  ;;  %v4538_v8 = vrot.slane %v910_v41, %v4371_v50 }
 0x199   :  { %v304_v51 = vsel %vm44_vm9, %v299_v35, 0.0  ;;  %v358_v53 = vsel %vm40_vm8, %v353_v18, 0.0  ;;  %v4515_v32 = vld [vmem:[#allocation2 + $0x158] sm:$0xff]  ;;  %v4529_v35 = vrot.slane %v1254_v61, %v4301_v2 }
 0x19a   :  { %307 = vst.msk [vmem:[#allocation2 + $0x130] sm:$0xff] %vm13_vm0, %v304_v51  ;;  %361 = vst.msk [vmem:[#allocation2 + $0x170] sm:$0xff] %vm13_vm0, %v358_v53  ;;  %1664 = vrot.lane.b32.xlu1 %v1520_v46, %s3823_s26  ;;  %1999 = vrot.lane.b32.xlu0 %v4255_v34, %s3816_s0  ;;  %v1302_v18 = vcombine.low %v4515_v32, %v4517_v22  ;;  %v4541_v51 = vrot.slane %v911_v43, %v4371_v50 }
 0x19b   :  { %6611 = vst [vmem:[#allocation18_spill] sm:$0xff] %v4538_v8  ;;  %v4544_v46 = vrot.slane %v1391_v44, %v4301_v2  ;;  %v998_v34 = vcombine.low %v4533_v48, %v4509_v38  ;;  %v1318_v43 = vcombine.low %v4529_v35, %v4505_v56 }
 0x19c   :  { %v339_v61 = vpop.permute.xlu0 %338  ;;  %v171_v53 = vpop.permute.xlu1 %170  ;;  %v4554_v41 = vrot.slane %v1302_v18, %v4301_v2  ;;  %v977_v48 = vcombine.high %v4541_v51, %v4462_v58 }
 0x19d   :  { %v344_v44 = vsel %vm4247_vm7, %v339_v61, 0.0  ;;  %v175_v52 = vsel %vm44_vm9, %v171_v53, 0.0  ;;  %v4576_v61 = vrot.slane %v1502_v40, %v4371_v50  ;;  %v4579_v53 = vrot.slane %v1503_v57, %v4371_v50  ;;  %v4583_v23 = vld [vmem:[#allocation2 + $0x100] sm:$0xff] }
 0x19e   :  { %347 = vst.msk [vmem:[#allocation2 + $0x150] sm:$0xff] %vm13_vm0, %v344_v44  ;;  %178 = vst.msk [vmem:[#allocation2 + $0x98] sm:$0xff] %vm13_vm0, %v175_v52  ;;  %1648 = vrot.lane.b32.xlu0 %v1519_v39, %s3815_s15  ;;  %v1350_v18 = vcombine.low %v4551_v1, %v4554_v41  ;;  %v1470_v12 = vcombine.low %v4544_v46, %v4424_v45  ;;  %v4586_v44 = vrot.slane %v982_v62, %v4301_v2 }
 0x19f   :  { %6613 = vst [vmem:[#allocation20_spill] sm:$0xff] %v4579_v53  ;;  %v4589_v52 = vrot.slane %v998_v34, %v4301_v2  ;;  %v975_v57 = vcombine.high %v4538_v8, %v4444_v4  ;;  %v4596_v33 = vrot.slane %v1318_v43, %v4371_v50  ;;  %v976_v62 = vcombine.low %v4541_v51, %v4462_v58  ;;  %v410_v43 = vld [vmem:[#allocation2 + $0x120] sm:$0xff] }
 0x1a0   :  { %v160_v47 = vpop.permute.xlu0 %159  ;;  %v211_v40 = vpop.permute.xlu1 %210  ;;  %v4599_v27 = vrot.slane %v1350_v18, %v4371_v50  ;;  %v414_v18 = vld [vmem:[#allocation2 + $0x140] sm:$0xff]  ;;  %v710_v51 = vcombine.low %v4583_v23, %v410_v43  ;;  %v4624_v4 = vrot.slane %v1470_v12, %v4371_v50  ;;  %v1271_v12 = vcombine.high %v3951_v17, %v4473_v28 }
 0x1a1   :  { %6614 = vst [vmem:[#allocation21_spill] sm:$0xff] %v4596_v33  ;;  %v164_v34 = vsel %vm40_vm8, %v160_v47, 0.0  ;;  %v215_v39 = vsel %vm4247_vm7, %v211_v40, 0.0  ;;  %v4611_v38 = vld [vmem:[#allocation2 + $0x130] sm:$0xff]  ;;  %v1521_v40 = vcombine.high %v4455_v6, %v4458_v10  ;;  %v742_v30 = vcombine.low %v414_v18, %v3949_v16 }
 0x1a2   :  { %6615 = vst [vmem:[#allocation22_spill] sm:$0xff] %v4599_v27  ;;  %167 = vst.msk [vmem:[#allocation2 + $0x88] sm:$0xff] %vm13_vm0, %v164_v34  ;;  %1536 = vrot.lane.b32.xlu0 %v975_v57, %s3815_s15  ;;  %v1383_v47 = vcombine.high %v4596_v33, %v4599_v27  ;;  %v726_v8 = vcombine.low %v3975_v21, %v4611_v38  ;;  %v1351_v34 = vcombine.high %v4551_v1, %v4554_v41  ;;  %v4647_v41 = vld [vmem:[#allocation2 + $0x170] sm:$0xff] }
 0x1a3   :  { %218 = vst.msk [vmem:[#allocation2 + $0xb8] sm:$0xff] %vm13_vm0, %v215_v39  ;;  %v1471_v39 = vcombine.high %v4544_v46, %v4424_v45  ;;  %v1255_v57 = vcombine.high %v4446_v5, %v4471_v42  ;;  %v1303_v1 = vcombine.high %v4515_v32, %v4517_v22  ;;  %v718_v17 = vrot.slane %v710_v51, %v4301_v2 }
 0x1a4   :  { %v200_v54 = vpop.permute.xlu0 %199  ;;  %1646 = vrot.lane.b32.xlu1 %v1383_v47, %s3815_s15  ;;  %v236_v6 = vpop.permute.xlu1 %235  ;;  %v4634_v63 = vrot.slane %v726_v8, %v4301_v2  ;;  %v1319_v8 = vcombine.high %v4529_v35, %v4505_v56  ;;  %v1287_v47 = vcombine.high %v4475_v55, %v3947_v15  ;;  %v711_v28 = vcombine.high %v4583_v23, %v410_v43 }
 0x1a5   :  { %v204_v46 = vsel %vm4238_vm4, %v200_v54, 0.0  ;;  %v240_v5 = vsel %vm44_vm9, %v236_v6, 0.0  ;;  %v4645_v42 = vld [vmem:[#allocation2 + $0x150] sm:$0xff]  ;;  %v743_v32 = vcombine.high %v414_v18, %v3949_v16  ;;  %v1522_v56 = vcombine.low %v4624_v4, %v4576_v61 }
 0x1a6   :  { %207 = vst.msk [vmem:[#allocation2 + $0xa8] sm:$0xff] %vm13_vm0, %v204_v46  ;;  %243 = vst.msk [vmem:[#allocation2 + $0xe8] sm:$0xff] %vm13_vm0, %v240_v5  ;;  %1552 = vrot.lane.b32.xlu0 %v976_v62, %s3823_s26  ;;  %v758_v54 = vcombine.low %v4645_v42, %v4647_v41  ;;  %v4664_v15 = vrot.slane %v1351_v34, %v4371_v50  ;;  %v4667_v55 = vrot.slane %v1471_v39, %v4371_v50 }
 0x1a7   :  { %v4670_v22 = vrot.slane %v1255_v57, %v4301_v2  ;;  %v750_v23 = vrot.slane %v742_v30, %v4301_v2  ;;  %v774_v43 = vcombine.low %v718_v17, %v4634_v63  ;;  %v4677_v18 = vrot.slane %v1303_v1, %v4301_v2 }
 0x1a8   :  { %v225_v35 = vpop.permute.xlu0 %224  ;;  %1568 = vrot.lane.b32.xlu1 %v977_v48, %s3824_s27  ;;  %v158_v62 = vpop.permute.xlu1 %157  ;;  %v766_v16 = vrot.slane %v758_v54, %v4301_v2  ;;  %v4684_v39 = vrot.slane %v1319_v8, %v4371_v50  ;;  %v4687_v48 = vrot.slane %v1271_v12, %v4301_v2  ;;  %v4693_v57 = vrot.slane %v711_v28, %v4301_v2 }
 0x1a9   :  { %v229_v51 = vsel %vm40_vm8, %v225_v35, 0.0  ;;  %v163_v34 = vsel %vm40_vm8, %v158_v62, 0.0  ;;  %v4696_v6 = vrot.slane %v743_v32, %v4301_v2  ;;  %v4699_v1 = vrot.slane %v1287_v47, %v4301_v2 }
 0x1aa   :  { %232 = vst.msk [vmem:[#allocation2 + $0xd8] sm:$0xff] %vm13_vm0, %v229_v51  ;;  %166 = vst.msk [vmem:[#allocation2 + $0x80] sm:$0xff] %vm13_vm0, %v163_v34  ;;  %1680 = vrot.lane.b32.xlu0 %v1521_v40, %s3824_s27  ;;  %v806_v30 = vcombine.low %v750_v23, %v766_v16  ;;  %v1385_v12 = vcombine.high %v4684_v39, %v4664_v15  ;;  %v775_v46 = vcombine.high %v718_v17, %v4634_v63  ;;  %v397_v5 = vld [vmem:[#allocation2 + $0xb8] sm:$0xff] }
 0x1ab   :  { %v727_v8 = vcombine.high %v3975_v21, %v4611_v38  ;;  %v759_v40 = vcombine.high %v4645_v42, %v4647_v41  ;;  %v4710_v47 = vrot.slane %v774_v43, %v4371_v50  ;;  %v807_v35 = vcombine.high %v750_v23, %v766_v16  ;;  %v391_v41 = vld [vmem:[#allocation2 + $0x88] sm:$0xff]  ;;  %v393_v17 = vld [vmem:[#allocation2 + $0x98] sm:$0xff] }
 0x1ac   :  { %v265_v54 = vpop.permute.xlu0 %264  ;;  %1696 = vrot.lane.b32.xlu1 %v1522_v56, %s3825_s28  ;;  %v198_v28 = vpop.permute.xlu1 %197  ;;  %v4713_v32 = vrot.slane %v806_v30, %v4371_v50  ;;  %v1367_v63 = vcombine.high %v4699_v1, %v4677_v18  ;;  %v1384_v42 = vcombine.low %v4684_v39, %v4664_v15  ;;  %v1335_v62 = vcombine.high %v4670_v22, %v4687_v48 }
 0x1ad   :  { %6616 = vst [vmem:[#allocation23_spill] sm:$0xff] %v4710_v47  ;;  %v269_v21 = vsel %vm4238_vm4, %v265_v54, 0.0  ;;  %v203_v38 = vsel %vm4238_vm4, %v198_v28, 0.0  ;;  %v395_v56 = vld [vmem:[#allocation2 + $0xa8] sm:$0xff]  ;;  %v1134_v51 = vcombine.low %v393_v17, %v397_v5  ;;  %v1135_v34 = vcombine.high %v393_v17, %v397_v5 }
 0x1ae   :  { %6617 = vst [vmem:[#allocation24_spill] sm:$0xff] %v4713_v32  ;;  %272 = vst.msk [vmem:[#allocation2 + $0xf8] sm:$0xff] %vm13_vm0, %v269_v21  ;;  %v839_v23 = vcombine.high %v4710_v47, %v4713_v32  ;;  %v403_v16 = vld [vmem:[#allocation2 + $0xe8] sm:$0xff]  ;;  %v1118_v43 = vcombine.low %v391_v41, %v395_v56  ;;  %v789_v30 = vrot.slane %v775_v46, %v4371_v50 }
 0x1af   :  { %206 = vst.msk [vmem:[#allocation2 + $0xa0] sm:$0xff] %vm13_vm0, %v203_v38  ;;  %v4731_v15 = vrot.slane %v727_v8, %v4301_v2  ;;  %v4734_v39 = vrot.slane %v759_v40, %v4301_v2  ;;  %v1119_v54 = vcombine.high %v391_v41, %v395_v56  ;;  %v6618_v21 = vcombine.low %v4565_v11, %v4568_v9 }
 0x1b0   :  { %v169_v28 = vpop.permute.xlu0 %168  ;;  %1534 = vrot.lane.b32.xlu0 %v839_v23, %s3815_s15  ;;  %v223_v38 = vpop.permute.xlu1 %222  ;;  %v821_v5 = vrot.slane %v807_v35, %v4371_v50  ;;  %v4743_v46 = vrot.slane %v1367_v63, %v4371_v50  ;;  %v1126_v17 = vrot.slane %v1118_v43, %v4301_v2  ;;  %v1150_v56 = vcombine.low %v3993_v25, %v403_v16 }
 0x1b1   :  { %1584 = vrot.lane.b32.xlu1 %v6618_v21, %s3825_s28  ;;  %v174_v40 = vsel %vm44_vm9, %v169_v28, 0.0  ;;  %v228_v41 = vsel %vm40_vm8, %v223_v38, 0.0  ;;  %v1142_v35 = vrot.slane %v1134_v51, %v4301_v2  ;;  %v4757_v63 = vrot.slane %v1135_v34, %v4301_v2  ;;  %v401_v34 = vld [vmem:[#allocation2 + $0xd8] sm:$0xff] }
 0x1b2   :  { %6619 = vst [vmem:[#allocation25_spill] sm:$0xff] %v4743_v46  ;;  %177 = vst.msk [vmem:[#allocation2 + $0x90] sm:$0xff] %vm13_vm0, %v174_v40  ;;  %v1151_v23 = vcombine.high %v3993_v25, %v403_v16  ;;  %v4761_v28 = vrot.slane %v1335_v62, %v4371_v50  ;;  %v4764_v21 = vrot.slane %v1119_v54, %v4301_v2 }
 0x1b3   :  { %231 = vst.msk [vmem:[#allocation2 + $0xd0] sm:$0xff] %vm13_vm0, %v228_v41  ;;  %v791_v38 = vcombine.high %v4693_v57, %v4731_v15  ;;  %v823_v51 = vcombine.high %v4696_v6, %v4734_v39  ;;  %v841_v62 = vcombine.high %v789_v30, %v821_v5  ;;  %v840_v16 = vcombine.low %v789_v30, %v821_v5 }
 0x1b4   :  { %6620 = vst [vmem:[#allocation26_spill] sm:$0xff] %v4761_v28  ;;  %v209_v40 = vpop.permute.xlu0 %208  ;;  %1662 = vrot.lane.b32.xlu0 %v1384_v42, %s3823_s26  ;;  %v263_v25 = vpop.permute.xlu1 %262  ;;  %v1158_v27 = vrot.slane %v1150_v56, %v4301_v2  ;;  %v1183_v33 = vcombine.high %v1126_v17, %v1142_v35  ;;  %v1182_v5 = vcombine.low %v1126_v17, %v1142_v35 }
 0x1b5   :  { %1678 = vrot.lane.b32.xlu1 %v1385_v12, %s3824_s27  ;;  %v214_v41 = vsel %vm4247_vm7, %v209_v40, 0.0  ;;  %v268_v8 = vsel %vm4238_vm4, %v263_v25, 0.0  ;;  %v405_v43 = vld [vmem:[#allocation2 + $0xf8] sm:$0xff]  ;;  %v4781_v12 = vld [vmem:[#allocation2 + $0x80] sm:$0xff]  ;;  %v1165_v25 = vrot.slane %v1151_v23, %v4301_v2  ;;  %v4791_v32 = vrot.slane %v791_v38, %v4371_v50 }
 0x1b6   :  { %v4783_v42 = vld [vmem:[#allocation2 + $0xa0] sm:$0xff]  ;;  %217 = vst.msk [vmem:[#allocation2 + $0xb0] sm:$0xff] %vm13_vm0, %v214_v41  ;;  %271 = vst.msk [vmem:[#allocation2 + $0xf0] sm:$0xff] %vm13_vm0, %v268_v8  ;;  %v1166_v30 = vcombine.low %v401_v34, %v405_v43  ;;  %v1167_v54 = vcombine.high %v401_v34, %v405_v43  ;;  %v4794_v56 = vrot.slane %v823_v51, %v4371_v50 }
 0x1b7   :  { %v575_v40 = vcombine.high %v4781_v12, %v4783_v42  ;;  %6621 = vst [vmem:[#allocation27_spill] sm:$0xff] %v4791_v32  ;;  %v1199_v47 = vcombine.high %v4764_v21, %v4757_v63  ;;  %v1198_v23 = vcombine.low %v4764_v21, %v4757_v63  ;;  %v1524_v51 = vcombine.low %v4667_v55, %v4579_v53 }
 0x1b8   :  { %6622 = vst [vmem:[#allocation28_spill] sm:$0xff] %v4794_v56  ;;  %v234_v41 = vpop.permute.xlu0 %233  ;;  %1550 = vrot.lane.b32.xlu0 %v840_v16, %s3823_s26  ;;  %v144_v8 = vpop.permute.xlu1 %143  ;;  %v1174_v17 = vrot.slane %v1166_v30, %v4301_v2  ;;  %v1181_v35 = vrot.slane %v1167_v54, %v4301_v2  ;;  %v4817_v21 = vrot.slane %v1183_v33, %v4371_v50 }
 0x1b9   :  { %1566 = vrot.lane.b32.xlu1 %v841_v62, %s3824_s27  ;;  %v239_v43 = vsel %vm44_vm9, %v234_v41, 0.0  ;;  %v149_v38 = vsel %vm4247_vm7, %v144_v8, 0.0  ;;  %v790_v30 = vcombine.low %v4693_v57, %v4731_v15  ;;  %v822_v41 = vcombine.low %v4696_v6, %v4734_v39  ;;  %v392_v15 = vld [vmem:[#allocation2 + $0x90] sm:$0xff] }
 0x1ba   :  { %242 = vst.msk [vmem:[#allocation2 + $0xe0] sm:$0xff] %vm13_vm0, %v239_v43  ;;  %152 = vst.msk [vmem:[#allocation2 + $0x60] sm:$0xff] %vm13_vm0, %v149_v38  ;;  %v1215_v16 = vcombine.high %v1158_v27, %v1174_v17  ;;  %v1214_v34 = vcombine.low %v1158_v27, %v1174_v17  ;;  %v1230_v54 = vcombine.low %v1165_v25, %v1181_v35 }
 0x1bb   :  { %v1231_v8 = vcombine.high %v1165_v25, %v1181_v35  ;;  %v4827_v27 = vrot.slane %v1182_v5, %v4371_v50  ;;  %v4833_v33 = vrot.slane %v1198_v23, %v4371_v50  ;;  %v574_v35 = vcombine.low %v4781_v12, %v4783_v42 }
 0x1bc   :  { %v146_v62 = vpop.permute.xlu0 %145  ;;  %v2212_v43 = vpop.permute.xlu1 %2211  ;;  %v4824_v38 = vrot.slane %v1215_v16, %v4371_v50  ;;  %v4830_v17 = vrot.slane %v1214_v34, %v4371_v50  ;;  %v4842_v5 = vrot.slane %v1230_v54, %v4371_v50  ;;  %v4851_v34 = vrot.slane %v575_v40, %v4301_v2 }
 0x1bd   :  { %6623 = vst [vmem:[#allocation29_spill] sm:$0xff] %v4827_v27  ;;  %6625 = vst [vmem:[#allocation31_spill] sm:$0xff] %v4833_v33  ;;  %v150_v57 = vsel %vm4247_vm7, %v146_v62, 0.0  ;;  %v2217_v6 = vsel %vm44_vm9, %v2212_v43, 0.0  ;;  %v396_v39 = vld [vmem:[#allocation2 + $0xb0] sm:$0xff]  ;;  %v4856_v54 = vrot.slane %v1199_v47, %v4371_v50 }
 0x1be   :  { %6624 = vst [vmem:[#allocation30_spill] sm:$0xff] %v4830_v17  ;;  %v404_v25 = vld [vmem:[#allocation2 + $0xf0] sm:$0xff]  ;;  %6626 = vst [vmem:[#allocation32_spill] sm:$0xff] %v4842_v5  ;;  %v1248_v23 = vcombine.low %v4817_v21, %v4824_v38  ;;  %v1247_v62 = vcombine.high %v4827_v27, %v4830_v17  ;;  %v590_v16 = vcombine.low %v392_v15, %v396_v39 }
 0x1bf   :  { %153 = vst.msk [vmem:[#allocation2 + $0x68] sm:$0xff] %vm13_vm0, %v150_v57  ;;  %2219 = vst.msk [vmem:[#allocation2 + $0x180] sm:$0xff] %vm13_vm0, %v2217_v6  ;;  %v400_v43 = vld [vmem:[#allocation2 + $0xd0] sm:$0xff]  ;;  %v591_v42 = vcombine.high %v392_v15, %v396_v39  ;;  %v4859_v57 = vrot.slane %v1231_v8, %v4371_v50 }
 0x1c0   :  { %6627 = vst [vmem:[#allocation33_spill] sm:$0xff] %v4851_v34  ;;  %6628 = vst [vmem:[#allocation34_spill] sm:$0xff] %v4856_v54  ;;  %v2214_v6 = vpop.permute.xlu0 %2213  ;;  %1660 = vrot.lane.b32.xlu1 %v1248_v23, %s3823_s26  ;;  %1644 = vrot.lane.b32.xlu0 %v1247_v62, %s3815_s15  ;;  %v2144_v63 = vpop.permute.xlu1 %2143  ;;  %v4864_v40 = vrot.slane %v590_v16, %v4301_v2  ;;  %v622_v56 = vcombine.low %v400_v43, %v404_v25 }
 0x1c1   :  { %6629 = vst [vmem:[#allocation35_spill] sm:$0xff] %v4859_v57  ;;  %v623_v32 = vcombine.high %v400_v43, %v404_v25  ;;  %v2218_v15 = vsel %vm44_vm9, %v2214_v6, 0.0  ;;  %v2148_v47 = vsel %vm40_vm8, %v2144_v63, 0.0  ;;  %v402_v39 = vld [vmem:[#allocation2 + $0xe0] sm:$0xff]  ;;  %v4871_v8 = vrot.slane %v591_v42, %v4301_v2 }
 0x1c2   :  { %2220 = vst.msk [vmem:[#allocation2 + $0x188] sm:$0xff] %vm13_vm0, %v2218_v15  ;;  %2150 = vst.msk [vmem:[#allocation2 + $0x128] sm:$0xff] %vm13_vm0, %v2148_v47  ;;  %v1523_v25 = vcombine.high %v4624_v4, %v4576_v61  ;;  %v4880_v62 = vrot.slane %v822_v41, %v4371_v50  ;;  %v4883_v16 = vrot.slane %v574_v35, %v4301_v2 }
 0x1c3   :  { %6630 = vst [vmem:[#allocation36_spill] sm:$0xff] %v4871_v8  ;;  %v606_v63 = vcombine.low %v3995_v26, %v402_v39  ;;  %v4887_v43 = vrot.slane %v790_v30, %v4371_v50  ;;  %v607_v42 = vcombine.high %v3995_v26, %v402_v39  ;;  %v4900_v30 = vrot.slane %v622_v56, %v4301_v2 }
 0x1c4   :  { %v2132_v4 = vpop.permute.xlu0 %2131  ;;  %1728 = vrot.lane.b32.xlu1 %v1524_v51, %s3826_s29  ;;  %1712 = vrot.lane.b32.xlu0 %v1523_v25, %s3827_s30  ;;  %v2182_v41 = vpop.permute.xlu1 %2181  ;;  %v638_v26 = vcombine.low %v4883_v16, %v4864_v40  ;;  %v4908_v51 = vld [vmem:[#allocation2 + $0x48] sm:$0xff]  ;;  %v4918_v56 = vrot.slane %v623_v32, %v4301_v2  ;;  %v6634_v32 = vcombine.low %v4558_v29, %v3973_v20 }
 0x1c5   :  { %v4897_v35 = vrot.slane %v606_v63, %v4301_v2  ;;  %v2136_v47 = vsel %vm4247_vm7, %v2132_v4, 0.0  ;;  %v2186_v39 = vsel %vm4238_vm4, %v2182_v41, 0.0  ;;  %6631 = vst [vmem:[#allocation37_spill] sm:$0xff] %v4908_v51  ;;  %v4915_v63 = vrot.slane %v607_v42, %v4301_v2 }
 0x1c6   :  { %v4910_v15 = vld [vmem:[#allocation2 + $0x68] sm:$0xff]  ;;  %v4912_v25 = vld [vmem:[#allocation2 + $0x180] sm:$0xff]  ;;  %2138 = vst.msk [vmem:[#allocation2 + $0x108] sm:$0xff] %vm13_vm0, %v2136_v47  ;;  %2188 = vst.msk [vmem:[#allocation2 + $0x148] sm:$0xff] %vm13_vm0, %v2186_v39  ;;  %v842_v4 = vcombine.low %v4887_v43, %v4880_v62  ;;  %v4934_v12 = vrot.slane %v6634_v32, %v4301_v2  ;;  %v1046_v47 = vcombine.low %v4586_v44, %v4589_v52 }
 0x1c7   :  { %6632 = vst [vmem:[#allocation38_spill] sm:$0xff] %v4910_v15  ;;  %6633 = vst [vmem:[#allocation39_spill] sm:$0xff] %v4915_v63  ;;  %v670_v41 = vcombine.low %v4897_v35, %v4900_v30  ;;  %v1014_v23 = vcombine.low %v4908_v51, %v4910_v15  ;;  %v2693_v42 = vcombine.low %v4912_v25, %v4389_v14 }
 0x1c8   :  { %v2154_v6 = vpop.permute.xlu0 %2153  ;;  %1582 = vrot.lane.b32.xlu1 %v842_v4, %s3825_s28  ;;  %v2204_v17 = vpop.permute.xlu1 %2203  ;;  %v4942_v27 = vrot.slane %v638_v26, %v4371_v50 }
 0x1c9   :  { %v4945_v14 = vrot.slane %v670_v41, %v4371_v50  ;;  %v4948_v29 = vrot.slane %v1014_v23, %v4301_v2  ;;  %v4951_v32 = vrot.slane %v2693_v42, %v4301_v2  ;;  %v2158_v20 = vsel %vm44_vm9, %v2154_v6, 0.0  ;;  %v2270_v4 = vld [vmem:[#allocation2 + $0x188] sm:$0xff] }
 0x1ca   :  { %6635 = vst [vmem:[#allocation40_spill] sm:$0xff] %v4942_v27  ;;  %v2208_v39 = vsel %vm40_vm8, %v2204_v17, 0.0  ;;  %2160 = vst.msk [vmem:[#allocation2 + $0x138] sm:$0xff] %vm13_vm0, %v2158_v20  ;;  %v1366_v41 = vcombine.low %v4699_v1, %v4677_v18  ;;  %v959_v6 = vcombine.high %v4449_v49, %v4452_v7  ;;  %v4968_v42 = vrot.slane %v1046_v47, %v4371_v50 }
 0x1cb   :  { %6636 = vst [vmem:[#allocation41_spill] sm:$0xff] %v4945_v14  ;;  %2210 = vst.msk [vmem:[#allocation2 + $0x178] sm:$0xff] %vm13_vm0, %v2208_v39  ;;  %v703_v26 = vcombine.high %v4942_v27, %v4945_v14  ;;  %v1078_v23 = vcombine.low %v4948_v29, %v4934_v12  ;;  %v979_v20 = vcombine.high %v4565_v11, %v4568_v9 }
 0x1cc   :  { %6637 = vst [vmem:[#allocation42_spill] sm:$0xff] %v4968_v42  ;;  %v3237_v17 = vcombine.low %v2270_v4, %v4378_v0  ;;  %v2758_v39 = vcombine.high %v4951_v32, %v4381_v3  ;;  %v2192_v54 = vpop.permute.xlu0 %2191  ;;  %v2142_v57 = vpop.permute.xlu1 %2141  ;;  %v1334_v49 = vcombine.low %v4670_v22, %v4687_v48  ;;  %v3238_v7 = vcombine.high %v2270_v4, %v4378_v0 }
 0x1cd   :  { %1532 = vrot.lane.b32.xlu0 %v703_v26, %s3815_s15  ;;  %v4977_v18 = vrot.slane %v1078_v23, %v4371_v50  ;;  %v2196_v1 = vsel %vm4247_vm7, %v2192_v54, 0.0  ;;  %v2147_v47 = vsel %vm40_vm8, %v2142_v57, 0.0  ;;  %v1374_v22 = vrot.slane %v1366_v41, %v4371_v50 }
 0x1ce   :  { %v4989_v26 = vrot.slane %v3237_v17, %v4301_v2  ;;  %v4992_v23 = vrot.slane %v2758_v39, %v4371_v50  ;;  %2198 = vst.msk [vmem:[#allocation2 + $0x158] sm:$0xff] %vm13_vm0, %v2196_v1  ;;  %2149 = vst.msk [vmem:[#allocation2 + $0x120] sm:$0xff] %vm13_vm0, %v2147_v47  ;;  %v671_v48 = vcombine.high %v4897_v35, %v4900_v30 }
 0x1cf   :  { %6638 = vst [vmem:[#allocation43_spill] sm:$0xff] %v4977_v18  ;;  %v1111_v0 = vcombine.high %v4968_v42, %v4977_v18  ;;  %v5002_v54 = vrot.slane %v3238_v7, %v4301_v2  ;;  %v1342_v30 = vrot.slane %v1334_v49, %v4371_v50  ;;  %v639_v41 = vcombine.high %v4883_v16, %v4864_v40 }
 0x1d0   :  { %v3301_v57 = vcombine.low %v4989_v26, %v4412_v60  ;;  %v3302_v4 = vcombine.high %v4989_v26, %v4412_v60  ;;  %v2130_v1 = vpop.permute.xlu0 %2129  ;;  %v2180_v35 = vpop.permute.xlu1 %2179  ;;  %v685_v49 = vrot.slane %v671_v48, %v4371_v50 }
 0x1d1   :  { %1642 = vrot.lane.b32.xlu1 %v1111_v0, %s3815_s15  ;;  %1600 = vrot.lane.b32.xlu0 %v979_v20, %s3827_s30  ;;  %v3317_v7 = vcombine.low %v5002_v54, %v4424_v45  ;;  %v2135_v47 = vsel %vm4247_vm7, %v2130_v1, 0.0  ;;  %v2185_v39 = vsel %vm4238_vm4, %v2180_v35, 0.0  ;;  %v927_v0 = vcombine.high %v4478_v59, %v4418_v36  ;;  %v5036_v35 = vld [vmem:[#allocation2 + $0x60] sm:$0xff] }
 0x1d2   :  { %v5026_v20 = vrot.slane %v3302_v4, %v4371_v50  ;;  %2137 = vst.msk [vmem:[#allocation2 + $0x100] sm:$0xff] %vm13_vm0, %v2135_v47  ;;  %2187 = vst.msk [vmem:[#allocation2 + $0x140] sm:$0xff] %vm13_vm0, %v2185_v39  ;;  %v1387_v40 = vcombine.high %v1342_v30, %v1374_v22  ;;  %v1386_v16 = vcombine.low %v1342_v30, %v1374_v22  ;;  %v5052_v47 = vld [vmem:[#allocation2 + $0x40] sm:$0xff] }
 0x1d3   :  { %v5032_v17 = vrot.slane %v3317_v7, %v4371_v50  ;;  %6639 = vst [vmem:[#allocation44_spill] sm:$0xff] %v5036_v35  ;;  %v653_v22 = vrot.slane %v639_v41, %v4371_v50  ;;  %v5050_v7 = vrot.slane %v959_v6, %v4371_v50  ;;  %6641 = vst [vmem:[#allocation46_spill] sm:$0xff] %v5052_v47 }
 0x1d4   :  { %v2152_v59 = vpop.permute.xlu0 %2151  ;;  %v2202_v4 = vpop.permute.xlu1 %2201 }
 0x1d5   :  { %1710 = vrot.lane.b32.xlu1 %v1387_v40, %s3827_s30  ;;  %1694 = vrot.lane.b32.xlu0 %v1386_v16, %s3825_s28  ;;  %v2157_v39 = vsel %vm44_vm9, %v2152_v59, 0.0  ;;  %v2207_v30 = vsel %vm40_vm8, %v2202_v4, 0.0  ;;  %6640 = vst [vmem:[#allocation45_spill] sm:$0xff] %v5050_v7  ;;  %v5054_v40 = vld [vmem:[#allocation2 + $0x50] sm:$0xff]  ;;  %v705_v41 = vcombine.high %v653_v22, %v685_v49  ;;  %v704_v48 = vcombine.low %v653_v22, %v685_v49 }
 0x1d6   :  { %6642 = vst [vmem:[#allocation47_spill] sm:$0xff] %v5054_v40  ;;  %2159 = vst.msk [vmem:[#allocation2 + $0x130] sm:$0xff] %vm13_vm0, %v2157_v39  ;;  %v941_v59 = vrot.slane %v927_v0, %v4371_v50  ;;  %v470_v4 = vcombine.low %v5052_v47, %v5036_v35  ;;  %v486_v16 = vcombine.low %v5054_v40, %v3991_v24  ;;  %v5166_v47 = vld [vmem:[#allocation2 + $0x108] sm:$0xff] }
 0x1d7   :  { %2209 = vst.msk [vmem:[#allocation2 + $0x170] sm:$0xff] %vm13_vm0, %v2207_v30  ;;  %v6651_v40 = vcombine.low %v5026_v20, %v4458_v10  ;;  %v5168_v35 = vld [vmem:[#allocation2 + $0x128] sm:$0xff] }
 0x1d8   :  { %v2190_v6 = vpop.permute.xlu0 %2189  ;;  %v2034_v36 = vpop.permute.xlu1 %2033  ;;  %v981_v0 = vcombine.high %v941_v59, %v5050_v7  ;;  %v980_v22 = vcombine.low %v941_v59, %v5050_v7  ;;  %v1250_v59 = vcombine.low %v4833_v33, %v4842_v5  ;;  %v843_v5 = vcombine.high %v4887_v43, %v4880_v62  ;;  %v5186_v7 = vld [vmem:[#allocation2 + $0x160] sm:$0xff] }
 0x1d9   :  { %1564 = vrot.lane.b32.xlu1 %v705_v41, %s3824_s27  ;;  %1548 = vrot.lane.b32.xlu0 %v704_v48, %s3823_s26  ;;  %v2195_v39 = vsel %vm4247_vm7, %v2190_v6, 0.0  ;;  %v2038_v49 = vsel %vm44_vm9, %v2034_v36, 0.0  ;;  %v5076_v48 = vrot.slane %v470_v4, %v4301_v2  ;;  %v5081_v36 = vrot.slane %v486_v16, %v4301_v2  ;;  %v5184_v33 = vld [vmem:[#allocation2 + $0x140] sm:$0xff]  ;;  %6657 = vst [vmem:[#allocation55_spill] sm:$0xff] %v5186_v7 }
 0x1da   :  { %2197 = vst.msk [vmem:[#allocation2 + $0x150] sm:$0xff] %vm13_vm0, %v2195_v39  ;;  %2040 = vst.msk [vmem:[#allocation2 + $0x98] sm:$0xff] %vm13_vm0, %v2038_v49  ;;  %v1249_v4 = vcombine.high %v4817_v21, %v4824_v38  ;;  %v5097_v16 = vrot.slane %v3301_v57, %v4371_v50  ;;  %v6646_v38 = vld [vmem:[#allocation13_spill] sm:$0xff]  ;;  %v1525_v57 = vcombine.high %v4667_v55, %v4579_v53 }
 0x1db   :  { %v534_v49 = vcombine.low %v5076_v48, %v5081_v36  ;;  %v1047_v55 = vcombine.high %v4586_v44, %v4589_v52  ;;  %v1079_v44 = vcombine.high %v4948_v29, %v4934_v12  ;;  %v5143_v52 = vld [vmem:[#allocation2 + $0x118] sm:$0xff]  ;;  %6656 = vst [vmem:[#allocation54_spill] sm:$0xff] %v5184_v33 }
 0x1dc   :  { %v2024_v30 = vpop.permute.xlu0 %2023  ;;  %v2072_v41 = vpop.permute.xlu1 %2071  ;;  %6643 = vst [vmem:[#allocation48_spill] sm:$0xff] %v5097_v16  ;;  %v3366_v26 = vcombine.high %v5097_v16, %v6646_v38  ;;  %v5131_v16 = vld [vmem:[#allocation2 + $0x148] sm:$0xff] }
 0x1dd   :  { %1632 = vrot.lane.b32.xlu1 %v981_v0, %s3828_s3  ;;  %1616 = vrot.lane.b32.xlu0 %v980_v22, %s3826_s29  ;;  %v2028_v6 = vsel %vm40_vm8, %v2024_v30, 0.0  ;;  %v2076_v39 = vsel %vm4247_vm7, %v2072_v41, 0.0  ;;  %v6644_v30 = vld [vmem:[#allocation11_spill] sm:$0xff]  ;;  %v6645_v41 = vld [vmem:[#allocation10_spill] sm:$0xff]  ;;  %v5162_v12 = vrot.slane %v1047_v55, %v4371_v50  ;;  %v5164_v24 = vld [vmem:[#allocation2 + $0x130] sm:$0xff] }
 0x1de   :  { %2030 = vst.msk [vmem:[#allocation2 + $0x88] sm:$0xff] %vm13_vm0, %v2028_v6  ;;  %2078 = vst.msk [vmem:[#allocation2 + $0xb8] sm:$0xff] %vm13_vm0, %v2076_v39  ;;  %v502_v6 = vcombine.low %v6645_v41, %v6644_v30  ;;  %v5116_v39 = vrot.slane %v534_v49, %v4371_v50  ;;  %v6654_v38 = vcombine.high %v6645_v41, %v6644_v30  ;;  %v5188_v53 = vld [vmem:[#allocation2 + $0x170] sm:$0xff] }
 0x1df   :  { %6652 = vst [vmem:[#allocation51_spill] sm:$0xff] %v5162_v12  ;;  %6653 = vst [vmem:[#allocation52_spill] sm:$0xff] %v5164_v24  ;;  %v5195_v41 = vrot.slane %v1079_v44, %v4371_v50 }
 0x1e0   :  { %v2062_v0 = vpop.permute.xlu0 %2061  ;;  %v2094_v22 = vpop.permute.xlu1 %2093  ;;  %6647 = vst [vmem:[#allocation11_spill] sm:$0xff] %v5116_v39  ;;  %6658 = vst [vmem:[#allocation56_spill] sm:$0xff] %v5188_v53 }
 0x1e1   :  { %1692 = vrot.lane.b32.xlu1 %v1250_v59, %s3825_s28  ;;  %1676 = vrot.lane.b32.xlu0 %v1249_v4, %s3824_s27  ;;  %v2066_v21 = vsel %vm4238_vm4, %v2062_v0, 0.0  ;;  %v2098_v60 = vsel %vm44_vm9, %v2094_v22, 0.0  ;;  %v5118_v59 = vld [vmem:[#allocation2 + $0x158] sm:$0xff]  ;;  %v3812_v4 = vld [vmem:[#allocation2 + $0x190] sm:$0xff]  ;;  %6659 = vst [vmem:[#allocation57_spill] sm:$0xff] %v5195_v41 }
 0x1e2   :  { %2068 = vst.msk [vmem:[#allocation2 + $0xa8] sm:$0xff] %vm13_vm0, %v2066_v21  ;;  %2100 = vst.msk [vmem:[#allocation2 + $0xe8] sm:$0xff] %vm13_vm0, %v2098_v60  ;;  %v3813_v0 = vld [vmem:[#allocation2 + $0x1b0] sm:$0xff]  ;;  %v5123_v21 = vrot.slane %v502_v6, %v4371_v50 }
 0x1e3   :  { %v2710_v11 = vcombine.high %v3812_v4, %v3813_v0  ;;  %v5133_v4 = vld [vmem:[#allocation2 + $0x168] sm:$0xff]  ;;  %v5149_v0 = vld [vmem:[#allocation2 + $0x110] sm:$0xff] }
 0x1e4   :  { %v2084_v1 = vpop.permute.xlu0 %2083  ;;  %v2022_v22 = vpop.permute.xlu1 %2021  ;;  %6648 = vst [vmem:[#allocation10_spill] sm:$0xff] %v5123_v21  ;;  %v567_v6 = vcombine.high %v5123_v21, %v5116_v39  ;;  %6649 = vst [vmem:[#allocation49_spill] sm:$0xff] %v5149_v0  ;;  %v1388_v21 = vcombine.low %v4761_v28, %v4743_v46  ;;  %v3101_v39 = vcombine.low %v5166_v47, %v5168_v35  ;;  %v5222_v46 = vld [vmem:[#allocation2 + $0x120] sm:$0xff] }
 0x1e5   :  { %3495 = vrot.lane.b32.xlu1 %v3366_v26, %s3815_s15  ;;  %1744 = vrot.lane.b32.xlu0 %v1525_v57, %s3828_s3  ;;  %v2088_v49 = vsel %vm40_vm8, %v2084_v1, 0.0  ;;  %v2027_v60 = vsel %vm40_vm8, %v2022_v22, 0.0  ;;  %v5135_v26 = vld [vmem:[#allocation2 + $0x178] sm:$0xff]  ;;  %v5151_v22 = vld [vmem:[#allocation2 + $0x150] sm:$0xff]  ;;  %6664 = vst [vmem:[#allocation60_spill] sm:$0xff] %v5222_v46 }
 0x1e6   :  { %2090 = vst.msk [vmem:[#allocation2 + $0xd8] sm:$0xff] %vm13_vm0, %v2088_v49  ;;  %2029 = vst.msk [vmem:[#allocation2 + $0x80] sm:$0xff] %vm13_vm0, %v2027_v60  ;;  %v5145_v1 = vld [vmem:[#allocation2 + $0x138] sm:$0xff]  ;;  %v3149_v57 = vcombine.low %v5118_v59, %v5135_v26  ;;  %v5154_v49 = vrot.slane %v2710_v11, %v4301_v2  ;;  %v3133_v11 = vcombine.low %v5131_v16, %v5133_v4 }
 0x1e7   :  { %6650 = vst [vmem:[#allocation50_spill] sm:$0xff] %v5151_v22  ;;  %v3117_v30 = vcombine.low %v5143_v52, %v5145_v1  ;;  %v2605_v62 = vcombine.low %v5151_v22, %v5188_v53 }
 0x1e8   :  { %v2122_v60 = vpop.permute.xlu0 %2121  ;;  %v2060_v29 = vpop.permute.xlu1 %2059  ;;  %v5202_v43 = vrot.slane %v3149_v57, %v4301_v2 }
 0x1e9   :  { %3511 = vrot.lane.b32.xlu1 %v6651_v40, %s3823_s26  ;;  %1530 = vrot.lane.b32.xlu0 %v567_v6, %s3815_s15  ;;  %v5176_v40 = vrot.slane %v6654_v38, %v4371_v50  ;;  %v2126_v6 = vsel %vm4238_vm4, %v2122_v60, 0.0  ;;  %v2065_v55 = vsel %vm4238_vm4, %v2060_v29, 0.0  ;;  %v5197_v38 = vld [vmem:[#allocation2 + $0x100] sm:$0xff]  ;;  %v5248_v53 = vld [vmem:[#allocation2 + $0xe8] sm:$0xff] }
 0x1ea   :  { %2128 = vst.msk [vmem:[#allocation2 + $0xf8] sm:$0xff] %vm13_vm0, %v2126_v6  ;;  %2067 = vst.msk [vmem:[#allocation2 + $0xa0] sm:$0xff] %vm13_vm0, %v2065_v55  ;;  %v3814_v60 = vld [vmem:[#allocation2 + $0x1a0] sm:$0xff]  ;;  %v6661_v6 = vcombine.low %v4951_v32, %v4381_v3  ;;  %v2573_v55 = vcombine.low %v5149_v0, %v5164_v24  ;;  %v2589_v3 = vcombine.low %v5184_v33, %v5186_v7  ;;  %v5246_v7 = vld [vmem:[#allocation2 + $0xc8] sm:$0xff] }
 0x1eb   :  { %6655 = vst [vmem:[#allocation53_spill] sm:$0xff] %v5176_v40  ;;  %6660 = vst [vmem:[#allocation58_spill] sm:$0xff] %v5197_v38  ;;  %v2694_v29 = vcombine.high %v4912_v25, %v3814_v60  ;;  %v6663_v25 = vcombine.low %v4992_v23, %v4462_v58  ;;  %v5227_v32 = vrot.slane %v3133_v11, %v4301_v2  ;;  %v5244_v11 = vld [vmem:[#allocation2 + $0xa8] sm:$0xff] }
 0x1ec   :  { %v5211_v44 = vrot.slane %v6661_v6, %v4371_v50  ;;  %v2032_v57 = vpop.permute.xlu0 %2031  ;;  %v2082_v60 = vpop.permute.xlu1 %2081  ;;  %v6665_v6 = vcombine.low %v4851_v34, %v4871_v8  ;;  %v2557_v22 = vcombine.low %v5197_v38, %v5222_v46  ;;  %v5242_v33 = vrot.slane %v3117_v30, %v4301_v2  ;;  %6667 = vst [vmem:[#allocation62_spill] sm:$0xff] %v5244_v11  ;;  %v6670_v34 = vld [vmem:[#allocation12_spill] sm:$0xff]  ;;  %v5272_v46 = vld [vmem:[#allocation2 + $0xb8] sm:$0xff] }
 0x1ed   :  { %3399 = vrot.lane.b32.xlu1 %v6663_v25, %s3823_s26  ;;  %1598 = vrot.lane.b32.xlu0 %v843_v5, %s3827_s30  ;;  %v2037_v25 = vsel %vm44_vm9, %v2032_v57, 0.0  ;;  %v2087_v5 = vsel %vm40_vm8, %v2082_v60, 0.0  ;;  %6668 = vst [vmem:[#allocation63_spill] sm:$0xff] %v5246_v7  ;;  %6669 = vst [vmem:[#allocation64_spill] sm:$0xff] %v5248_v53  ;;  %v1112_v57 = vcombine.low %v5162_v12, %v5195_v41  ;;  %v5451_v27 = vld [vmem:[#allocation2 + $0x80] sm:$0xff] }
 0x1ee   :  { %6662 = vst [vmem:[#allocation59_spill] sm:$0xff] %v5211_v44  ;;  %v5233_v28 = vrot.slane %v6665_v6, %v4371_v50  ;;  %2039 = vst.msk [vmem:[#allocation2 + $0x90] sm:$0xff] %vm13_vm0, %v2037_v25  ;;  %v5255_v60 = vrot.slane %v2605_v62, %v4301_v2  ;;  %v3197_v30 = vcombine.low %v5227_v32, %v5202_v43 }
 0x1ef   :  { %2089 = vst.msk [vmem:[#allocation2 + $0xd0] sm:$0xff] %vm13_vm0, %v2087_v5  ;;  %v5260_v6 = vrot.slane %v2694_v29, %v4301_v2  ;;  %v2822_v8 = vcombine.high %v5211_v44, %v6670_v34  ;;  %v5265_v38 = vrot.slane %v2573_v55, %v4301_v2  ;;  %v5268_v25 = vrot.slane %v3101_v39, %v4301_v2  ;;  %v5270_v5 = vld [vmem:[#allocation2 + $0x88] sm:$0xff] }
 0x1f0   :  { %6666 = vst [vmem:[#allocation61_spill] sm:$0xff] %v5233_v28  ;;  %6671 = vst [vmem:[#allocation65_spill] sm:$0xff] %v5270_v5  ;;  %v6673_v62 = vcombine.low %v4915_v63, %v4918_v56  ;;  %v2070_v29 = vpop.permute.xlu0 %2069  ;;  %v6675_v44 = vcombine.high %v5026_v20, %v4458_v10  ;;  %v2120_v55 = vpop.permute.xlu1 %2119  ;;  %v2597_v39 = vrot.slane %v2589_v3, %v4301_v2  ;;  %v5299_v3 = vld [vmem:[#allocation2 + $0xd8] sm:$0xff] }
 0x1f1   :  { %6672 = vst [vmem:[#allocation66_spill] sm:$0xff] %v5272_v46  ;;  %1658 = vrot.lane.b32.xlu0 %v1112_v57, %s3823_s26  ;;  %v2965_v34 = vcombine.low %v5270_v5, %v5244_v11  ;;  %v2997_v24 = vcombine.low %v5246_v7, %v5248_v53  ;;  %v2125_v63 = vsel %vm4238_vm4, %v2120_v55, 0.0  ;;  %v2565_v10 = vrot.slane %v2557_v22, %v4301_v2  ;;  %v5301_v57 = vld [vmem:[#allocation2 + $0xf8] sm:$0xff] }
 0x1f2   :  { %v5278_v0 = vrot.slane %v6673_v62, %v4371_v50  ;;  %3527 = vrot.lane.b32.xlu1 %v6675_v44, %s3824_s27  ;;  %v2075_v62 = vsel %vm4247_vm7, %v2070_v29, 0.0  ;;  %v3165_v20 = vcombine.low %v5268_v25, %v5242_v33  ;;  %v5297_v44 = vld [vmem:[#allocation2 + $0x98] sm:$0xff]  ;;  %2127 = vst.msk [vmem:[#allocation2 + $0xf0] sm:$0xff] %vm13_vm0, %v2125_v63  ;;  %v2654_v29 = vcombine.high %v2597_v39, %v5255_v60 }
 0x1f3   :  { %6676 = vst [vmem:[#allocation68_spill] sm:$0xff] %v5297_v44  ;;  %2077 = vst.msk [vmem:[#allocation2 + $0xb0] sm:$0xff] %vm13_vm0, %v2075_v62  ;;  %v5307_v7 = vrot.slane %v3197_v30, %v4371_v50  ;;  %v2981_v22 = vcombine.low %v5297_v44, %v5272_v46  ;;  %v3013_v55 = vcombine.low %v5299_v3, %v5301_v57 }
 0x1f4   :  { %6674 = vst [vmem:[#allocation67_spill] sm:$0xff] %v5278_v0  ;;  %v2622_v53 = vcombine.high %v2565_v10, %v5265_v38  ;;  %v535_v62 = vcombine.high %v5076_v48, %v5081_v36  ;;  %v2092_v11 = vpop.permute.xlu0 %2091  ;;  %v6678_v30 = vcombine.high %v4992_v23, %v4462_v58  ;;  %v1952_v44 = vpop.permute.xlu1 %1951  ;;  %v5326_v46 = vrot.slane %v2965_v34, %v4301_v2 }
 0x1f5   :  { %6677 = vst [vmem:[#allocation69_spill] sm:$0xff] %v5307_v7  ;;  %1726 = vrot.lane.b32.xlu0 %v1388_v21, %s3826_s29  ;;  %v5329_v5 = vrot.slane %v2997_v24, %v4301_v2  ;;  %v5332_v48 = vrot.slane %v3013_v55, %v4301_v2  ;;  %v2097_v36 = vsel %vm44_vm9, %v2092_v11, 0.0  ;;  %v1956_v63 = vsel %vm4247_vm7, %v1952_v44, 0.0 }
 0x1f6   :  { %3415 = vrot.lane.b32.xlu1 %v6678_v30, %s3824_s27  ;;  %v2653_v58 = vcombine.low %v2597_v39, %v5255_v60  ;;  %v5340_v23 = vrot.slane %v535_v62, %v4371_v50  ;;  %2099 = vst.msk [vmem:[#allocation2 + $0xe0] sm:$0xff] %vm13_vm0, %v2097_v36  ;;  %1958 = vst.msk [vmem:[#allocation2 + $0x18] sm:$0xff] %vm13_vm0, %v1956_v63  ;;  %v5345_v24 = vrot.slane %v2654_v29, %v4371_v50 }
 0x1f7   :  { %v5348_v34 = vrot.slane %v2981_v22, %v4301_v2  ;;  %v3061_v21 = vcombine.low %v5329_v5, %v5332_v48  ;;  %v5355_v60 = vrot.slane %v3165_v20, %v4371_v50  ;;  %v2773_v39 = vcombine.low %v5260_v6, %v5154_v49 }
 0x1f8   :  { %6679 = vst [vmem:[#allocation70_spill] sm:$0xff] %v5340_v23  ;;  %v1942_v22 = vpop.permute.xlu0 %1941  ;;  %v6681_v55 = vcombine.low %v5032_v17, %v4576_v61  ;;  %v1974_v62 = vpop.permute.xlu1 %1973  ;;  %v5369_v20 = vrot.slane %v2622_v53, %v4371_v50  ;;  %v2621_v30 = vcombine.low %v2565_v10, %v5265_v38  ;;  %v5390_v10 = vrot.slane %v2653_v58, %v4371_v50 }
 0x1f9   :  { %6680 = vst [vmem:[#allocation71_spill] sm:$0xff] %v5355_v60  ;;  %3383 = vrot.lane.b32.xlu0 %v2822_v8, %s3815_s15  ;;  %v3029_v63 = vcombine.low %v5326_v46, %v5348_v34  ;;  %v1946_v36 = vsel %vm4238_vm4, %v1942_v22, 0.0  ;;  %v1978_v29 = vsel %vm44_vm9, %v1974_v62, 0.0  ;;  %v3230_v8 = vcombine.high %v5355_v60, %v5307_v7 }
 0x1fa   :  { %3543 = vrot.lane.b32.xlu1 %v6681_v55, %s3825_s28  ;;  %v3198_v55 = vcombine.high %v5227_v32, %v5202_v43  ;;  %1948 = vst.msk [vmem:[#allocation2 + $0x8] sm:$0xff] %vm13_vm0, %v1946_v36  ;;  %1980 = vst.msk [vmem:[#allocation2 + $0x48] sm:$0xff] %vm13_vm0, %v1978_v29  ;;  %v2687_v53 = vcombine.low %v5369_v20, %v5345_v24  ;;  %v5387_v38 = vrot.slane %v3061_v21, %v4371_v50  ;;  %v5395_v43 = vld [vmem:[#allocation2 + $0xc0] sm:$0xff]  ;;  %v5411_v11 = vld [vmem:[#allocation2 + $0xb0] sm:$0xff] }
 0x1fb   :  { %v5393_v22 = vrot.slane %v2773_v39, %v4371_v50  ;;  %v5400_v62 = vrot.slane %v3029_v63, %v4371_v50  ;;  %v5403_v21 = vrot.slane %v2621_v30, %v4371_v50  ;;  %v3166_v58 = vcombine.high %v5268_v25, %v5242_v33 }
 0x1fc   :  { %v1964_v32 = vpop.permute.xlu0 %1963  ;;  %v2012_v29 = vpop.permute.xlu1 %2011  ;;  %v5424_v25 = vrot.slane %v3198_v55, %v4371_v50 }
 0x1fd   :  { %3493 = vrot.lane.b32.xlu0 %v3230_v8, %s3815_s15  ;;  %v1968_v39 = vsel %vm40_vm8, %v1964_v32, 0.0  ;;  %v2016_v36 = vsel %vm4247_vm7, %v2012_v29, 0.0  ;;  %v5415_v8 = vld [vmem:[#allocation2 + $0xf0] sm:$0xff]  ;;  %v3094_v63 = vcombine.high %v5400_v62, %v5387_v38  ;;  %v2686_v33 = vcombine.high %v5403_v21, %v5390_v10 }
 0x1fe   :  { %3397 = vrot.lane.b32.xlu1 %v2687_v53, %s3823_s26  ;;  %v5413_v53 = vld [vmem:[#allocation2 + $0xe0] sm:$0xff]  ;;  %1970 = vst.msk [vmem:[#allocation2 + $0x38] sm:$0xff] %vm13_vm0, %v1968_v39  ;;  %2018 = vst.msk [vmem:[#allocation2 + $0x68] sm:$0xff] %vm13_vm0, %v2016_v36  ;;  %v2825_v32 = vcombine.low %v5393_v22, %v4568_v9  ;;  %v5430_v29 = vld [vmem:[#allocation2 + $0x90] sm:$0xff]  ;;  %v5439_v55 = vrot.slane %v3166_v58, %v4371_v50  ;;  %v2774_v58 = vcombine.high %v5260_v6, %v5154_v49 }
 0x1ff   :  { %v2453_v30 = vcombine.low %v5395_v43, %v5413_v53  ;;  %v5432_v39 = vld [vmem:[#allocation2 + $0xa0] sm:$0xff]  ;;  %v5434_v36 = vld [vmem:[#allocation2 + $0xd0] sm:$0xff]  ;;  %v2437_v7 = vcombine.low %v5430_v29, %v5411_v11 }
 0x200   :  { %v2002_v44 = vpop.permute.xlu0 %2001  ;;  %v1950_v60 = vpop.permute.xlu1 %1949  ;;  %v2469_v18 = vcombine.low %v5434_v36, %v5415_v8 }
 0x201   :  { %3381 = vrot.lane.b32.xlu0 %v2686_v33, %s3815_s15  ;;  %v2006_v42 = vsel %vm4238_vm4, %v2002_v44, 0.0  ;;  %v1955_v14 = vsel %vm4247_vm7, %v1950_v60, 0.0  ;;  %v3231_v33 = vcombine.low %v5439_v55, %v5424_v25  ;;  %v3062_v44 = vcombine.high %v5329_v5, %v5332_v48 }
 0x202   :  { %3491 = vrot.lane.b32.xlu1 %v3094_v63, %s3815_s15  ;;  %v3318_v63 = vcombine.high %v5002_v54, %v4424_v45  ;;  %2008 = vst.msk [vmem:[#allocation2 + $0x58] sm:$0xff] %vm13_vm0, %v2006_v42  ;;  %1957 = vst.msk [vmem:[#allocation2 + $0x10] sm:$0xff] %vm13_vm0, %v1955_v14  ;;  %v2421_v60 = vcombine.low %v5451_v27, %v5432_v39  ;;  %v5464_v45 = vrot.slane %v2453_v30, %v4301_v2 }
 0x203   :  { %v3150_v54 = vcombine.high %v5118_v59, %v5135_v26  ;;  %v6682_v5 = vcombine.high %v5032_v17, %v4576_v61  ;;  %v3030_v59 = vcombine.high %v5326_v46, %v5348_v34  ;;  %v5482_v26 = vrot.slane %v2437_v7, %v4301_v2 }
 0x204   :  { %v1940_v6 = vpop.permute.xlu0 %1939  ;;  %v1972_v48 = vpop.permute.xlu1 %1971  ;;  %v2477_v30 = vrot.slane %v2469_v18, %v4301_v2  ;;  %v5490_v61 = vrot.slane %v3318_v63, %v4371_v50  ;;  %v3102_v17 = vcombine.high %v5166_v47, %v5168_v35  ;;  %v2688_v46 = vcombine.high %v5369_v20, %v5345_v24 }
 0x205   :  { %3509 = vrot.lane.b32.xlu0 %v3231_v33, %s3823_s26  ;;  %v1945_v14 = vsel %vm4238_vm4, %v1940_v6, 0.0  ;;  %v1977_v42 = vsel %vm44_vm9, %v1972_v48, 0.0  ;;  %v5499_v18 = vrot.slane %v3062_v44, %v4371_v50  ;;  %v2429_v7 = vrot.slane %v2421_v60, %v4301_v2  ;;  %v6685_v44 = vld [vmem:[#allocation56_spill] sm:$0xff]  ;;  %v6686_v60 = vld [vmem:[#allocation50_spill] sm:$0xff]  ;;  %v6708_v6 = vld [vmem:[#allocation33_spill] sm:$0xff] }
 0x206   :  { %3559 = vrot.lane.b32.xlu1 %v6682_v5, %s3827_s30  ;;  %1947 = vst.msk [vmem:[#allocation2] sm:$0xff] %vm13_vm0, %v1945_v14  ;;  %1979 = vst.msk [vmem:[#allocation2 + $0x40] sm:$0xff] %vm13_vm0, %v1977_v42  ;;  %v2517_v37 = vcombine.low %v5464_v45, %v2477_v30  ;;  %v3232_v34 = vcombine.high %v5439_v55, %v5424_v25  ;;  %v5506_v63 = vrot.slane %v2774_v58, %v4371_v50  ;;  %v6690_v5 = vld [vmem:[#allocation20_spill] sm:$0xff] }
 0x207   :  { %v3118_v35 = vcombine.high %v5143_v52, %v5145_v1  ;;  %v3134_v47 = vcombine.high %v5131_v16, %v5133_v4  ;;  %v5515_v33 = vrot.slane %v3030_v59, %v4371_v50  ;;  %v2485_v25 = vcombine.low %v2429_v7, %v5482_v26  ;;  %v6683_v4 = vld [vmem:[#allocation52_spill] sm:$0xff]  ;;  %v6684_v1 = vld [vmem:[#allocation49_spill] sm:$0xff] }
 0x208   :  { %v1962_v24 = vpop.permute.xlu0 %1961  ;;  %v2010_v20 = vpop.permute.xlu1 %2009  ;;  %v5519_v55 = vrot.slane %v3150_v54, %v4301_v2  ;;  %v2574_v58 = vcombine.high %v6684_v1, %v6683_v4  ;;  %v5534_v42 = vrot.slane %v2517_v37, %v4371_v50  ;;  %v2518_v31 = vcombine.high %v5464_v45, %v2477_v30  ;;  %v5551_v37 = vld [vmem:[#allocation2 + $0x78] sm:$0xff]  ;;  %v6696_v4 = vld [vmem:[#allocation60_spill] sm:$0xff] }
 0x209   :  { %3431 = vrot.lane.b32.xlu0 %v2825_v32, %s3825_s28  ;;  %v1967_v52 = vsel %vm40_vm8, %v1962_v24, 0.0  ;;  %v2015_v16 = vsel %vm4247_vm7, %v2010_v20, 0.0  ;;  %v2606_v32 = vcombine.high %v6686_v60, %v6685_v44  ;;  %v3095_v54 = vcombine.low %v5515_v33, %v5499_v18  ;;  %v6691_v24 = vld [vmem:[#allocation55_spill] sm:$0xff]  ;;  %v6692_v20 = vld [vmem:[#allocation54_spill] sm:$0xff]  ;;  %6694 = vst [vmem:[#allocation56_spill] sm:$0xff] %v5551_v37 }
 0x20a   :  { %3413 = vrot.lane.b32.xlu1 %v2688_v46, %s3824_s27  ;;  %1969 = vst.msk [vmem:[#allocation2 + $0x30] sm:$0xff] %vm13_vm0, %v1967_v52  ;;  %2017 = vst.msk [vmem:[#allocation2 + $0x60] sm:$0xff] %vm13_vm0, %v2015_v16  ;;  %v3371_v48 = vcombine.low %v5490_v61, %v6690_v5  ;;  %v5542_v59 = vrot.slane %v3118_v35, %v4301_v2  ;;  %v5545_v46 = vrot.slane %v3134_v47, %v4301_v2  ;;  %v5549_v16 = vld [vmem:[#allocation2 + $0x58] sm:$0xff] }
 0x20b   :  { %6687 = vst [vmem:[#allocation52_spill] sm:$0xff] %v5534_v42  ;;  %v2590_v52 = vcombine.high %v6692_v20, %v6691_v24  ;;  %6693 = vst [vmem:[#allocation49_spill] sm:$0xff] %v5549_v16  ;;  %v5556_v30 = vrot.slane %v2485_v25, %v4371_v50  ;;  %v2486_v35 = vcombine.high %v2429_v7, %v5482_v26  ;;  %v6697_v47 = vld [vmem:[#allocation58_spill] sm:$0xff]  ;;  %v5573_v25 = vld [vmem:[#allocation2 + $0x68] sm:$0xff] }
 0x20c   :  { %v2000_v45 = vpop.permute.xlu0 %1999  ;;  %v2558_v1 = vcombine.high %v6697_v47, %v6696_v4  ;;  %v5561_v44 = vld [vmem:[#allocation2 + $0x38] sm:$0xff]  ;;  %v5566_v24 = vrot.slane %v3102_v17, %v4301_v2  ;;  %6700 = vst [vmem:[#allocation54_spill] sm:$0xff] %v5573_v25  ;;  %v5579_v7 = vrot.slane %v2518_v31, %v4371_v50  ;;  %v5582_v13 = vrot.slane %v2574_v58, %v4301_v2  ;;  %v5584_v17 = vld [vmem:[#allocation2 + $0x8] sm:$0xff] }
 0x20d   :  { %3525 = vrot.lane.b32.xlu0 %v3232_v34, %s3824_s27  ;;  %6695 = vst [vmem:[#allocation50_spill] sm:$0xff] %v5556_v30  ;;  %6698 = vst [vmem:[#allocation20_spill] sm:$0xff] %v5561_v44  ;;  %v2005_v60 = vsel %vm4238_vm4, %v2000_v45, 0.0  ;;  %v5571_v34 = vrot.slane %v2606_v32, %v4301_v2  ;;  %v2550_v26 = vcombine.high %v5556_v30, %v5534_v42  ;;  %v5586_v20 = vld [vmem:[#allocation2 + $0x18] sm:$0xff]  ;;  %v5588_v45 = vld [vmem:[#allocation2 + $0x28] sm:$0xff] }
 0x20e   :  { %3507 = vrot.lane.b32.xlu1 %v3095_v54, %s3823_s26  ;;  %v3213_v54 = vcombine.low %v5545_v46, %v5519_v55  ;;  %2007 = vst.msk [vmem:[#allocation2 + $0x50] sm:$0xff] %vm13_vm0, %v2005_v60  ;;  %6701 = vst [vmem:[#allocation60_spill] sm:$0xff] %v5582_v13  ;;  %v2877_v32 = vcombine.low %v5549_v16, %v5551_v37  ;;  %v3181_v4 = vcombine.low %v5566_v24, %v5542_v59  ;;  %v5597_v31 = vld [vmem:[#allocation2 + $0x48] sm:$0xff]  ;;  %v2221_v15 = vld [vmem:[#allocation2] sm:$0xff] }
 0x20f   :  { %6699 = vst [vmem:[#allocation55_spill] sm:$0xff] %v5571_v34  ;;  %6702 = vst [vmem:[#allocation58_spill] sm:$0xff] %v5584_v17  ;;  %v5595_v47 = vrot.slane %v2590_v52, %v4301_v2  ;;  %v2845_v58 = vcombine.low %v5586_v20, %v5561_v44  ;;  %v6707_v60 = vld [vmem:[#allocation36_spill] sm:$0xff]  ;;  %v5608_v14 = vrot.slane %v2486_v35, %v4371_v50  ;;  %v5624_v35 = vpop.permute.xlu1 %1664  ;;  %v6768_v42 = vld [vmem:[#allocation14_spill] sm:$0xff] }
 0x210   :  { %6703 = vst [vmem:[#allocation72_spill] sm:$0xff] %v5586_v20  ;;  %6704 = vst [vmem:[#allocation73_spill] sm:$0xff] %v5588_v45  ;;  %v655_v49 = vcombine.high %v6708_v6, %v6707_v60  ;;  %v5603_v19 = vpop.permute.xlu0 %1648  ;;  %v5611_v52 = vrot.slane %v2558_v1, %v4301_v2  ;;  %v2861_v16 = vcombine.low %v5597_v31, %v5573_v25  ;;  %v2225_v25 = vld [vmem:[#allocation2 + $0x20] sm:$0xff] }
 0x211   :  { %6705 = vst [vmem:[#allocation74_spill] sm:$0xff] %v5595_v47  ;;  %6706 = vst [vmem:[#allocation75_spill] sm:$0xff] %v5597_v31  ;;  %3379 = vrot.lane.b32.xlu0 %v2550_v26, %s3815_s15  ;;  %v5616_v20 = vrot.slane %v3213_v54, %v4371_v50  ;;  %v2669_v6 = vcombine.low %v5595_v47, %v5571_v34  ;;  %v2227_v60 = vld [vmem:[#allocation2 + $0x30] sm:$0xff]  ;;  %v5622_v26 = vld [vmem:[#allocation2 + $0x60] sm:$0xff]  ;;  %v2551_v1 = vcombine.low %v5608_v14, %v5579_v7 }
 0x212   :  { %6709 = vst [vmem:[#allocation36_spill] sm:$0xff] %v5603_v19  ;;  %3575 = vrot.lane.b32.xlu1 %v3371_v48, %s3826_s29  ;;  %6710 = vst [vmem:[#allocation33_spill] sm:$0xff] %v5611_v52  ;;  %v2829_v48 = vcombine.low %v5584_v17, %v5588_v45  ;;  %v2826_v44 = vcombine.high %v5393_v22, %v4568_v9  ;;  %v2637_v54 = vcombine.low %v5611_v52, %v5582_v13  ;;  %v5635_v19 = vld [vmem:[#allocation2 + $0x70] sm:$0xff]  ;;  %v5645_v22 = vld [vmem:[#allocation2 + $0x40] sm:$0xff] }
 0x213   :  { %6711 = vst [vmem:[#allocation76_spill] sm:$0xff] %v5624_v35  ;;  %v5633_v31 = vrot.slane %v2877_v32, %v4301_v2  ;;  %v6712_v17 = vld [vmem:[#allocation45_spill] sm:$0xff]  ;;  %v5640_v35 = vrot.slane %v3181_v4, %v4371_v50  ;;  %v5643_v37 = vrot.slane %v2845_v58, %v4301_v2  ;;  %v5652_v32 = vrot.slane %v2861_v16, %v4301_v2 }
 0x214   :  { %v2827_v45 = vcombine.low %v5506_v63, %v6712_v17  ;;  %v2223_v9 = vld [vmem:[#allocation2 + $0x10] sm:$0xff]  ;;  %v5647_v51 = vpop.permute.xlu0 %1536  ;;  %v2317_v4 = vcombine.low %v5645_v22, %v5622_v26  ;;  %v5659_v13 = vrot.slane %v2669_v6, %v4371_v50  ;;  %v5662_v47 = vrot.slane %v2829_v48, %v4301_v2 }
 0x215   :  { %6713 = vst [vmem:[#allocation45_spill] sm:$0xff] %v5647_v51  ;;  %3447 = vrot.lane.b32.xlu0 %v2826_v44, %s3827_s30  ;;  %v2301_v52 = vcombine.low %v2223_v9, %v2227_v60  ;;  %v3233_v58 = vcombine.low %v5640_v35, %v5616_v20  ;;  %v2231_v51 = vld [vmem:[#allocation2 + $0x50] sm:$0xff]  ;;  %v5669_v16 = vrot.slane %v2637_v54, %v4371_v50 }
 0x216   :  { %3395 = vrot.lane.b32.xlu1 %v2551_v1, %s3823_s26  ;;  %v6714_v1 = vld [vmem:[#allocation39_spill] sm:$0xff]  ;;  %v5666_v34 = vpop.permute.xlu1 %1646  ;;  %v2925_v41 = vcombine.low %v5652_v32, %v5633_v31  ;;  %v2285_v12 = vcombine.low %v2221_v15, %v2225_v25  ;;  %v2333_v23 = vcombine.low %v2231_v51, %v5635_v19  ;;  %v2893_v6 = vcombine.low %v5662_v47, %v5643_v37 }
 0x217   :  { %v687_v44 = vcombine.high %v6714_v1, %v4918_v56  ;;  %6715 = vst [vmem:[#allocation39_spill] sm:$0xff] %v5666_v34  ;;  %v5677_v48 = vrot.slane %v655_v49, %v4371_v50  ;;  %v5689_v0 = vrot.slane %v2301_v52, %v4301_v2  ;;  %v5692_v28 = vrot.slane %v2317_v4, %v4301_v2 }
 0x218   :  { %v5684_v54 = vpop.permute.xlu0 %1552  ;;  %v5695_v49 = vrot.slane %v2333_v23, %v4301_v2  ;;  %v5706_v52 = vrot.slane %v2925_v41, %v4371_v50  ;;  %v5709_v4 = vrot.slane %v2285_v12, %v4301_v2  ;;  %v2302_v1 = vcombine.high %v2223_v9, %v2227_v60 }
 0x219   :  { %v5680_v40 = vrot.slane %v687_v44, %v4371_v50  ;;  %3541 = vrot.lane.b32.xlu0 %v3233_v58, %s3825_s28  ;;  %v2689_v44 = vcombine.low %v5669_v16, %v5659_v13  ;;  %v2286_v58 = vcombine.high %v2221_v15, %v2225_v25  ;;  %v5716_v34 = vrot.slane %v2893_v6, %v4371_v50 }
 0x21a   :  { %3463 = vrot.lane.b32.xlu1 %v2827_v45, %s3826_s29  ;;  %v5701_v56 = vpop.permute.xlu1 %1568  ;;  %v3096_v45 = vcombine.high %v5515_v33, %v5499_v18  ;;  %6719 = vst [vmem:[#allocation78_spill] sm:$0xff] %v5706_v52  ;;  %v2381_v23 = vcombine.low %v5692_v28, %v5695_v49  ;;  %v2349_v18 = vcombine.low %v5709_v4, %v5689_v0 }
 0x21b   :  { %6718 = vst [vmem:[#allocation77_spill] sm:$0xff] %v5701_v56  ;;  %6720 = vst [vmem:[#allocation79_spill] sm:$0xff] %v5716_v34  ;;  %v3372_v41 = vcombine.high %v5490_v61, %v6690_v5  ;;  %v3014_v12 = vcombine.high %v5299_v3, %v5301_v57  ;;  %v2958_v25 = vcombine.high %v5716_v34, %v5706_v52  ;;  %v6723_v5 = vld [vmem:[#allocation62_spill] sm:$0xff]  ;;  %v6725_v57 = vld [vmem:[#allocation64_spill] sm:$0xff] }
 0x21c   :  { %v5724_v33 = vpop.permute.xlu0 %1680  ;;  %v5731_v60 = vrot.slane %v2381_v23, %v4371_v50  ;;  %v2300_v9 = vrot.slane %v2286_v58, %v4301_v2  ;;  %v2316_v6 = vrot.slane %v2302_v1, %v4301_v2  ;;  %v3234_v61 = vcombine.high %v5640_v35, %v5616_v20  ;;  %v6766_v52 = vld [vmem:[#allocation19_spill] sm:$0xff] }
 0x21d   :  { %3429 = vrot.lane.b32.xlu0 %v2689_v44, %s3825_s28  ;;  %v6724_v44 = vld [vmem:[#allocation65_spill] sm:$0xff]  ;;  %v5746_v23 = vrot.slane %v2349_v18, %v4371_v50  ;;  %v2334_v1 = vcombine.high %v2231_v51, %v5635_v19  ;;  %v2926_v20 = vcombine.high %v5652_v32, %v5633_v31  ;;  %v3214_v35 = vcombine.high %v5545_v46, %v5519_v55 }
 0x21e   :  { %3523 = vrot.lane.b32.xlu1 %v3096_v45, %s3824_s27  ;;  %v5726_v15 = vpop.permute.xlu1 %1696  ;;  %6722 = vst [vmem:[#allocation81_spill] sm:$0xff] %v5731_v60  ;;  %v2966_v3 = vcombine.high %v6724_v44, %v6723_v5  ;;  %v6726_v45 = vld [vmem:[#allocation63_spill] sm:$0xff]  ;;  %v2365_v58 = vcombine.low %v2300_v9, %v2316_v6  ;;  %v6728_v5 = vld [vmem:[#allocation66_spill] sm:$0xff]  ;;  %v6729_v44 = vld [vmem:[#allocation68_spill] sm:$0xff] }
 0x21f   :  { %6721 = vst [vmem:[#allocation80_spill] sm:$0xff] %v5726_v15  ;;  %v2998_v56 = vcombine.high %v6726_v45, %v6725_v57  ;;  %v2318_v15 = vcombine.high %v5645_v22, %v5622_v26  ;;  %6727 = vst [vmem:[#allocation62_spill] sm:$0xff] %v5746_v23  ;;  %v2982_v57 = vcombine.high %v6729_v44, %v6728_v5 }
 0x220   :  { %v5756_v26 = vrot.slane %v3014_v12, %v4301_v2  ;;  %v2414_v51 = vcombine.high %v5746_v23, %v5731_v60  ;;  %v2348_v31 = vrot.slane %v2334_v1, %v4301_v2  ;;  %v5769_v46 = vrot.slane %v2966_v3, %v4301_v2 }
 0x221   :  { %3489 = vrot.lane.b32.xlu0 %v2958_v25, %s3815_s15  ;;  %v2332_v19 = vrot.slane %v2318_v15, %v4301_v2  ;;  %v5772_v32 = vrot.slane %v2998_v56, %v4301_v2  ;;  %v2690_v15 = vcombine.high %v5669_v16, %v5659_v13  ;;  %v2894_v25 = vcombine.high %v5662_v47, %v5643_v37 }
 0x222   :  { %3591 = vrot.lane.b32.xlu1 %v3372_v41, %s3828_s3  ;;  %v5758_v22 = vpop.permute.xlu0 %1534  ;;  %v2552_v56 = vcombine.high %v5608_v14, %v5579_v7  ;;  %v5787_v45 = vrot.slane %v2982_v57, %v4301_v2  ;;  %v2366_v5 = vcombine.high %v2300_v9, %v2316_v6  ;;  %v5792_v44 = vrot.slane %v2926_v20, %v4371_v50 }
 0x223   :  { %v5760_v41 = vpop.permute.xlu1 %1584  ;;  %v2397_v3 = vcombine.low %v2332_v19, %v2348_v31  ;;  %v3077_v1 = vcombine.low %v5772_v32, %v5756_v26  ;;  %v2398_v37 = vcombine.high %v2332_v19, %v2348_v31  ;;  %v3182_v14 = vcombine.high %v5566_v24, %v5542_v59  ;;  %v6745_v59 = vld [vmem:[#allocation57_spill] sm:$0xff] }
 0x224   :  { %v3045_v7 = vcombine.low %v5769_v46, %v5787_v45  ;;  %v5811_v9 = vrot.slane %v2894_v25, %v4371_v50  ;;  %v2828_v24 = vcombine.high %v5506_v63, %v6712_v17  ;;  %v2422_v17 = vcombine.high %v5451_v27, %v5432_v39  ;;  %v6739_v27 = vld [vmem:[#allocation70_spill] sm:$0xff]  ;;  %v6744_v25 = vld [vmem:[#allocation51_spill] sm:$0xff] }
 0x225   :  { %3557 = vrot.lane.b32.xlu0 %v3234_v61, %s3827_s30  ;;  %v5795_v61 = vrot.slane %v2365_v58, %v4371_v50  ;;  %v5798_v13 = vrot.slane %v2397_v3, %v4371_v50  ;;  %v5820_v58 = vrot.slane %v3214_v35, %v4371_v50  ;;  %v5823_v20 = vrot.slane %v3077_v1, %v4371_v50 }
 0x226   :  { %3377 = vrot.lane.b32.xlu1 %v2414_v51, %s3815_s15  ;;  %v5804_v47 = vpop.permute.xlu0 %1662  ;;  %v2959_v57 = vcombine.low %v5811_v9, %v5792_v44  ;;  %v5828_v51 = vrot.slane %v2366_v5, %v4371_v50  ;;  %v5831_v19 = vrot.slane %v2398_v37, %v4371_v50  ;;  %v5836_v63 = vrot.slane %v3182_v14, %v4371_v50 }
 0x227   :  { %v5806_v16 = vpop.permute.xlu1 %1678  ;;  %v2454_v14 = vcombine.high %v5395_v43, %v5413_v53  ;;  %v6732_v43 = vld [vmem:[#allocation29_spill] sm:$0xff]  ;;  %v6733_v53 = vld [vmem:[#allocation30_spill] sm:$0xff]  ;;  %v6746_v12 = vcombine.high %v6744_v25, %v6745_v59  ;;  %v6750_v25 = vld [vmem:[#allocation55_spill] sm:$0xff] }
 0x228   :  { %6730 = vst [vmem:[#allocation65_spill] sm:$0xff] %v5828_v51  ;;  %6731 = vst [vmem:[#allocation64_spill] sm:$0xff] %v5831_v19  ;;  %v3235_v5 = vcombine.low %v5836_v63, %v5820_v58  ;;  %v6769_v19 = vld [vmem:[#allocation39_spill] sm:$0xff] }
 0x229   :  { %3411 = vrot.lane.b32.xlu0 %v2552_v56, %s3824_s27  ;;  %v5866_v3 = vrot.slane %v2454_v14, %v4301_v2 }
 0x22a   :  { %3445 = vrot.lane.b32.xlu1 %v2690_v15, %s3827_s30  ;;  %v5845_v15 = vrot.slane %v3045_v7, %v4371_v50  ;;  %v1551_v56 = vpop.permute.xlu0 %1550  ;;  %v2438_v7 = vcombine.high %v5430_v29, %v5411_v11  ;;  %v6735_v11 = vld [vmem:[#allocation61_spill] sm:$0xff] }
 0x22b   :  { %v1567_v1 = vpop.permute.xlu1 %1566 }
 0x22c   :  { %v3097_v37 = vcombine.low %v5845_v15, %v5823_v20  ;;  %v5884_v14 = vrot.slane %v2438_v7, %v4301_v2  ;;  %v2382_v7 = vcombine.high %v5692_v28, %v5695_v49 }
 0x22d   :  { %3479 = vrot.lane.b32.xlu0 %v2828_v24, %s3828_s3  ;;  %v2470_v24 = vcombine.high %v5434_v36, %v5415_v8  ;;  %v6736_v8 = vld [vmem:[#allocation67_spill] sm:$0xff]  ;;  %v6738_v36 = vld [vmem:[#allocation53_spill] sm:$0xff] }
 0x22e   :  { %3505 = vrot.lane.b32.xlu1 %v2959_v57, %s3823_s26  ;;  %v6737_v29 = vcombine.low %v6735_v11, %v6736_v8  ;;  %v6740_v39 = vcombine.low %v6738_v36, %v6739_v27  ;;  %v5923_v59 = vrot.slane %v2382_v7, %v4371_v50 }
 0x231   :  { %3539 = vrot.lane.b32.xlu0 %v3097_v37, %s3825_s28 }
 0x232   :  { %3573 = vrot.lane.b32.xlu1 %v3235_v5, %s3826_s29  ;;  %v1645_v57 = vpop.permute.xlu0 %1644  ;;  %v1661_v35 = vpop.permute.xlu1 %1660  ;;  %v6734_v5 = vcombine.low %v6732_v43, %v6733_v53  ;;  %v5887_v43 = vrot.slane %v2470_v24, %v4301_v2 }
 0x234   :  { %v1785_v37 = vsel %vm13_vm0, %v6734_v5, %v1645_v57  ;;  %v6741_v57 = vld [vmem:[#allocation23_spill] sm:$0xff] }
 0x235   :  { %v5873_v31 = vsel %vm1754_vm10, %v1785_v37, %v1661_v35  ;;  %1546 = vrot.lane.b32.xlu0 %v6740_v39, %s3823_s26  ;;  %v6742_v35 = vld [vmem:[#allocation24_spill] sm:$0xff]  ;;  %v2533_v39 = vcombine.low %v5866_v3, %v5887_v43 }
 0x236   :  { %1580 = vrot.lane.b32.xlu1 %v6737_v29, %s3825_s28  ;;  %v6743_v53 = vcombine.low %v6741_v57, %v6742_v35  ;;  %v5894_v37 = vpop.permute.xlu1 %1728  ;;  %v5897_v29 = vrot.slane %v2422_v17, %v4301_v2  ;;  %v6748_v57 = vld [vmem:[#allocation28_spill] sm:$0xff]  ;;  %v5917_v49 = vpop.permute.xlu0 %1712 }
 0x238   :  { %v1752_v5 = vsel %vm13_vm0, %v6743_v53, %v5758_v22  ;;  %v6747_v22 = vld [vmem:[#allocation27_spill] sm:$0xff]  ;;  %v2501_v17 = vcombine.low %v5897_v29, %v5884_v14  ;;  %v2350_v53 = vcombine.high %v5709_v4, %v5689_v0  ;;  %v6752_v0 = vld [vmem:[#allocation26_spill] sm:$0xff]  ;;  %v6753_v4 = vld [vmem:[#allocation25_spill] sm:$0xff] }
 0x239   :  { %v1757_v24 = vsel %vm1754_vm10, %v1752_v5, %v1551_v56  ;;  %v6749_v35 = vcombine.low %v6747_v22, %v6748_v57  ;;  %v6751_v5 = vld [vmem:[#allocation74_spill] sm:$0xff]  ;;  %v6754_v55 = vcombine.high %v6752_v0, %v6753_v4  ;;  %v6761_v4 = vld [vmem:[#allocation41_spill] sm:$0xff] }
 0x23a   :  { %1674 = vrot.lane.b32.xlu1 %v6746_v12, %s3824_s27  ;;  %v1762_v28 = vsel %vm1759_vm11, %v1757_v24, %v1567_v1  ;;  %v1583_v56 = vpop.permute.xlu1 %1582  ;;  %v5920_v12 = vrot.slane %v2533_v39, %v4371_v50  ;;  %v6755_v1 = vld [vmem:[#allocation31_spill] sm:$0xff]  ;;  %v6756_v24 = vld [vmem:[#allocation32_spill] sm:$0xff]  ;;  %v5939_v39 = vrot.slane %v2501_v17, %v4371_v50  ;;  %v5942_v7 = vrot.slane %v2350_v53, %v4371_v50 }
 0x23b   :  { %1614 = vrot.lane.b32.xlu0 %v6749_v35, %s3826_s29  ;;  %v2670_v35 = vcombine.high %v6751_v5, %v6750_v25  ;;  %v5928_v18 = vsel %vm1764_vm12, %v1762_v28, %v1583_v56  ;;  %v6757_v6 = vcombine.high %v6755_v1, %v6756_v24  ;;  %v6758_v25 = vld [vmem:[#allocation60_spill] sm:$0xff]  ;;  %v6759_v5 = vld [vmem:[#allocation33_spill] sm:$0xff] }
 0x23c   :  { %v2638_v28 = vcombine.high %v6759_v5, %v6758_v25  ;;  %v2553_v60 = vcombine.low %v5939_v39, %v5920_v12  ;;  %v6763_v53 = vld [vmem:[#allocation16_spill] sm:$0xff]  ;;  %v6764_v24 = vld [vmem:[#allocation17_spill] sm:$0xff]  ;;  %v6765_v5 = vld [vmem:[#allocation3_spill] sm:$0xff] }
 0x23d   :  { %v5951_v0 = vrot.slane %v2670_v35, %v4371_v50  ;;  %v999_v23 = vcombine.high %v6764_v24, %v6763_v53  ;;  %v1031_v34 = vcombine.high %v6766_v52, %v6765_v5  ;;  %v6767_v35 = vld [vmem:[#allocation5_spill] sm:$0xff]  ;;  %v6774_v24 = vld [vmem:[#allocation38_spill] sm:$0xff] }
 0x23e   :  { %1742 = vrot.lane.b32.xlu1 %v6754_v55, %s3828_s3  ;;  %v2415_v55 = vcombine.low %v5942_v7, %v5923_v59  ;;  %v5962_v25 = vrot.slane %v2638_v28, %v4371_v50  ;;  %v983_v30 = vcombine.high %v6768_v42, %v6767_v35  ;;  %v6773_v52 = vld [vmem:[#allocation37_spill] sm:$0xff] }
 0x23f   :  { %1708 = vrot.lane.b32.xlu0 %v6757_v6, %s3827_s30  ;;  %v1533_v56 = vpop.permute.xlu0 %1532  ;;  %v6760_v6 = vld [vmem:[#allocation40_spill] sm:$0xff]  ;;  %v6775_v5 = vcombine.high %v6773_v52, %v6774_v24 }
 0x240   :  { %v6762_v17 = vcombine.low %v6760_v6, %v6761_v4  ;;  %v6770_v6 = vld [vmem:[#allocation21_spill] sm:$0xff]  ;;  %v6771_v4 = vld [vmem:[#allocation22_spill] sm:$0xff]  ;;  %v2691_v28 = vcombine.low %v5962_v25, %v5951_v0  ;;  %v6002_v52 = vrot.slane %v983_v30, %v4301_v2 }
 0x241   :  { %v5983_v42 = vrot.slane %v6775_v5, %v4301_v2 }
 0x242   :  { %v1751_v1 = vsel %vm13_vm0, %v6762_v17, %v1533_v56  ;;  %3427 = vrot.lane.b32.xlu1 %v2553_v60, %s3825_s28  ;;  %v6772_v56 = vcombine.low %v6770_v6, %v6771_v4  ;;  %v6776_v6 = vld [vmem:[#allocation42_spill] sm:$0xff] }
 0x243   :  { %3393 = vrot.lane.b32.xlu0 %v2415_v55, %s3823_s26  ;;  %v5973_v53 = vpop.permute.xlu0 %1600  ;;  %v1643_v60 = vpop.permute.xlu1 %1642  ;;  %v2960_v55 = vcombine.high %v5811_v9, %v5792_v44  ;;  %v5994_v44 = vrot.slane %v999_v23, %v4301_v2  ;;  %v5999_v9 = vrot.slane %v1031_v34, %v4301_v2  ;;  %v3098_v23 = vcombine.high %v5845_v15, %v5823_v20 }
 0x244   :  { %v1786_v17 = vsel %vm13_vm0, %v6772_v56, %v6769_v19  ;;  %v6777_v19 = vld [vmem:[#allocation43_spill] sm:$0xff] }
 0x245   :  { %v1790_v35 = vsel %vm1754_vm10, %v1786_v17, %v5804_v47  ;;  %v6778_v4 = vcombine.low %v6776_v6, %v6777_v19  ;;  %v1062_v30 = vcombine.low %v6002_v52, %v5994_v44  ;;  %v6782_v6 = vld [vmem:[#allocation49_spill] sm:$0xff] }
 0x246   :  { %3521 = vrot.lane.b32.xlu1 %v2960_v55, %s3824_s27  ;;  %v1794_v47 = vsel %vm1759_vm11, %v1790_v35, %v5806_v16  ;;  %v1094_v55 = vcombine.low %v5983_v42, %v5999_v9  ;;  %v6779_v16 = vld [vmem:[#allocation13_spill] sm:$0xff]  ;;  %v6781_v35 = vld [vmem:[#allocation56_spill] sm:$0xff] }
 0x247   :  { %v5991_v56 = vsel %vm13_vm0, %v6778_v4, %v1643_v60  ;;  %3461 = vrot.lane.b32.xlu0 %v2691_v28, %s3826_s29  ;;  %v1695_v17 = vpop.permute.xlu0 %1694  ;;  %v1711_v24 = vpop.permute.xlu1 %1710  ;;  %v3236_v60 = vcombine.high %v5836_v63, %v5820_v58  ;;  %v6780_v58 = vld [vmem:[#allocation15_spill] sm:$0xff]  ;;  %v2878_v19 = vcombine.high %v6782_v6, %v6781_v35  ;;  %v6783_v4 = vld [vmem:[#allocation36_spill] sm:$0xff]  ;;  %v6789_v35 = vcombine.high %v6735_v11, %v6736_v8  ;;  %v6793_v6 = vld [vmem:[#allocation73_spill] sm:$0xff] }
 0x248   :  { %v1798_v34 = vsel %vm1764_vm12, %v1794_v47, %v1695_v17  ;;  %v1518_v63 = vcombine.low %v6780_v58, %v6779_v16  ;;  %v6023_v5 = vrot.slane %v1094_v55, %v4371_v50  ;;  %v6786_v58 = vld [vmem:[#allocation12_spill] sm:$0xff]  ;;  %v6787_v16 = vld [vmem:[#allocation18_spill] sm:$0xff] }
 0x249   :  { %v6016_v28 = vsel %vm1769_vm13, %v1798_v34, %v1711_v24  ;;  %v6031_v24 = vrot.slane %v1062_v30, %v4371_v50  ;;  %v974_v51 = vcombine.low %v6787_v16, %v6786_v58  ;;  %v6791_v30 = vld [vmem:[#allocation54_spill] sm:$0xff]  ;;  %v6795_v16 = vld [vmem:[#allocation20_spill] sm:$0xff] }
 0x24a   :  { %3589 = vrot.lane.b32.xlu1 %v3236_v60, %s3828_s3  ;;  %v1787_v47 = vsel %vm13_vm0, %v1518_v63, %v6783_v4  ;;  %v6784_v60 = vld [vmem:[#allocation9_spill] sm:$0xff]  ;;  %v6792_v63 = vld [vmem:[#allocation75_spill] sm:$0xff]  ;;  %v6794_v4 = vld [vmem:[#allocation58_spill] sm:$0xff] }
 0x24b   :  { %3555 = vrot.lane.b32.xlu0 %v3098_v23, %s3827_s30  ;;  %v1549_v20 = vpop.permute.xlu0 %1548  ;;  %v1565_v15 = vpop.permute.xlu1 %1564  ;;  %v6785_v23 = vld [vmem:[#allocation8_spill] sm:$0xff] }
 0x24c   :  { %v1756_v17 = vsel %vm1754_vm10, %v1751_v1, %v1549_v20  ;;  %v455_v34 = vcombine.high %v6785_v23, %v6784_v60  ;;  %v6790_v1 = vcombine.high %v6738_v36, %v6739_v27  ;;  %v2862_v20 = vcombine.high %v6792_v63, %v6791_v30  ;;  %v6796_v23 = vld [vmem:[#allocation72_spill] sm:$0xff]  ;;  %v6799_v63 = vld [vmem:[#allocation6_spill] sm:$0xff] }
 0x24d   :  { %v6038_v55 = vsel %vm1759_vm11, %v1756_v17, %v1565_v15  ;;  %v2830_v60 = vcombine.high %v6794_v4, %v6793_v6  ;;  %v2846_v15 = vcombine.high %v6796_v23, %v6795_v16  ;;  %v6797_v17 = vld [vmem:[#allocation45_spill] sm:$0xff]  ;;  %v6798_v58 = vld [vmem:[#allocation76_spill] sm:$0xff]  ;;  %v1114_v36 = vcombine.low %v6031_v24, %v6023_v5  ;;  %v6800_v6 = vld [vmem:[#allocation7_spill] sm:$0xff] }
 0x24e   :  { %6788 = vst [vmem:[#allocation63_spill] sm:$0xff] %v6038_v55  ;;  %1596 = vrot.lane.b32.xlu1 %v6789_v35, %s3827_s30  ;;  %v1753_v55 = vsel %vm13_vm0, %v974_v51, %v6797_v17  ;;  %v1791_v11 = vsel %vm1754_vm10, %v1787_v47, %v6798_v58  ;;  %v6061_v27 = vrot.slane %v2878_v19, %v4301_v2  ;;  %v6801_v4 = vld [vmem:[#allocation44_spill] sm:$0xff]  ;;  %v6802_v16 = vld [vmem:[#allocation46_spill] sm:$0xff] }
 0x24f   :  { %1562 = vrot.lane.b32.xlu0 %v6790_v1, %s3824_s27  ;;  %v1617_v8 = vpop.permute.xlu0 %1616  ;;  %v1633_v35 = vpop.permute.xlu1 %1632  ;;  %v1758_v1 = vsel %vm1754_vm10, %v1753_v55, %v5684_v54  ;;  %v1795_v30 = vsel %vm1759_vm11, %v1791_v11, %v5724_v33  ;;  %v439_v51 = vcombine.high %v6800_v6, %v6799_v63  ;;  %v471_v47 = vcombine.high %v6802_v16, %v6801_v4  ;;  %v6804_v33 = vld [vmem:[#allocation4_spill] sm:$0xff]  ;;  %v6805_v55 = vld [vmem:[#allocation47_spill] sm:$0xff] }
 0x250   :  { %v6803_v58 = vcombine.high %v6747_v22, %v6748_v57  ;;  %v6077_v19 = vrot.slane %v2862_v20, %v4301_v2  ;;  %v6080_v54 = vrot.slane %v455_v34, %v4301_v2  ;;  %v487_v23 = vcombine.high %v6805_v55, %v6804_v33  ;;  %v6806_v22 = vld [vmem:[#allocation77_spill] sm:$0xff]  ;;  %v6807_v20 = vld [vmem:[#allocation80_spill] sm:$0xff] }
 0x251   :  { %v3078_v17 = vcombine.high %v5772_v32, %v5756_v26  ;;  %v6087_v11 = vrot.slane %v2830_v60, %v4301_v2  ;;  %v1763_v57 = vsel %vm1759_vm11, %v1758_v1, %v6806_v22  ;;  %v1799_v34 = vsel %vm1764_vm12, %v1795_v30, %v6807_v20  ;;  %v6811_v20 = vld [vmem:[#allocation10_spill] sm:$0xff] }
 0x252   :  { %1690 = vrot.lane.b32.xlu1 %v1114_v36, %s3825_s28  ;;  %v6090_v36 = vrot.slane %v2846_v15, %v4301_v2  ;;  %v2416_v4 = vcombine.high %v5942_v7, %v5923_v59  ;;  %v2941_v26 = vcombine.low %v6077_v19, %v6061_v27  ;;  %v1768_v32 = vsel %vm1764_vm12, %v1763_v57, %v5760_v41  ;;  %v6808_v7 = vld [vmem:[#allocation34_spill] sm:$0xff]  ;;  %v6809_v41 = vld [vmem:[#allocation35_spill] sm:$0xff] }
 0x253   :  { %1630 = vrot.lane.b32.xlu0 %v6803_v58, %s3828_s3  ;;  %v1677_v63 = vpop.permute.xlu0 %1676  ;;  %v1693_v6 = vpop.permute.xlu1 %1692  ;;  %v1803_v60 = vsel %vm1769_vm13, %v1799_v34, %v5917_v49  ;;  %v6107_v1 = vrot.slane %v471_v47, %v4301_v2  ;;  %v1773_v30 = vsel %vm1769_vm13, %v1768_v32, %v5973_v53  ;;  %v6810_v16 = vcombine.low %v6808_v7, %v6809_v41  ;;  %v6812_v34 = vld [vmem:[#allocation11_spill] sm:$0xff] }
 0x254   :  { %v1793_v15 = vsel %vm1759_vm11, %v5873_v31, %v1677_v63  ;;  %v3046_v49 = vcombine.high %v5769_v46, %v5787_v45  ;;  %v1778_v31 = vsel %vm1774_vm14, %v1773_v30, %v1617_v8  ;;  %v2909_v47 = vcombine.low %v6087_v11, %v6090_v36 }
 0x255   :  { %v6112_v59 = vsel %vm1764_vm12, %v1793_v15, %v1693_v6  ;;  %v6125_v53 = vrot.slane %v487_v23, %v4301_v2  ;;  %v1807_v58 = vsel %vm1774_vm14, %v1803_v60, %v5894_v37  ;;  %v2692_v22 = vcombine.high %v5962_v25, %v5951_v0 }
 0x256   :  { %3409 = vrot.lane.b32.xlu1 %v2416_v4, %s3824_s27  ;;  %v3092_v46 = vrot.slane %v3078_v17, %v4371_v50  ;;  %v6135_v45 = vrot.slane %v439_v51, %v4301_v2  ;;  %v2554_v23 = vcombine.high %v5939_v39, %v5920_v12  ;;  %v2949_v57 = vrot.slane %v2941_v26, %v4371_v50 }
 0x257   :  { %1724 = vrot.lane.b32.xlu0 %v6810_v16, %s3826_s29  ;;  %v1745_v33 = vpop.permute.xlu0 %1744  ;;  %v6129_v55 = vpop.permute.xlu1 %3495  ;;  %v550_v37 = vcombine.low %v6107_v1, %v6125_v53  ;;  %v1783_v0 = vsel %vm1779_vm15, %v1778_v31, %v1633_v35  ;;  %v3060_v25 = vrot.slane %v3046_v49, %v4371_v50  ;;  %v2917_v2 = vrot.slane %v2909_v47, %v4371_v50 }
 0x258   :  { %v1811_v8 = vsel %vm1779_vm15, %v1807_v58, %v1745_v33  ;;  %v518_v12 = vcombine.low %v6135_v45, %v6080_v54  ;;  %v6813_v63 = vcombine.low %v6811_v20, %v6812_v34  ;;  %v2534_v15 = vcombine.high %v5866_v3, %v5887_v43 }
 0x259   :  { %1848 = vmatprep.subr.mxu0 %v1811_v8  ;;  %v3099_v17 = vcombine.low %v3060_v25, %v3092_v46  ;;  %v2961_v35 = vcombine.low %v2917_v2, %v2949_v57  ;;  %v558_v4 = vrot.slane %v550_v37, %v4371_v50  ;;  %v6814_v49 = vcombine.low %v5677_v48, %v5680_v40 }
 0x25a   :  { %3477 = vrot.lane.b32.xlu1 %v2692_v22, %s3828_s3  ;;  %1849 = vmatpush1.msra.mxu0 %v1783_v0  ;;  %v526_v26 = vrot.slane %v518_v12, %v4371_v50  ;;  %v2502_v31 = vcombine.high %v5897_v29, %v5884_v14  ;;  %v2548_v3 = vrot.slane %v2534_v15, %v4371_v50 }
 0x25b   :  { %3443 = vrot.lane.b32.xlu0 %v2554_v23, %s3827_s30  ;;  %v6150_v39 = vpop.permute.xlu1 %3511  ;;  %v1531_v51 = vpop.permute.xlu0 %1530  ;;  %v1115_v43 = vcombine.high %v6031_v24, %v6023_v5  ;;  %v6815_v33 = vcombine.high %v6808_v7, %v6809_v41  ;;  %v6816_v5 = vcombine.low %v5795_v61, %v5798_v13  ;;  %v3100_v41 = vcombine.high %v3060_v25, %v3092_v46 }
 0x25c   :  { %v6156_v6 = vsel %vm13_vm0, %v6813_v63, %v1531_v51  ;;  %v570_v16 = vcombine.low %v526_v26, %v558_v4  ;;  %v2516_v14 = vrot.slane %v2502_v31, %v4371_v50  ;;  %v2962_v23 = vcombine.high %v2917_v2, %v2949_v57 }
 0x25d   :  { %v1095_v37 = vcombine.high %v5983_v42, %v5999_v9  ;;  %v2942_v51 = vcombine.high %v6077_v19, %v6061_v27  ;;  %v6817_v42 = vcombine.high %v5677_v48, %v5680_v40  ;;  %v2910_v9 = vcombine.high %v6087_v11, %v6090_v36 }
 0x25e   :  { %3571 = vrot.lane.b32.xlu1 %v3099_v17, %s3826_s29  ;;  %v2555_v8 = vcombine.low %v2516_v14, %v2548_v3  ;;  %v571_v17 = vcombine.high %v526_v26, %v558_v4  ;;  %v6818_v27 = vcombine.low %v5400_v62, %v5387_v38  ;;  %v6819_v40 = vcombine.low %v5403_v21, %v5390_v10 }
 0x25f   :  { %3537 = vrot.lane.b32.xlu0 %v2961_v35, %s3825_s28  ;;  %v6162_v32 = vpop.permute.xlu1 %3399  ;;  %v1599_v60 = vpop.permute.xlu0 %1598  ;;  %v1109_v46 = vrot.slane %v1095_v37, %v4371_v50  ;;  %v2956_v25 = vrot.slane %v2942_v51, %v4371_v50  ;;  %v551_v11 = vcombine.high %v6107_v1, %v6125_v53  ;;  %v6820_v36 = vcombine.high %v5795_v61, %v5798_v13  ;;  %v6829_v51 = vld [vmem:[#allocation48_spill] sm:$0xff] }
 0x260   :  { %v6168_v30 = vsel %vm1769_vm13, %v5928_v18, %v1599_v60  ;;  %v2924_v20 = vrot.slane %v2910_v9, %v4371_v50  ;;  %v519_v10 = vcombine.high %v6135_v45, %v6080_v54  ;;  %v2556_v63 = vcombine.high %v2516_v14, %v2548_v3  ;;  %v6824_v3 = vld [vmem:[#allocation50_spill] sm:$0xff] }
 0x261   :  { %v565_v1 = vrot.slane %v551_v11, %v4371_v50  ;;  %v6832_v11 = vld [vmem:[#allocation79_spill] sm:$0xff] }
 0x262   :  { %1612 = vrot.lane.b32.xlu1 %v6814_v49, %s3826_s29  ;;  %v2963_v34 = vcombine.low %v2924_v20, %v2956_v25  ;;  %v533_v61 = vrot.slane %v519_v10, %v4371_v50  ;;  %v2964_v60 = vcombine.high %v2924_v20, %v2956_v25 }
 0x263   :  { %1578 = vrot.lane.b32.xlu0 %v570_v16, %s3825_s28  ;;  %v1659_v58 = vpop.permute.xlu0 %1658  ;;  %v6822_v16 = vld [vmem:[#allocation64_spill] sm:$0xff] }
 0x264   :  { %v6177_v47 = vpop.permute.xlu1 %3527  ;;  %v6182_v18 = vsel %vm1754_vm10, %v5991_v56, %v1659_v58  ;;  %v572_v54 = vcombine.low %v533_v61, %v565_v1 }
 0x266   :  { %1740 = vrot.lane.b32.xlu1 %v6815_v33, %s3828_s3 }
 0x267   :  { %1706 = vrot.lane.b32.xlu0 %v1115_v43, %s3827_s30  ;;  %v1727_v22 = vpop.permute.xlu0 %1726  ;;  %v6825_v43 = vld [vmem:[#allocation52_spill] sm:$0xff] }
 0x268   :  { %v6192_v29 = vpop.permute.xlu1 %3415  ;;  %v6196_v56 = vsel %vm1774_vm14, %v6016_v28, %v1727_v22  ;;  %v1063_v28 = vcombine.high %v6002_v52, %v5994_v44  ;;  %v6826_v33 = vcombine.low %v6824_v3, %v6825_v43  ;;  %v573_v22 = vcombine.high %v533_v61, %v565_v1 }
 0x26a   :  { %3459 = vrot.lane.b32.xlu1 %v2555_v8, %s3826_s29  ;;  %v1077_v44 = vrot.slane %v1063_v28, %v4371_v50  ;;  %v6821_v50 = vld [vmem:[#allocation65_spill] sm:$0xff] }
 0x26b   :  { %3425 = vrot.lane.b32.xlu0 %v6816_v5, %s3825_s28  ;;  %v6205_v7 = vpop.permute.xlu0 %3383  ;;  %v6823_v49 = vcombine.low %v6821_v50, %v6822_v16  ;;  %v6827_v8 = vcombine.high %v6821_v50, %v6822_v16 }
 0x26c   :  { %v6203_v24 = vpop.permute.xlu1 %3543  ;;  %v1116_v2 = vcombine.low %v1077_v44, %v1109_v46  ;;  %v1117_v35 = vcombine.high %v1077_v44, %v1109_v46 }
 0x26e   :  { %3587 = vrot.lane.b32.xlu1 %v3100_v41, %s3828_s3 }
 0x26f   :  { %3553 = vrot.lane.b32.xlu0 %v2962_v23, %s3827_s30  ;;  %v6213_v12 = vpop.permute.xlu0 %3493 }
 0x270   :  { %v3398_v0 = vpop.permute.xlu1 %3397 }
 0x272   :  { %1628 = vrot.lane.b32.xlu1 %v6817_v42, %s3828_s3 }
 0x273   :  { %1594 = vrot.lane.b32.xlu0 %v571_v17, %s3827_s30  ;;  %v3382_v57 = vpop.permute.xlu0 %3381 }
 0x274   :  { %v3492_v52 = vpop.permute.xlu1 %3491  ;;  %v3599_v48 = vsel %vm13_vm0, %v6819_v40, %v3382_v57 }
 0x275   :  { %v3626_v19 = vsel %vm13_vm0, %v6818_v27, %v3492_v52  ;;  %v3603_v38 = vsel %vm1754_vm10, %v3599_v48, %v3398_v0  ;;  %v6828_v0 = vld [vmem:[#allocation13_spill] sm:$0xff]  ;;  %v6830_v48 = vld [vmem:[#allocation12_spill] sm:$0xff] }
 0x276   :  { %3441 = vrot.lane.b32.xlu1 %v6820_v36, %s3827_s30  ;;  %v3365_v17 = vcombine.low %v6829_v51, %v6828_v0  ;;  %v6833_v36 = vld [vmem:[#allocation78_spill] sm:$0xff]  ;;  %v6838_v0 = vld [vmem:[#allocation69_spill] sm:$0xff]  ;;  %v6839_v51 = vld [vmem:[#allocation71_spill] sm:$0xff] }
 0x277   :  { %1722 = vrot.lane.b32.xlu0 %v1116_v2, %s3826_s29  ;;  %v6246_v21 = vpop.permute.xlu0 %3509  ;;  %v6834_v20 = vcombine.low %v6832_v11, %v6833_v36 }
 0x278   :  { %v3560_v62 = vpop.permute.xlu1 %3559  ;;  %v3628_v46 = vsel %vm13_vm0, %v3365_v17, %v6129_v55  ;;  %v3229_v17 = vcombine.low %v6839_v51, %v6838_v0 }
 0x279   :  { %v3632_v42 = vsel %vm1754_vm10, %v3628_v46, %v6150_v39  ;;  %v6831_v39 = vld [vmem:[#allocation59_spill] sm:$0xff] }
 0x27a   :  { %3569 = vrot.lane.b32.xlu1 %v2963_v34, %s3826_s29  ;;  %v3636_v52 = vsel %vm1759_vm11, %v3632_v42, %v6177_v47  ;;  %v2821_v2 = vcombine.low %v6831_v39, %v6830_v48  ;;  %v6835_v34 = vld [vmem:[#allocation62_spill] sm:$0xff] }
 0x27b   :  { %3475 = vrot.lane.b32.xlu0 %v2556_v63, %s3828_s3  ;;  %v3432_v53 = vpop.permute.xlu0 %3431  ;;  %v3640_v25 = vsel %vm1764_vm12, %v3636_v52, %v6203_v24  ;;  %v6836_v63 = vld [vmem:[#allocation81_spill] sm:$0xff] }
 0x27c   :  { %v3414_v13 = vpop.permute.xlu1 %3413  ;;  %v3644_v27 = vsel %vm1769_vm13, %v3640_v25, %v3560_v62  ;;  %v3600_v24 = vsel %vm13_vm0, %v2821_v2, %v6205_v7  ;;  %v6837_v1 = vcombine.low %v6835_v34, %v6836_v63 }
 0x27d   :  { %v6253_v4 = vsel %vm1759_vm11, %v3603_v38, %v3414_v13  ;;  %v3604_v13 = vsel %vm1754_vm10, %v3600_v24, %v6162_v32 }
 0x27e   :  { %1738 = vrot.lane.b32.xlu1 %v1117_v35, %s3828_s3 }
 0x27f   :  { %1610 = vrot.lane.b32.xlu0 %v572_v54, %s3826_s29  ;;  %v6257_v26 = vpop.permute.xlu0 %3525 }
 0x280   :  { %v3508_v45 = vpop.permute.xlu1 %3507 }
 0x281   :  { %v3630_v15 = vsel %vm1754_vm10, %v3626_v19, %v3508_v45  ;;  %v3608_v45 = vsel %vm1759_vm11, %v3604_v13, %v6192_v29 }
 0x282   :  { %3585 = vrot.lane.b32.xlu1 %v2964_v60, %s3828_s3  ;;  %v3612_v7 = vsel %vm1764_vm12, %v3608_v45, %v3432_v53 }
 0x283   :  { %3457 = vrot.lane.b32.xlu0 %v6823_v49, %s3826_s29  ;;  %v3380_v58 = vpop.permute.xlu0 %3379 }
 0x284   :  { %v3576_v31 = vpop.permute.xlu1 %3575  ;;  %v3598_v14 = vsel %vm13_vm0, %v6826_v33, %v3380_v58 }
 0x285   :  { %v3648_v19 = vsel %vm1774_vm14, %v3644_v27, %v3576_v31 }
 0x286   :  { %3473 = vrot.lane.b32.xlu1 %v6827_v8, %s3828_s3 }
 0x287   :  { %1626 = vrot.lane.b32.xlu0 %v573_v22, %s3828_s3  ;;  %v3448_v41 = vpop.permute.xlu0 %3447 }
 0x288   :  { %v3396_v5 = vpop.permute.xlu1 %3395 }
 0x289   :  { %v3602_v23 = vsel %vm1754_vm10, %v3598_v14, %v3396_v5 }
 0x28b   :  { %v3542_v28 = vpop.permute.xlu0 %3541 }
 0x28c   :  { %v3464_v37 = vpop.permute.xlu1 %3463 }
 0x28f   :  { %v6281_v44 = vpop.permute.xlu0 %3429 }
 0x290   :  { %v3524_v9 = vpop.permute.xlu1 %3523  ;;  %v3611_v11 = vsel %vm1764_vm12, %v6253_v4, %v6281_v44 }
 0x291   :  { %v6286_v57 = vsel %vm1759_vm11, %v3630_v15, %v3524_v9  ;;  %v3616_v15 = vsel %vm1769_vm13, %v3612_v7, %v3448_v41 }
 0x292   :  { %v3620_v50 = vsel %vm1774_vm14, %v3616_v15, %v3464_v37 }
 0x293   :  { %v3490_v40 = vpop.permute.xlu0 %3489 }
 0x294   :  { %v3592_v55 = vpop.permute.xlu1 %3591  ;;  %v3625_v47 = vsel %vm13_vm0, %v6834_v20, %v3490_v40 }
 0x295   :  { %v3652_v38 = vsel %vm1779_vm15, %v3648_v19, %v3592_v55 }
 0x296   :  { %3677 = vmatprep.subr.mxu1 %v3652_v38 }
 0x297   :  { %v3558_v62 = vpop.permute.xlu0 %3557 }
 0x298   :  { %v3378_v10 = vpop.permute.xlu1 %3377 }
 0x299   :  { %v6305_v61 = vsel %vm13_vm0, %v6837_v1, %v3378_v10 }
 0x29b   :  { %v3412_v54 = vpop.permute.xlu0 %3411 }
 0x29c   :  { %v3446_v35 = vpop.permute.xlu1 %3445  ;;  %v6312_v60 = vsel %vm1759_vm11, %v3602_v23, %v3412_v54 }
 0x29d   :  { %v3615_v36 = vsel %vm1769_vm13, %v3611_v11, %v3446_v35 }
 0x29f   :  { %v3480_v49 = vpop.permute.xlu0 %3479 }
 0x2a0   :  { %v3506_v16 = vpop.permute.xlu1 %3505  ;;  %v3624_v32 = vsel %vm1779_vm15, %v3620_v50, %v3480_v49  ;;  %v6840_v49 = vld [vmem:[#allocation63_spill] sm:$0xff] }
 0x2a1   :  { %v6318_v31 = vsel %vm1754_vm10, %v3625_v47, %v3506_v16  ;;  %3678 = vmatpush1.msra.mxu1 %v3624_v32 }
 0x2a3   :  { %v3540_v3 = vpop.permute.xlu0 %3539 }
 0x2a4   :  { %v3574_v58 = vpop.permute.xlu1 %3573  ;;  %v3638_v45 = vsel %vm1764_vm12, %v6286_v57, %v3540_v3 }
 0x2a7   :  { %v1547_v43 = vpop.permute.xlu0 %1546 }
 0x2a8   :  { %v1581_v29 = vpop.permute.xlu1 %1580  ;;  %v6323_v33 = vsel %vm1754_vm10, %v6156_v6, %v1547_v43  ;;  %v3627_v6 = vsel %vm13_vm0, %v3229_v17, %v6213_v12 }
 0x2a9   :  { %v3631_v46 = vsel %vm1754_vm10, %v3627_v6, %v6246_v21  ;;  %v1766_v32 = vsel %vm1764_vm12, %v6840_v49, %v1581_v29 }
 0x2aa   :  { %v3635_v9 = vsel %vm1759_vm11, %v3631_v46, %v6257_v26 }
 0x2ac   :  { %v1675_v53 = vpop.permute.xlu1 %1674 }
 0x2ad   :  { %v1615_v14 = vpop.permute.xlu0 %1614  ;;  %v6327_v22 = vsel %vm1759_vm11, %v6182_v18, %v1675_v53 }
 0x2ae   :  { %v1777_v21 = vsel %vm1774_vm14, %v6168_v30, %v1615_v14 }
 0x2b0   :  { %v1743_v8 = vpop.permute.xlu1 %1742 }
 0x2b1   :  { %v1709_v5 = vpop.permute.xlu0 %1708  ;;  %v1810_v41 = vsel %vm1779_vm15, %v6196_v56, %v1743_v8  ;;  %v3639_v56 = vsel %vm1764_vm12, %v3635_v9, %v3542_v28 }
 0x2b2   :  { %1850 = vmatprep.subr.mxu0 %v1810_v41  ;;  %v3643_v52 = vsel %vm1769_vm13, %v3639_v56, %v3558_v62  ;;  %v1801_v63 = vsel %vm1769_vm13, %v6112_v59, %v1709_v5 }
 0x2b3   :  { %v3647_v25 = vsel %vm1774_vm14, %v3643_v52, %v3574_v58 }
 0x2b4   :  { %v3428_v23 = vpop.permute.xlu1 %3427 }
 0x2b5   :  { %v6331_v37 = vpop.permute.xlu0 %3393  ;;  %v3610_v5 = vsel %vm1764_vm12, %v6312_v60, %v3428_v23 }
 0x2b8   :  { %v6339_v18 = vpop.permute.xlu1 %3521 }
 0x2b9   :  { %v3462_v42 = vpop.permute.xlu0 %3461  ;;  %v3633_v60 = vsel %vm1759_vm11, %v6318_v31, %v6339_v18 }
 0x2ba   :  { %v3619_v20 = vsel %vm1774_vm14, %v3615_v36, %v3462_v42  ;;  %v6841_v36 = vmov 0.0  }
 0x2bc   :  { %v3590_v27 = vpop.permute.xlu1 %3589 }
 0x2bd   :  { %v3556_v19 = vpop.permute.xlu0 %3555  ;;  %v3651_v55 = vsel %vm1779_vm15, %v3647_v25, %v3590_v27  ;;  %v3601_v25 = vsel %vm1754_vm10, %v6305_v61, %v6331_v37 }
 0x2be   :  { %3679 = vmatprep.subr.mxu1 %v3651_v55  ;;  %v3642_v7 = vsel %vm1769_vm13, %v3638_v45, %v3556_v19 }
 0x2c0   :  { %v1597_v12 = vpop.permute.xlu1 %1596 }
 0x2c1   :  { %v6347_v40 = vpop.permute.xlu0 %1562  ;;  %v1771_v58 = vsel %vm1769_vm13, %v1766_v32, %v1597_v12 }
 0x2c2   :  { %v1760_v18 = vsel %vm1759_vm11, %v6323_v33, %v6347_v40 }
 0x2c4   :  { %v1691_v48 = vpop.permute.xlu1 %1690 }
 0x2c5   :  { %v1631_v39 = vpop.permute.xlu0 %1630  ;;  %v1796_v17 = vsel %vm1764_vm12, %v6327_v22, %v1691_v48 }
 0x2c6   :  { %v1782_v26 = vsel %vm1779_vm15, %v1777_v21, %v1631_v39 }
 0x2c7   :  { %1851 = vmatpush1.msra.mxu0 %v1782_v26 }
 0x2c8   :  { %v3410_v28 = vpop.permute.xlu1 %3409 }
 0x2c9   :  { %v1725_v2 = vpop.permute.xlu0 %1724  ;;  %v3605_v55 = vsel %vm1759_vm11, %v3601_v25, %v3410_v28  ;;  %v46_v28 = vld [vmem:[%s6479_s1] sm:$0xff] }
 0x2ca   :  { %v1805_v1 = vsel %vm1774_vm14, %v1801_v63, %v1725_v2 }
 0x2cc   :  { %v3478_v47 = vpop.permute.xlu1 %3477 }
 0x2cd   :  { %v3444_v38 = vpop.permute.xlu0 %3443  ;;  %v3623_v24 = vsel %vm1779_vm15, %v3619_v20, %v3478_v47  ;;  %v47_v20 = vld [vmem:[%s6479_s1 + $0x8] sm:$0xff]  ;;  %v48_v47 = vld [vmem:[%s6479_s1 + $0x10] sm:$0xff] }
 0x2ce   :  { %3680 = vmatpush1.msra.mxu1 %v3623_v24  ;;  %v3614_v41 = vsel %vm1769_vm13, %v3610_v5, %v3444_v38  ;;  %v49_v38 = vld [vmem:[%s6479_s1 + $0x18] sm:$0x3f] }
 0x2d0   :  { %v3572_v30 = vpop.permute.xlu1 %3571 }
 0x2d1   :  { %v3538_v10 = vpop.permute.xlu0 %3537  ;;  %v3646_v15 = vsel %vm1774_vm14, %v3642_v7, %v3572_v30 }
 0x2d2   :  { %v3637_v52 = vsel %vm1764_vm12, %v3633_v60, %v3538_v10 }
 0x2d4   :  { %v1613_v62 = vpop.permute.xlu1 %1612 }
 0x2d5   :  { %v1579_v34 = vpop.permute.xlu0 %1578  ;;  %v1776_v43 = vsel %vm1774_vm14, %v1771_v58, %v1613_v62 }
 0x2d6   :  { %v1765_v48 = vsel %vm1764_vm12, %v1760_v18, %v1579_v34 }
 0x2d8   :  { %v1741_v13 = vpop.permute.xlu1 %1740 }
 0x2d9   :  { %v1707_v4 = vpop.permute.xlu0 %1706  ;;  %v1809_v44 = vsel %vm1779_vm15, %v1805_v1, %v1741_v13 }
 0x2da   :  { %1852 = vmatprep.subr.mxu0 %v1809_v44  ;;  %v1800_v46 = vsel %vm1769_vm13, %v1796_v17, %v1707_v4 }
 0x2dc   :  { %v3460_v35 = vpop.permute.xlu1 %3459 }
 0x2dd   :  { %v3426_v54 = vpop.permute.xlu0 %3425  ;;  %v3618_v29 = vsel %vm1774_vm14, %v3614_v41, %v3460_v35 }
 0x2de   :  { %v3609_v21 = vsel %vm1764_vm12, %v3605_v55, %v3426_v54 }
 0x2e0   :  { %v3588_v50 = vpop.permute.xlu1 %3587 }
 0x2e1   :  { %v3554_v16 = vpop.permute.xlu0 %3553  ;;  %v3650_v59 = vsel %vm1779_vm15, %v3646_v15, %v3588_v50 }
 0x2e2   :  { %3681 = vmatprep.subr.mxu1 %v3650_v59  ;;  %v3641_v22 = vsel %vm1769_vm13, %v3637_v52, %v3554_v16 }
 0x2e4   :  { %v1629_v53 = vpop.permute.xlu1 %1628 }
 0x2e5   :  { %v1595_v14 = vpop.permute.xlu0 %1594  ;;  %v1781_v57 = vsel %vm1779_vm15, %v1776_v43, %v1629_v53 }
 0x2e6   :  { %1853 = vmatpush1.msra.mxu0 %v1781_v57  ;;  %v1770_v61 = vsel %vm1769_vm13, %v1765_v48, %v1595_v14 }
 0x2e8   :  { %v3442_v3 = vpop.permute.xlu1 %3441 }
 0x2e9   :  { %v1723_v8 = vpop.permute.xlu0 %1722  ;;  %v3613_v39 = vsel %vm1769_vm13, %v3609_v21, %v3442_v3 }
 0x2ea   :  { %v1804_v42 = vsel %vm1774_vm14, %v1800_v46, %v1723_v8 }
 0x2ec   :  { %v3570_v0 = vpop.permute.xlu1 %3569 }
 0x2ed   :  { %v3476_v51 = vpop.permute.xlu0 %3475  ;;  %v3645_v27 = vsel %vm1774_vm14, %v3641_v22, %v3570_v0 }
 0x2ee   :  { %v3622_v6 = vsel %vm1779_vm15, %v3618_v29, %v3476_v51 }
 0x2ef   :  { %3682 = vmatpush1.msra.mxu1 %v3622_v6 }
 0x2f0   :  { %v1739_v9 = vpop.permute.xlu1 %1738 }
 0x2f1   :  { %v1611_v23 = vpop.permute.xlu0 %1610  ;;  %v1808_v56 = vsel %vm1779_vm15, %v1804_v42, %v1739_v9 }
 0x2f2   :  { %1854 = vmatprep.subr.mxu0 %v1808_v56  ;;  %v1775_v2 = vsel %vm1774_vm14, %v1770_v61, %v1611_v23 }
 0x2f4   :  { %v3586_v19 = vpop.permute.xlu1 %3585 }
 0x2f5   :  { %v3458_v12 = vpop.permute.xlu0 %3457  ;;  %v3649_v31 = vsel %vm1779_vm15, %v3645_v27, %v3586_v19 }
 0x2f6   :  { %3683 = vmatprep.subr.mxu1 %v3649_v31  ;;  %v3617_v37 = vsel %vm1774_vm14, %v3613_v39, %v3458_v12 }
 0x2f8   :  { %v3474_v26 = vpop.permute.xlu1 %3473 }
 0x2f9   :  { %v1627_v11 = vpop.permute.xlu0 %1626  ;;  %v3621_v33 = vsel %vm1779_vm15, %v3617_v37, %v3474_v26 }
 0x2fa   :  { %v1780_v40 = vsel %vm1779_vm15, %v1775_v2, %v1627_v11  ;;  %3684 = vmatpush1.msra.mxu1 %v3621_v33 }
 0x2fb   :  { %1855 = vmatpush1.msra.mxu0 %v1780_v40  ;;  %3786 = vmatmul.mubr.msk.f32.vlgmr.msra.gmra.mxu1 %vm1754_vm10, %v46_v28 }
 0x2fc   :  { %3772 = vmatmul.mubr.msk.f32.vlgmr.msra.gmra.mxu0 %vm1754_vm10, %v46_v28  ;;  %3723 = vmatprep.mubr.f32.mxu1 %v6841_v36 }
 0x2fd   :  { %1894 = vmatprep.mubr.f32.mxu0 %v6841_v36 }
 0x2ff   :  { %3787 = vmatmul.mubr.msk.f32.gmra.mxu1 %vm1754_vm10, %v47_v20 }
 0x300   :  { %3773 = vmatmul.mubr.msk.f32.gmra.mxu0 %vm1754_vm10, %v47_v20  ;;  %3729 = vmatprep.mubr.f32.mxu1 %v6841_v36 }
 0x301   :  { %1900 = vmatprep.mubr.f32.mxu0 %v6841_v36 }
 0x303   :  { %3788 = vmatmul.mubr.msk.f32.gmra.mxu1 %vm1754_vm10, %v48_v47 }
 0x304   :  { %3774 = vmatmul.mubr.msk.f32.gmra.mxu0 %vm1754_vm10, %v48_v47  ;;  %3735 = vmatprep.mubr.f32.mxu1 %v6841_v36 }
 0x305   :  { %1906 = vmatprep.mubr.f32.mxu0 %v6841_v36 }
 0x307   :  { %3789 = vmatmul.mubr.msk.f32.gmra.mxu1 %vm1754_vm10, %v49_v38 }
 0x308   :  { %3775 = vmatmul.mubr.msk.f32.gmra.mxu0 %vm1754_vm10, %v49_v38 }
 0x3bb   :  { %v3719_v24 = vpop.f32.mrf.mxu1 }
 0x3bc   :  { %v1890_v30 = vpop.f32.mrf.mxu0  ;;  %3790 = vst [vmem:[%s6480_s2 + $0x40] sm:$0xff] %v3719_v24 }
 0x3bd   :  { %1913 = vst [vmem:[%s6480_s2] sm:$0xff] %v1890_v30  ;;  %v3721_v10 = vpop.f32.mrf.mxu1 }
 0x3be   :  { %v1892_v62 = vpop.f32.mrf.mxu0  ;;  %3791 = vst [vmem:[%s6480_s2 + $0x48] sm:$0xff] %v3721_v10 }
 0x3bf   :  { %1914 = vst [vmem:[%s6480_s2 + $0x8] sm:$0xff] %v1892_v62  ;;  %v3725_v34 = vpop.f32.mrf.mxu1 }
 0x3c0   :  { %v1896_v63 = vpop.f32.mrf.mxu0  ;;  %3792 = vst [vmem:[%s6480_s2 + $0x50] sm:$0xff] %v3725_v34 }
 0x3c1   :  { %1915 = vst [vmem:[%s6480_s2 + $0x10] sm:$0xff] %v1896_v63  ;;  %v3727_v1 = vpop.f32.mrf.mxu1 }
 0x3c2   :  { %v1898_v13 = vpop.f32.mrf.mxu0  ;;  %3793 = vst [vmem:[%s6480_s2 + $0x58] sm:$0xff] %v3727_v1 }
 0x3c3   :  { %1916 = vst [vmem:[%s6480_s2 + $0x18] sm:$0xff] %v1898_v13  ;;  %v3731_v4 = vpop.f32.mrf.mxu1 }
 0x3c4   :  { %v1902_v44 = vpop.f32.mrf.mxu0  ;;  %3794 = vst [vmem:[%s6480_s2 + $0x60] sm:$0xff] %v3731_v4 }
 0x3c5   :  { %1917 = vst [vmem:[%s6480_s2 + $0x20] sm:$0xff] %v1902_v44  ;;  %v3733_v35 = vpop.f32.mrf.mxu1 }
 0x3c6   :  { %v1904_v54 = vpop.f32.mrf.mxu0  ;;  %3795 = vst [vmem:[%s6480_s2 + $0x68] sm:$0xff] %v3733_v35 }
 0x3c7   :  { %1918 = vst [vmem:[%s6480_s2 + $0x28] sm:$0xff] %v1904_v54  ;;  %v3737_v45 = vpop.f32.mrf.mxu1 }
 0x3c8   :  { %v1908_v7 = vpop.f32.mrf.mxu0  ;;  %3796 = vst [vmem:[%s6480_s2 + $0x70] sm:$0x3f] %v3737_v45 }
 0x3c9   :  { %1919 = vst [vmem:[%s6480_s2 + $0x30] sm:$0x3f] %v1908_v7  ;;  %v3739_v15 = vpop.f32.mrf.mxu1 }
 0x3ca   :  { %v1910_v50 = vpop.f32.mrf.mxu0  ;;  %3797 = vst [vmem:[%s6480_s2 + $0x78] sm:$0x3f] %v3739_v15 }
 0x3cb   :  { %1920 = vst [vmem:[%s6480_s2 + $0x38] sm:$0x3f] %v1910_v50 }

</bundles_post_ra>
